<compile_context>
chip_gen: v5e
topology: v5e:2x2
jax: 0.10.0
libtpu: 0.0.40
codegen_flags: <defaults>
</compile_context>

<pallas_src>
import functools

import numpy as np
import jax
import jax.numpy as jnp
from jax.experimental import pallas as pl
from jax.experimental.pallas import tpu as pltpu


# Set to jnp.bfloat16 on v6e/v7x for 2x MXU throughput (f32 accumulation is kept).
MATMUL_DTYPE = jnp.float32


def _c(x):
    return x.astype(MATMUL_DTYPE)


def _mm(a, b):
    return jnp.dot(_c(a), _c(b), preferred_element_type=jnp.float32)


# ----------------------------------------------------------------------------
# helpers (trace-time / host-side)
# ----------------------------------------------------------------------------
def _layer_norm(y, eps=1e-5):
    # torch.nn.LayerNorm(d_model) freshly constructed in forward -> weight=1, bias=0
    mu = jnp.mean(y, axis=-1, keepdims=True)
    var = jnp.mean((y - mu) ** 2, axis=-1, keepdims=True)
    return (y - mu) * jax.lax.rsqrt(var + eps)


def _positional_embedding(max_len, d_model):
    pe = np.zeros((max_len, d_model), np.float32)
    position = np.arange(max_len, dtype=np.float32)[:, None]
    div_term = np.exp(
        np.arange(0, d_model, 2, dtype=np.float32) * -(np.log(10000.0) / d_model))
    pe[:, 0::2] = np.sin(position * div_term)
    pe[:, 1::2] = np.cos(position * div_term)
    return jnp.asarray(pe)


# ----------------------------------------------------------------------------
# in-kernel multi-head attention on values (all heads batched; no per-head loop)
# ----------------------------------------------------------------------------
def _mha(xq, xkv, bias, wq, wk, wv, wo, d_k):
    """xq:(Lq,D)  xkv:(Lk,D)  bias:(Lq,Lk) additive (-1e9 on masked keys)
       wq,wk:(H,D,d_k)  wv:(H,D,d_v)  wo:(H,d_v,D)
       returns (LayerNorm(out + xq):(Lq,D), attn:(H,Lq,Lk))."""
    n_heads = wq.shape[0]
    xq_b = jnp.broadcast_to(xq[None], (n_heads,) + xq.shape)     # (H,Lq,D)
    xkv_b = jnp.broadcast_to(xkv[None], (n_heads,) + xkv.shape)  # (H,Lk,D)

    q = jnp.einsum("hqc,hcd->hqd", _c(xq_b), _c(wq), preferred_element_type=jnp.float32)
    k = jnp.einsum("hkc,hcd->hkd", _c(xkv_b), _c(wk), preferred_element_type=jnp.float32)
    v = jnp.einsum("hkc,hcd->hkd", _c(xkv_b), _c(wv), preferred_element_type=jnp.float32)

    scores = jnp.einsum("hqd,hkd->hqk", _c(q), _c(k), preferred_element_type=jnp.float32)
    scores = scores * (1.0 / float(np.sqrt(d_k))) + bias[None, :, :]

    m = jnp.max(scores, axis=-1, keepdims=True)
    e = jnp.exp(scores - m)
    attn = e * pl.reciprocal(jnp.sum(e, axis=-1, keepdims=True), approx=True)

    ctx = jnp.einsum("hqk,hkd->hqd", _c(attn), _c(v), preferred_element_type=jnp.float32)
    out_h = jnp.einsum("hqd,hdc->hqc", _c(ctx), _c(wo), preferred_element_type=jnp.float32)
    out = jnp.sum(out_h, axis=0)                      # == concat(heads) @ W_O
    return _layer_norm(out + xq), attn


# ----------------------------------------------------------------------------
# fused decoder kernel (one grid step = one batch element, whole decoder)
# ----------------------------------------------------------------------------
def _decoder_kernel(x_ref, enc_ref, sbias_ref, cbias_ref, pos_ref,
                    convw_ref, tw_ref, tb_ref,
                    swq_ref, swk_ref, swv_ref, swo_ref,
                    cwq_ref, cwk_ref, cwv_ref, cwo_ref,
                    w1_ref, w2_ref,
                    out_ref, sattn_ref, cattn_ref,
                    *, n_layers, n_heads, d_k, d_v):
    L = x_ref.shape[1]
    x = x_ref[0]            # (L, C)
    enc = enc_ref[0]        # (Ls, D)
    sbias = sbias_ref[0]    # (L, L)   additive mask bias
    cbias = cbias_ref[0]    # (L, Ls)  additive mask bias

    # ---- DataEmbedding: circular Conv1d(k=3, no bias) + Linear temporal + PE ----
    x_m1 = pltpu.roll(x, shift=1, axis=0)       # x[(t-1) % L]  (XLU rotate, free slot)
    x_p1 = pltpu.roll(x, shift=L - 1, axis=0)   # x[(t+1) % L]
    dec = (_mm(x_m1, convw_ref[0]) + _mm(x, convw_ref[1]) + _mm(x_p1, convw_ref[2])
           + _mm(x, tw_ref[...]) + tb_ref[...] + pos_ref[...])
    # TODO(synk): dropout inside DataEmbedding is identity in eval mode.

    # ---- decoder layers (static unroll; all weights already resident in VMEM) ----
    for l in range(n_layers):
        dec, sattn = _mha(dec, dec, sbias,
                          swq_ref[l], swk_ref[l], swv_ref[l], swo_ref[l], d_k)
        sattn_ref[0, l * n_heads:(l + 1) * n_heads, :, :] = sattn

        dec, cattn = _mha(dec, enc, cbias,
                          cwq_ref[l], cwk_ref[l], cwv_ref[l], cwo_ref[l], d_k)
        cattn_ref[0, l * n_heads:(l + 1) * n_heads, :, :] = cattn

        h = jnp.maximum(_mm(dec, w1_ref[l]), 0.0)          # Linear + ReLU
        dec = _layer_norm(_mm(h, w2_ref[l]) + dec)         # Linear + residual + LN

    out_ref[0] = dec


# ----------------------------------------------------------------------------
# masks (cheap glue, plain JAX, computed once outside the kernel)
# ----------------------------------------------------------------------------
def get_attn_pad_mask(seq_q, seq_k):
    # TODO(synk): original helper expects 2-D token-id sequences; for 3-D float
    # inputs we define "pad" as a key position whose feature vector is all zeros.
    B, len_q = seq_q.shape[0], seq_q.shape[1]
    len_k = seq_k.shape[1]
    pad = jnp.all(seq_k == 0, axis=-1)                               # (B, len_k)
    return jnp.broadcast_to(pad[:, None, :], (B, len_q, len_k)).astype(jnp.int32)


def get_attn_subsequence_mask(seq):
    B, L = seq.shape[0], seq.shape[1]
    sub = jnp.triu(jnp.ones((L, L), jnp.int32), k=1)
    return jnp.broadcast_to(sub[None], (B, L, L))


# ----------------------------------------------------------------------------
# parameter init (deterministic, synthetic); weights stored stacked & head-major
# ----------------------------------------------------------------------------
def init_decoder_params(key, *, dec_in, d_model, d_k, d_v, n_heads, d_ff,
                        n_layers, max_len=128):
    def nrm(k, shape, scale=0.1):
        return scale * jax.random.normal(k, shape, dtype=jnp.float32)

    keys = iter(jax.random.split(key, 3 + n_layers * 10))
    params = {
        "embed": {
            # transposed circular-Conv1d taps: W_j^T with shape (c_in, d_model), j=0,1,2
            "conv_wT": nrm(next(keys), (3, dec_in, d_model)),
            "temp_w": nrm(next(keys), (dec_in, d_model)),
            "temp_b": nrm(next(keys), (1, d_model)),
            "pos": _positional_embedding(max_len, d_model),
        },
    }

    def head_in(w):    # nn.Linear(d_model, H*d).weight.T (D, H*d) -> (H, D, d)
        return jnp.transpose(w.reshape(d_model, n_heads, -1), (1, 0, 2))

    def head_out(w):   # nn.Linear(H*d_v, d_model).weight.T (H*d_v, D) -> (H, d_v, D)
        return w.reshape(n_heads, d_v, d_model)

    names = ("self_wq", "self_wk", "self_wv", "self_wo",
             "cross_wq", "cross_wk", "cross_wv", "cross_wo",
             "ffn_w1", "ffn_w2")
    stacks = {n: [] for n in names}
    for _ in range(n_layers):
        stacks["self_wq"].append(head_in(nrm(next(keys), (d_model, n_heads * d_k))))
        stacks["self_wk"].append(head_in(nrm(next(keys), (d_model, n_heads * d_k))))
        stacks["self_wv"].append(head_in(nrm(next(keys), (d_model, n_heads * d_v))))
        stacks["self_wo"].append(head_out(nrm(next(keys), (n_heads * d_v, d_model))))
        stacks["cross_wq"].append(head_in(nrm(next(keys), (d_model, n_heads * d_k))))
        stacks["cross_wk"].append(head_in(nrm(next(keys), (d_model, n_heads * d_k))))
        stacks["cross_wv"].append(head_in(nrm(next(keys), (d_model, n_heads * d_v))))
        stacks["cross_wo"].append(head_out(nrm(next(keys), (n_heads * d_v, d_model))))
        stacks["ffn_w1"].append(nrm(next(keys), (d_model, d_ff)))
        stacks["ffn_w2"].append(nrm(next(keys), (d_ff, d_model)))
    for n in names:
        params[n] = jnp.stack(stacks[n], axis=0)
    return params


# ----------------------------------------------------------------------------
# Decoder.forward
# ----------------------------------------------------------------------------
def decoder_forward(params, dec_inputs, enc_inputs, enc_outputs, *, n_heads, d_k, d_v):
    B, Lq, C = dec_inputs.shape
    Ls = enc_outputs.shape[1]
    D = params["embed"]["temp_w"].shape[-1]
    n_layers = params["self_wq"].shape[0]
    d_ff = params["ffn_w1"].shape[-1]

    # masks -> additive bias, built once and reused by all layers inside the kernel
    pad_self = get_attn_pad_mask(dec_inputs, dec_inputs)
    subseq = get_attn_subsequence_mask(dec_inputs)
    self_bias = jnp.where((pad_self + subseq) > 0, -1e9, 0.0).astype(jnp.float32)
    cross_bias = jnp.where(get_attn_pad_mask(dec_inputs, enc_inputs) > 0,
                           -1e9, 0.0).astype(jnp.float32)
    pos = params["embed"]["pos"][:Lq]

    def per_batch(*rest):
        zeros = (0,) * len(rest)
        return pl.BlockSpec((1,) + rest, lambda b: (b,) + zeros)

    def replicated(*shape):
        zeros = (0,) * len(shape)
        return pl.BlockSpec(shape, lambda b: zeros)

    kernel = functools.partial(_decoder_kernel, n_layers=n_layers,
                               n_heads=n_heads, d_k=d_k, d_v=d_v)

    in_specs = [
        per_batch(Lq, C),                          # dec_inputs
        per_batch(Ls, D),                          # enc_outputs
        per_batch(Lq, Lq),                         # self-attn additive bias
        per_batch(Lq, Ls),                         # cross-attn additive bias
        replicated(Lq, D),                         # positional embedding
        replicated(3, C, D),                       # conv taps (transposed)
        replicated(C, D),                          # temporal Linear weight
        replicated(1, D),                          # temporal Linear bias
        replicated(n_layers, n_heads, D, d_k),     # self W_Q
        replicated(n_layers, n_heads, D, d_k),     # self W_K
        replicated(n_layers, n_heads, D, d_v),     # self W_V
        replicated(n_layers, n_heads, d_v, D),     # self W_O
        replicated(n_layers, n_heads, D, d_k),     # cross W_Q
        replicated(n_layers, n_heads, D, d_k),     # cross W_K
        replicated(n_layers, n_heads, D, d_v),     # cross W_V
        replicated(n_layers, n_heads, d_v, D),     # cross W_O
        replicated(n_layers, D, d_ff),             # FFN W1
        replicated(n_layers, d_ff, D),             # FFN W2
    ]
    out_specs = (
        per_batch(Lq, D),                          # decoder output
        per_batch(n_layers * n_heads, Lq, Lq),     # self-attn weights (all layers)
        per_batch(n_layers * n_heads, Lq, Ls),     # cross-attn weights (all layers)
    )
    out_shape = (
        jax.ShapeDtypeStruct((B, Lq, D), jnp.float32),
        jax.ShapeDtypeStruct((B, n_layers * n_heads, Lq, Lq), jnp.float32),
        jax.ShapeDtypeStruct((B, n_layers * n_heads, Lq, Ls), jnp.float32),
    )

    dec_out, sattn_all, cattn_all = pl.pallas_call(
        kernel,
        out_shape=out_shape,
        grid=(B,),
        in_specs=in_specs,
        out_specs=out_specs,
        compiler_params=pltpu.CompilerParams(dimension_semantics=("parallel",)),
    )(dec_inputs, enc_outputs, self_bias, cross_bias, pos,
      params["embed"]["conv_wT"], params["embed"]["temp_w"], params["embed"]["temp_b"],
      params["self_wq"], params["self_wk"], params["self_wv"], params["self_wo"],
      params["cross_wq"], params["cross_wk"], params["cross_wv"], params["cross_wo"],
      params["ffn_w1"], params["ffn_w2"])

    self_attns = [sattn_all[:, l * n_heads:(l + 1) * n_heads] for l in range(n_layers)]
    enc_attns = [cattn_all[:, l * n_heads:(l + 1) * n_heads] for l in range(n_layers)]
    return dec_out, self_attns, enc_attns


# ----------------------------------------------------------------------------
# main
# ----------------------------------------------------------------------------
if __name__ == "__main__":
    B = 2
    tgt_len = 8
    src_len = 8
    dec_in = 4       # decoder_in_size
    enc_in = 4
    d_model = 32
    d_k = d_v = 8
    n_heads = 4
    d_ff = 64
    n_layers = 2

    root = jax.random.PRNGKey(0)
    k_par, k_dec, k_enc_in, k_enc_out = jax.random.split(root, 4)

    params = init_decoder_params(
        k_par, dec_in=dec_in, d_model=d_model, d_k=d_k, d_v=d_v,
        n_heads=n_heads, d_ff=d_ff, n_layers=n_layers)

    dec_inputs = jax.random.normal(k_dec, (B, tgt_len, dec_in), dtype=jnp.float32)
    enc_inputs = jax.random.normal(k_enc_in, (B, src_len, enc_in), dtype=jnp.float32)
    enc_outputs = jax.random.normal(k_enc_out, (B, src_len, d_model), dtype=jnp.float32)

    fwd = jax.jit(functools.partial(decoder_forward, n_heads=n_heads, d_k=d_k, d_v=d_v))
    dec_out, self_attns, enc_attns = fwd(params, dec_inputs, enc_inputs, enc_outputs)

    jax.block_until_ready(dec_out)
    for a in self_attns + enc_attns:
        jax.block_until_ready(a)

    assert dec_out.shape == (B, tgt_len, d_model)
    assert len(self_attns) == n_layers and len(enc_attns) == n_layers
    assert self_attns[0].shape == (B, n_heads, tgt_len, tgt_len)
    assert enc_attns[0].shape == (B, n_heads, tgt_len, src_len)
    assert bool(jnp.all(jnp.isfinite(dec_out)))
    for a in self_attns + enc_attns:
        assert bool(jnp.all(jnp.isfinite(a)))
    print("KERNEL_OK")
</pallas_src>

<mosaic_0001>
module attributes {stable_mosaic.version = 11 : i64} {
  func.func @_decoder_kernel(%arg0: i32, %arg1: memref<1x8x4xf32, #tpu.memory_space<vmem>>, %arg2: memref<1x8x32xf32, #tpu.memory_space<vmem>>, %arg3: memref<1x8x8xf32, #tpu.memory_space<vmem>>, %arg4: memref<1x8x8xf32, #tpu.memory_space<vmem>>, %arg5: memref<8x32xf32, #tpu.memory_space<vmem>>, %arg6: memref<3x4x32xf32, #tpu.memory_space<vmem>>, %arg7: memref<4x32xf32, #tpu.memory_space<vmem>>, %arg8: memref<1x32xf32, #tpu.memory_space<vmem>>, %arg9: memref<2x4x32x8xf32, #tpu.memory_space<vmem>>, %arg10: memref<2x4x32x8xf32, #tpu.memory_space<vmem>>, %arg11: memref<2x4x32x8xf32, #tpu.memory_space<vmem>>, %arg12: memref<2x4x8x32xf32, #tpu.memory_space<vmem>>, %arg13: memref<2x4x32x8xf32, #tpu.memory_space<vmem>>, %arg14: memref<2x4x32x8xf32, #tpu.memory_space<vmem>>, %arg15: memref<2x4x32x8xf32, #tpu.memory_space<vmem>>, %arg16: memref<2x4x8x32xf32, #tpu.memory_space<vmem>>, %arg17: memref<2x32x64xf32, #tpu.memory_space<vmem>>, %arg18: memref<2x64x32xf32, #tpu.memory_space<vmem>>, %arg19: memref<1x8x32xf32, #tpu.memory_space<vmem>>, %arg20: memref<1x8x8x8xf32, #tpu.memory_space<vmem>>, %arg21: memref<1x8x8x8xf32, #tpu.memory_space<vmem>>) attributes {dimension_semantics = [#tpu.dimension_semantics<parallel>], iteration_bounds = array<i64: 2>, scalar_prefetch = 0 : i64, scratch_operands = 0 : i64, tpu.core_type = #tpu.core_type<tc>, window_params = [{transform_indices = @transform_0, window_bounds = array<i64: 1, 8, 4>}, {transform_indices = @transform_1, window_bounds = array<i64: 1, 8, 32>}, {transform_indices = @transform_2, window_bounds = array<i64: 1, 8, 8>}, {transform_indices = @transform_3, window_bounds = array<i64: 1, 8, 8>}, {pipeline_mode = #tpu.pipeline_mode<synchronous>, transform_indices = @transform_4, window_bounds = array<i64: 8, 32>}, {pipeline_mode = #tpu.pipeline_mode<synchronous>, transform_indices = @transform_5, window_bounds = array<i64: 3, 4, 32>}, {pipeline_mode = #tpu.pipeline_mode<synchronous>, transform_indices = @transform_6, window_bounds = array<i64: 4, 32>}, {pipeline_mode = #tpu.pipeline_mode<synchronous>, transform_indices = @transform_7, window_bounds = array<i64: 1, 32>}, {pipeline_mode = #tpu.pipeline_mode<synchronous>, transform_indices = @transform_8, window_bounds = array<i64: 2, 4, 32, 8>}, {pipeline_mode = #tpu.pipeline_mode<synchronous>, transform_indices = @transform_9, window_bounds = array<i64: 2, 4, 32, 8>}, {pipeline_mode = #tpu.pipeline_mode<synchronous>, transform_indices = @transform_10, window_bounds = array<i64: 2, 4, 32, 8>}, {pipeline_mode = #tpu.pipeline_mode<synchronous>, transform_indices = @transform_11, window_bounds = array<i64: 2, 4, 8, 32>}, {pipeline_mode = #tpu.pipeline_mode<synchronous>, transform_indices = @transform_12, window_bounds = array<i64: 2, 4, 32, 8>}, {pipeline_mode = #tpu.pipeline_mode<synchronous>, transform_indices = @transform_13, window_bounds = array<i64: 2, 4, 32, 8>}, {pipeline_mode = #tpu.pipeline_mode<synchronous>, transform_indices = @transform_14, window_bounds = array<i64: 2, 4, 32, 8>}, {pipeline_mode = #tpu.pipeline_mode<synchronous>, transform_indices = @transform_15, window_bounds = array<i64: 2, 4, 8, 32>}, {pipeline_mode = #tpu.pipeline_mode<synchronous>, transform_indices = @transform_16, window_bounds = array<i64: 2, 32, 64>}, {pipeline_mode = #tpu.pipeline_mode<synchronous>, transform_indices = @transform_17, window_bounds = array<i64: 2, 64, 32>}, {transform_indices = @transform_18, window_bounds = array<i64: 1, 8, 32>}, {transform_indices = @transform_19, window_bounds = array<i64: 1, 8, 8, 8>}, {transform_indices = @transform_20, window_bounds = array<i64: 1, 8, 8, 8>}]} {
    %c0 = arith.constant 0 : index
    %c0_0 = arith.constant 0 : index
    %c0_1 = arith.constant 0 : index
    %0 = vector.load %arg1[%c0, %c0_0, %c0_1] : memref<1x8x4xf32, #tpu.memory_space<vmem>>, vector<1x8x4xf32>
    %1 = vector.shape_cast %0 : vector<1x8x4xf32> to vector<8x4xf32>
    %c0_2 = arith.constant 0 : index
    %c0_3 = arith.constant 0 : index
    %c0_4 = arith.constant 0 : index
    %2 = vector.load %arg2[%c0_2, %c0_3, %c0_4] : memref<1x8x32xf32, #tpu.memory_space<vmem>>, vector<1x8x32xf32>
    %3 = vector.shape_cast %2 : vector<1x8x32xf32> to vector<8x32xf32>
    %c0_5 = arith.constant 0 : index
    %c0_6 = arith.constant 0 : index
    %c0_7 = arith.constant 0 : index
    %4 = vector.load %arg3[%c0_5, %c0_6, %c0_7] : memref<1x8x8xf32, #tpu.memory_space<vmem>>, vector<1x8x8xf32>
    %5 = vector.shape_cast %4 : vector<1x8x8xf32> to vector<8x8xf32>
    %c0_8 = arith.constant 0 : index
    %c0_9 = arith.constant 0 : index
    %c0_10 = arith.constant 0 : index
    %6 = vector.load %arg4[%c0_8, %c0_9, %c0_10] : memref<1x8x8xf32, #tpu.memory_space<vmem>>, vector<1x8x8xf32>
    %7 = vector.shape_cast %6 : vector<1x8x8xf32> to vector<8x8xf32>
    %c1_i32 = arith.constant 1 : i32
    %8 = tpu.dynamic_rotate %1 by %c1_i32 dim 0 : vector<8x4xf32>, i32 -> vector<8x4xf32>
    %c7_i32 = arith.constant 7 : i32
    %9 = tpu.dynamic_rotate %1 by %c7_i32 dim 0 : vector<8x4xf32>, i32 -> vector<8x4xf32>
    %c0_11 = arith.constant 0 : index
    %c0_12 = arith.constant 0 : index
    %c0_13 = arith.constant 0 : index
    %10 = vector.load %arg6[%c0_11, %c0_12, %c0_13] : memref<3x4x32xf32, #tpu.memory_space<vmem>>, vector<1x4x32xf32>
    %11 = vector.shape_cast %10 : vector<1x4x32xf32> to vector<4x32xf32>
    %cst = arith.constant dense<0.000000e+00> : vector<8x32xf32>
    %12 = tpu.matmul %8, %11, %cst {dimension_numbers = #tpu.dot_dimension_numbers<[1], [0], [0], [1], [0, 0, 1, 1], [], []>} : vector<8x4xf32>, vector<4x32xf32>, vector<8x32xf32> -> vector<8x32xf32>
    %c1 = arith.constant 1 : index
    %c0_14 = arith.constant 0 : index
    %c0_15 = arith.constant 0 : index
    %13 = vector.load %arg6[%c1, %c0_14, %c0_15] : memref<3x4x32xf32, #tpu.memory_space<vmem>>, vector<1x4x32xf32>
    %14 = vector.shape_cast %13 : vector<1x4x32xf32> to vector<4x32xf32>
    %cst_16 = arith.constant dense<0.000000e+00> : vector<8x32xf32>
    %15 = tpu.matmul %1, %14, %cst_16 {dimension_numbers = #tpu.dot_dimension_numbers<[1], [0], [0], [1], [0, 0, 1, 1], [], []>} : vector<8x4xf32>, vector<4x32xf32>, vector<8x32xf32> -> vector<8x32xf32>
    %16 = arith.addf %12, %15 : vector<8x32xf32>
    %c2 = arith.constant 2 : index
    %c0_17 = arith.constant 0 : index
    %c0_18 = arith.constant 0 : index
    %17 = vector.load %arg6[%c2, %c0_17, %c0_18] : memref<3x4x32xf32, #tpu.memory_space<vmem>>, vector<1x4x32xf32>
    %18 = vector.shape_cast %17 : vector<1x4x32xf32> to vector<4x32xf32>
    %cst_19 = arith.constant dense<0.000000e+00> : vector<8x32xf32>
    %19 = tpu.matmul %9, %18, %cst_19 {dimension_numbers = #tpu.dot_dimension_numbers<[1], [0], [0], [1], [0, 0, 1, 1], [], []>} : vector<8x4xf32>, vector<4x32xf32>, vector<8x32xf32> -> vector<8x32xf32>
    %20 = arith.addf %16, %19 : vector<8x32xf32>
    %c0_20 = arith.constant 0 : index
    %c0_21 = arith.constant 0 : index
    %21 = vector.load %arg7[%c0_20, %c0_21] : memref<4x32xf32, #tpu.memory_space<vmem>>, vector<4x32xf32>
    %cst_22 = arith.constant dense<0.000000e+00> : vector<8x32xf32>
    %22 = tpu.matmul %1, %21, %cst_22 {dimension_numbers = #tpu.dot_dimension_numbers<[1], [0], [0], [1], [0, 0, 1, 1], [], []>} : vector<8x4xf32>, vector<4x32xf32>, vector<8x32xf32> -> vector<8x32xf32>
    %23 = arith.addf %20, %22 : vector<8x32xf32>
    %c0_23 = arith.constant 0 : index
    %c0_24 = arith.constant 0 : index
    %24 = vector.load %arg8[%c0_23, %c0_24] : memref<1x32xf32, #tpu.memory_space<vmem>>, vector<1x32xf32>
    %25 = vector.broadcast %24 : vector<1x32xf32> to vector<8x32xf32>
    %26 = arith.addf %23, %25 : vector<8x32xf32>
    %c0_25 = arith.constant 0 : index
    %c0_26 = arith.constant 0 : index
    %27 = vector.load %arg5[%c0_25, %c0_26] : memref<8x32xf32, #tpu.memory_space<vmem>>, vector<8x32xf32>
    %28 = arith.addf %26, %27 : vector<8x32xf32>
    %c0_27 = arith.constant 0 : index
    %c0_28 = arith.constant 0 : index
    %c0_29 = arith.constant 0 : index
    %c0_30 = arith.constant 0 : index
    %29 = vector.load %arg9[%c0_27, %c0_28, %c0_29, %c0_30] : memref<2x4x32x8xf32, #tpu.memory_space<vmem>>, vector<1x4x32x8xf32>
    %30 = vector.shape_cast %29 : vector<1x4x32x8xf32> to vector<4x32x8xf32>
    %c0_31 = arith.constant 0 : index
    %c0_32 = arith.constant 0 : index
    %c0_33 = arith.constant 0 : index
    %c0_34 = arith.constant 0 : index
    %31 = vector.load %arg10[%c0_31, %c0_32, %c0_33, %c0_34] : memref<2x4x32x8xf32, #tpu.memory_space<vmem>>, vector<1x4x32x8xf32>
    %32 = vector.shape_cast %31 : vector<1x4x32x8xf32> to vector<4x32x8xf32>
    %c0_35 = arith.constant 0 : index
    %c0_36 = arith.constant 0 : index
    %c0_37 = arith.constant 0 : index
    %c0_38 = arith.constant 0 : index
    %33 = vector.load %arg11[%c0_35, %c0_36, %c0_37, %c0_38] : memref<2x4x32x8xf32, #tpu.memory_space<vmem>>, vector<1x4x32x8xf32>
    %34 = vector.shape_cast %33 : vector<1x4x32x8xf32> to vector<4x32x8xf32>
    %c0_39 = arith.constant 0 : index
    %c0_40 = arith.constant 0 : index
    %c0_41 = arith.constant 0 : index
    %c0_42 = arith.constant 0 : index
    %35 = vector.load %arg12[%c0_39, %c0_40, %c0_41, %c0_42] : memref<2x4x8x32xf32, #tpu.memory_space<vmem>>, vector<1x4x8x32xf32>
    %36 = vector.shape_cast %35 : vector<1x4x8x32xf32> to vector<4x8x32xf32>
    %37 = vector.shape_cast %28 : vector<8x32xf32> to vector<1x8x32xf32>
    %38 = vector.shape_cast %37 : vector<1x8x32xf32> to vector<1x8x32xf32>
    %39 = vector.broadcast %38 : vector<1x8x32xf32> to vector<4x8x32xf32>
    %40 = vector.shape_cast %28 : vector<8x32xf32> to vector<1x8x32xf32>
    %41 = vector.shape_cast %40 : vector<1x8x32xf32> to vector<1x8x32xf32>
    %42 = vector.broadcast %41 : vector<1x8x32xf32> to vector<4x8x32xf32>
    "tpu.trace_start"() <{level = 10 : i32, message = "hqc,hcd->hqd"}> : () -> ()
    %cst_43 = arith.constant dense<0.000000e+00> : vector<4x8x8xf32>
    %43 = tpu.matmul %39, %30, %cst_43 {dimension_numbers = #tpu.dot_dimension_numbers<[2], [1], [1], [2], [0, 0, 0, 1, 1, 2], [0], [0]>} : vector<4x8x32xf32>, vector<4x32x8xf32>, vector<4x8x8xf32> -> vector<4x8x8xf32>
    "tpu.trace_stop"() : () -> ()
    "tpu.trace_start"() <{level = 10 : i32, message = "hkc,hcd->hkd"}> : () -> ()
    %cst_44 = arith.constant dense<0.000000e+00> : vector<4x8x8xf32>
    %44 = tpu.matmul %42, %32, %cst_44 {dimension_numbers = #tpu.dot_dimension_numbers<[2], [1], [1], [2], [0, 0, 0, 1, 1, 2], [0], [0]>} : vector<4x8x32xf32>, vector<4x32x8xf32>, vector<4x8x8xf32> -> vector<4x8x8xf32>
    %cst_45 = arith.constant dense<0.000000e+00> : vector<4x8x8xf32>
    %45 = tpu.matmul %42, %34, %cst_45 {dimension_numbers = #tpu.dot_dimension_numbers<[2], [1], [1], [2], [0, 0, 0, 1, 1, 2], [0], [0]>} : vector<4x8x32xf32>, vector<4x32x8xf32>, vector<4x8x8xf32> -> vector<4x8x8xf32>
    "tpu.trace_stop"() : () -> ()
    "tpu.trace_start"() <{level = 10 : i32, message = "hqd,hkd->hqk"}> : () -> ()
    %cst_46 = arith.constant dense<0.000000e+00> : vector<4x8x8xf32>
    %46 = tpu.matmul %43, %44, %cst_46 {dimension_numbers = #tpu.dot_dimension_numbers<[2], [2], [1], [1], [0, 0, 0, 1, 1, 1], [0], [0]>} : vector<4x8x8xf32>, vector<4x8x8xf32>, vector<4x8x8xf32> -> vector<4x8x8xf32>
    "tpu.trace_stop"() : () -> ()
    %cst_47 = arith.constant 0.353553385 : f32
    %47 = vector.broadcast %cst_47 : f32 to vector<4x8x8xf32>
    %48 = arith.mulf %46, %47 : vector<4x8x8xf32>
    %49 = vector.shape_cast %5 : vector<8x8xf32> to vector<1x8x8xf32>
    %50 = vector.broadcast %49 : vector<1x8x8xf32> to vector<4x8x8xf32>
    %51 = arith.addf %48, %50 : vector<4x8x8xf32>
    %cst_48 = arith.constant dense<0xFF800000> : vector<4x8xf32>
    %52 = vector.multi_reduction <maximumf>, %51, %cst_48 [2] : vector<4x8x8xf32> to vector<4x8xf32>
    %53 = vector.shape_cast %52 : vector<4x8xf32> to vector<4x8x1xf32>
    %54 = vector.broadcast %53 : vector<4x8x1xf32> to vector<4x8x8xf32>
    %55 = arith.subf %51, %54 : vector<4x8x8xf32>
    %56 = math.exp %55 : vector<4x8x8xf32>
    %cst_49 = arith.constant dense<0.000000e+00> : vector<4x8xf32>
    %57 = vector.multi_reduction <add>, %56, %cst_49 [2] : vector<4x8x8xf32> to vector<4x8xf32>
    %58 = vector.shape_cast %57 : vector<4x8xf32> to vector<4x8x1xf32>
    %59 = tpu.reciprocal %58 {approx = true} : vector<4x8x1xf32> -> vector<4x8x1xf32>
    %60 = vector.broadcast %59 : vector<4x8x1xf32> to vector<4x8x8xf32>
    %61 = arith.mulf %56, %60 : vector<4x8x8xf32>
    "tpu.trace_start"() <{level = 10 : i32, message = "hqk,hkd->hqd"}> : () -> ()
    %cst_50 = arith.constant dense<0.000000e+00> : vector<4x8x8xf32>
    %62 = tpu.matmul %61, %45, %cst_50 {dimension_numbers = #tpu.dot_dimension_numbers<[2], [1], [1], [2], [0, 0, 0, 1, 1, 2], [0], [0]>} : vector<4x8x8xf32>, vector<4x8x8xf32>, vector<4x8x8xf32> -> vector<4x8x8xf32>
    "tpu.trace_stop"() : () -> ()
    "tpu.trace_start"() <{level = 10 : i32, message = "hqd,hdc->hqc"}> : () -> ()
    %cst_51 = arith.constant dense<0.000000e+00> : vector<4x8x32xf32>
    %63 = tpu.matmul %62, %36, %cst_51 {dimension_numbers = #tpu.dot_dimension_numbers<[2], [1], [1], [2], [0, 0, 0, 1, 1, 2], [0], [0]>} : vector<4x8x8xf32>, vector<4x8x32xf32>, vector<4x8x32xf32> -> vector<4x8x32xf32>
    "tpu.trace_stop"() : () -> ()
    %cst_52 = arith.constant dense<0.000000e+00> : vector<8x32xf32>
    %64 = vector.multi_reduction <add>, %63, %cst_52 [0] : vector<4x8x32xf32> to vector<8x32xf32>
    %65 = arith.addf %64, %28 : vector<8x32xf32>
    %cst_53 = arith.constant dense<0.000000e+00> : vector<8xf32>
    %66 = vector.multi_reduction <add>, %65, %cst_53 [1] : vector<8x32xf32> to vector<8xf32>
    %67 = vector.shape_cast %66 : vector<8xf32> to vector<8x1xf32>
    %cst_54 = arith.constant 3.200000e+01 : f32
    %68 = vector.broadcast %cst_54 : f32 to vector<8x1xf32>
    %69 = arith.divf %67, %68 : vector<8x1xf32>
    %70 = vector.broadcast %69 : vector<8x1xf32> to vector<8x32xf32>
    %71 = arith.subf %65, %70 : vector<8x32xf32>
    %72 = arith.mulf %71, %71 : vector<8x32xf32>
    %cst_55 = arith.constant dense<0.000000e+00> : vector<8xf32>
    %73 = vector.multi_reduction <add>, %72, %cst_55 [1] : vector<8x32xf32> to vector<8xf32>
    %74 = vector.shape_cast %73 : vector<8xf32> to vector<8x1xf32>
    %cst_56 = arith.constant 3.200000e+01 : f32
    %75 = vector.broadcast %cst_56 : f32 to vector<8x1xf32>
    %76 = arith.divf %74, %75 : vector<8x1xf32>
    %77 = vector.broadcast %69 : vector<8x1xf32> to vector<8x32xf32>
    %78 = arith.subf %65, %77 : vector<8x32xf32>
    %cst_57 = arith.constant 9.99999974E-6 : f32
    %79 = vector.broadcast %cst_57 : f32 to vector<8x1xf32>
    %80 = arith.addf %76, %79 : vector<8x1xf32>
    %81 = math.rsqrt %80 : vector<8x1xf32>
    %82 = vector.broadcast %81 : vector<8x1xf32> to vector<8x32xf32>
    %83 = arith.mulf %78, %82 : vector<8x32xf32>
    %c0_58 = arith.constant 0 : index
    %c0_59 = arith.constant 0 : index
    %c0_60 = arith.constant 0 : index
    %c0_61 = arith.constant 0 : index
    %84 = vector.load %arg20[%c0_58, %c0_59, %c0_60, %c0_61] : memref<1x8x8x8xf32, #tpu.memory_space<vmem>>, vector<1x4x8x8xf32>
    %85 = vector.shape_cast %84 : vector<1x4x8x8xf32> to vector<4x8x8xf32>
    %86 = vector.shape_cast %61 : vector<4x8x8xf32> to vector<1x4x8x8xf32>
    tpu.vector_store %arg20[%c0_58, %c0_59, %c0_60, %c0_61], %86 {strides = array<i32>} : memref<1x8x8x8xf32, #tpu.memory_space<vmem>>, vector<1x4x8x8xf32>,
    %c0_62 = arith.constant 0 : index
    %c0_63 = arith.constant 0 : index
    %c0_64 = arith.constant 0 : index
    %c0_65 = arith.constant 0 : index
    %87 = vector.load %arg13[%c0_62, %c0_63, %c0_64, %c0_65] : memref<2x4x32x8xf32, #tpu.memory_space<vmem>>, vector<1x4x32x8xf32>
    %88 = vector.shape_cast %87 : vector<1x4x32x8xf32> to vector<4x32x8xf32>
    %c0_66 = arith.constant 0 : index
    %c0_67 = arith.constant 0 : index
    %c0_68 = arith.constant 0 : index
    %c0_69 = arith.constant 0 : index
    %89 = vector.load %arg14[%c0_66, %c0_67, %c0_68, %c0_69] : memref<2x4x32x8xf32, #tpu.memory_space<vmem>>, vector<1x4x32x8xf32>
    %90 = vector.shape_cast %89 : vector<1x4x32x8xf32> to vector<4x32x8xf32>
    %c0_70 = arith.constant 0 : index
    %c0_71 = arith.constant 0 : index
    %c0_72 = arith.constant 0 : index
    %c0_73 = arith.constant 0 : index
    %91 = vector.load %arg15[%c0_70, %c0_71, %c0_72, %c0_73] : memref<2x4x32x8xf32, #tpu.memory_space<vmem>>, vector<1x4x32x8xf32>
    %92 = vector.shape_cast %91 : vector<1x4x32x8xf32> to vector<4x32x8xf32>
    %c0_74 = arith.constant 0 : index
    %c0_75 = arith.constant 0 : index
    %c0_76 = arith.constant 0 : index
    %c0_77 = arith.constant 0 : index
    %93 = vector.load %arg16[%c0_74, %c0_75, %c0_76, %c0_77] : memref<2x4x8x32xf32, #tpu.memory_space<vmem>>, vector<1x4x8x32xf32>
    %94 = vector.shape_cast %93 : vector<1x4x8x32xf32> to vector<4x8x32xf32>
    %95 = vector.shape_cast %83 : vector<8x32xf32> to vector<1x8x32xf32>
    %96 = vector.shape_cast %95 : vector<1x8x32xf32> to vector<1x8x32xf32>
    %97 = vector.broadcast %96 : vector<1x8x32xf32> to vector<4x8x32xf32>
    %98 = vector.shape_cast %3 : vector<8x32xf32> to vector<1x8x32xf32>
    %99 = vector.shape_cast %98 : vector<1x8x32xf32> to vector<1x8x32xf32>
    %100 = vector.broadcast %99 : vector<1x8x32xf32> to vector<4x8x32xf32>
    "tpu.trace_start"() <{level = 10 : i32, message = "hqc,hcd->hqd"}> : () -> ()
    %cst_78 = arith.constant dense<0.000000e+00> : vector<4x8x8xf32>
    %101 = tpu.matmul %97, %88, %cst_78 {dimension_numbers = #tpu.dot_dimension_numbers<[2], [1], [1], [2], [0, 0, 0, 1, 1, 2], [0], [0]>} : vector<4x8x32xf32>, vector<4x32x8xf32>, vector<4x8x8xf32> -> vector<4x8x8xf32>
    "tpu.trace_stop"() : () -> ()
    "tpu.trace_start"() <{level = 10 : i32, message = "hkc,hcd->hkd"}> : () -> ()
    %cst_79 = arith.constant dense<0.000000e+00> : vector<4x8x8xf32>
    %102 = tpu.matmul %100, %90, %cst_79 {dimension_numbers = #tpu.dot_dimension_numbers<[2], [1], [1], [2], [0, 0, 0, 1, 1, 2], [0], [0]>} : vector<4x8x32xf32>, vector<4x32x8xf32>, vector<4x8x8xf32> -> vector<4x8x8xf32>
    %cst_80 = arith.constant dense<0.000000e+00> : vector<4x8x8xf32>
    %103 = tpu.matmul %100, %92, %cst_80 {dimension_numbers = #tpu.dot_dimension_numbers<[2], [1], [1], [2], [0, 0, 0, 1, 1, 2], [0], [0]>} : vector<4x8x32xf32>, vector<4x32x8xf32>, vector<4x8x8xf32> -> vector<4x8x8xf32>
    "tpu.trace_stop"() : () -> ()
    "tpu.trace_start"() <{level = 10 : i32, message = "hqd,hkd->hqk"}> : () -> ()
    %cst_81 = arith.constant dense<0.000000e+00> : vector<4x8x8xf32>
    %104 = tpu.matmul %101, %102, %cst_81 {dimension_numbers = #tpu.dot_dimension_numbers<[2], [2], [1], [1], [0, 0, 0, 1, 1, 1], [0], [0]>} : vector<4x8x8xf32>, vector<4x8x8xf32>, vector<4x8x8xf32> -> vector<4x8x8xf32>
    "tpu.trace_stop"() : () -> ()
    %cst_82 = arith.constant 0.353553385 : f32
    %105 = vector.broadcast %cst_82 : f32 to vector<4x8x8xf32>
    %106 = arith.mulf %104, %105 : vector<4x8x8xf32>
    %107 = vector.shape_cast %7 : vector<8x8xf32> to vector<1x8x8xf32>
    %108 = vector.broadcast %107 : vector<1x8x8xf32> to vector<4x8x8xf32>
    %109 = arith.addf %106, %108 : vector<4x8x8xf32>
    %cst_83 = arith.constant dense<0xFF800000> : vector<4x8xf32>
    %110 = vector.multi_reduction <maximumf>, %109, %cst_83 [2] : vector<4x8x8xf32> to vector<4x8xf32>
    %111 = vector.shape_cast %110 : vector<4x8xf32> to vector<4x8x1xf32>
    %112 = vector.broadcast %111 : vector<4x8x1xf32> to vector<4x8x8xf32>
    %113 = arith.subf %109, %112 : vector<4x8x8xf32>
    %114 = math.exp %113 : vector<4x8x8xf32>
    %cst_84 = arith.constant dense<0.000000e+00> : vector<4x8xf32>
    %115 = vector.multi_reduction <add>, %114, %cst_84 [2] : vector<4x8x8xf32> to vector<4x8xf32>
    %116 = vector.shape_cast %115 : vector<4x8xf32> to vector<4x8x1xf32>
    %117 = tpu.reciprocal %116 {approx = true} : vector<4x8x1xf32> -> vector<4x8x1xf32>
    %118 = vector.broadcast %117 : vector<4x8x1xf32> to vector<4x8x8xf32>
    %119 = arith.mulf %114, %118 : vector<4x8x8xf32>
    "tpu.trace_start"() <{level = 10 : i32, message = "hqk,hkd->hqd"}> : () -> ()
    %cst_85 = arith.constant dense<0.000000e+00> : vector<4x8x8xf32>
    %120 = tpu.matmul %119, %103, %cst_85 {dimension_numbers = #tpu.dot_dimension_numbers<[2], [1], [1], [2], [0, 0, 0, 1, 1, 2], [0], [0]>} : vector<4x8x8xf32>, vector<4x8x8xf32>, vector<4x8x8xf32> -> vector<4x8x8xf32>
    "tpu.trace_stop"() : () -> ()
    "tpu.trace_start"() <{level = 10 : i32, message = "hqd,hdc->hqc"}> : () -> ()
    %cst_86 = arith.constant dense<0.000000e+00> : vector<4x8x32xf32>
    %121 = tpu.matmul %120, %94, %cst_86 {dimension_numbers = #tpu.dot_dimension_numbers<[2], [1], [1], [2], [0, 0, 0, 1, 1, 2], [0], [0]>} : vector<4x8x8xf32>, vector<4x8x32xf32>, vector<4x8x32xf32> -> vector<4x8x32xf32>
    "tpu.trace_stop"() : () -> ()
    %cst_87 = arith.constant dense<0.000000e+00> : vector<8x32xf32>
    %122 = vector.multi_reduction <add>, %121, %cst_87 [0] : vector<4x8x32xf32> to vector<8x32xf32>
    %123 = arith.addf %122, %83 : vector<8x32xf32>
    %cst_88 = arith.constant dense<0.000000e+00> : vector<8xf32>
    %124 = vector.multi_reduction <add>, %123, %cst_88 [1] : vector<8x32xf32> to vector<8xf32>
    %125 = vector.shape_cast %124 : vector<8xf32> to vector<8x1xf32>
    %cst_89 = arith.constant 3.200000e+01 : f32
    %126 = vector.broadcast %cst_89 : f32 to vector<8x1xf32>
    %127 = arith.divf %125, %126 : vector<8x1xf32>
    %128 = vector.broadcast %127 : vector<8x1xf32> to vector<8x32xf32>
    %129 = arith.subf %123, %128 : vector<8x32xf32>
    %130 = arith.mulf %129, %129 : vector<8x32xf32>
    %cst_90 = arith.constant dense<0.000000e+00> : vector<8xf32>
    %131 = vector.multi_reduction <add>, %130, %cst_90 [1] : vector<8x32xf32> to vector<8xf32>
    %132 = vector.shape_cast %131 : vector<8xf32> to vector<8x1xf32>
    %cst_91 = arith.constant 3.200000e+01 : f32
    %133 = vector.broadcast %cst_91 : f32 to vector<8x1xf32>
    %134 = arith.divf %132, %133 : vector<8x1xf32>
    %135 = vector.broadcast %127 : vector<8x1xf32> to vector<8x32xf32>
    %136 = arith.subf %123, %135 : vector<8x32xf32>
    %cst_92 = arith.constant 9.99999974E-6 : f32
    %137 = vector.broadcast %cst_92 : f32 to vector<8x1xf32>
    %138 = arith.addf %134, %137 : vector<8x1xf32>
    %139 = math.rsqrt %138 : vector<8x1xf32>
    %140 = vector.broadcast %139 : vector<8x1xf32> to vector<8x32xf32>
    %141 = arith.mulf %136, %140 : vector<8x32xf32>
    %c0_93 = arith.constant 0 : index
    %c0_94 = arith.constant 0 : index
    %c0_95 = arith.constant 0 : index
    %c0_96 = arith.constant 0 : index
    %142 = vector.load %arg21[%c0_93, %c0_94, %c0_95, %c0_96] : memref<1x8x8x8xf32, #tpu.memory_space<vmem>>, vector<1x4x8x8xf32>
    %143 = vector.shape_cast %142 : vector<1x4x8x8xf32> to vector<4x8x8xf32>
    %144 = vector.shape_cast %119 : vector<4x8x8xf32> to vector<1x4x8x8xf32>
    tpu.vector_store %arg21[%c0_93, %c0_94, %c0_95, %c0_96], %144 {strides = array<i32>} : memref<1x8x8x8xf32, #tpu.memory_space<vmem>>, vector<1x4x8x8xf32>,
    %c0_97 = arith.constant 0 : index
    %c0_98 = arith.constant 0 : index
    %c0_99 = arith.constant 0 : index
    %145 = vector.load %arg17[%c0_97, %c0_98, %c0_99] : memref<2x32x64xf32, #tpu.memory_space<vmem>>, vector<1x32x64xf32>
    %146 = vector.shape_cast %145 : vector<1x32x64xf32> to vector<32x64xf32>
    %cst_100 = arith.constant dense<0.000000e+00> : vector<8x64xf32>
    %147 = tpu.matmul %141, %146, %cst_100 {dimension_numbers = #tpu.dot_dimension_numbers<[1], [0], [0], [1], [0, 0, 1, 1], [], []>} : vector<8x32xf32>, vector<32x64xf32>, vector<8x64xf32> -> vector<8x64xf32>
    %cst_101 = arith.constant 0.000000e+00 : f32
    %148 = vector.broadcast %cst_101 : f32 to vector<8x64xf32>
    %149 = arith.maximumf %147, %148 : vector<8x64xf32>
    %c0_102 = arith.constant 0 : index
    %c0_103 = arith.constant 0 : index
    %c0_104 = arith.constant 0 : index
    %150 = vector.load %arg18[%c0_102, %c0_103, %c0_104] : memref<2x64x32xf32, #tpu.memory_space<vmem>>, vector<1x64x32xf32>
    %151 = vector.shape_cast %150 : vector<1x64x32xf32> to vector<64x32xf32>
    %cst_105 = arith.constant dense<0.000000e+00> : vector<8x32xf32>
    %152 = tpu.matmul %149, %151, %cst_105 {dimension_numbers = #tpu.dot_dimension_numbers<[1], [0], [0], [1], [0, 0, 1, 1], [], []>} : vector<8x64xf32>, vector<64x32xf32>, vector<8x32xf32> -> vector<8x32xf32>
    %153 = arith.addf %152, %141 : vector<8x32xf32>
    %cst_106 = arith.constant dense<0.000000e+00> : vector<8xf32>
    %154 = vector.multi_reduction <add>, %153, %cst_106 [1] : vector<8x32xf32> to vector<8xf32>
    %155 = vector.shape_cast %154 : vector<8xf32> to vector<8x1xf32>
    %cst_107 = arith.constant 3.200000e+01 : f32
    %156 = vector.broadcast %cst_107 : f32 to vector<8x1xf32>
    %157 = arith.divf %155, %156 : vector<8x1xf32>
    %158 = vector.broadcast %157 : vector<8x1xf32> to vector<8x32xf32>
    %159 = arith.subf %153, %158 : vector<8x32xf32>
    %160 = arith.mulf %159, %159 : vector<8x32xf32>
    %cst_108 = arith.constant dense<0.000000e+00> : vector<8xf32>
    %161 = vector.multi_reduction <add>, %160, %cst_108 [1] : vector<8x32xf32> to vector<8xf32>
    %162 = vector.shape_cast %161 : vector<8xf32> to vector<8x1xf32>
    %cst_109 = arith.constant 3.200000e+01 : f32
    %163 = vector.broadcast %cst_109 : f32 to vector<8x1xf32>
    %164 = arith.divf %162, %163 : vector<8x1xf32>
    %165 = vector.broadcast %157 : vector<8x1xf32> to vector<8x32xf32>
    %166 = arith.subf %153, %165 : vector<8x32xf32>
    %cst_110 = arith.constant 9.99999974E-6 : f32
    %167 = vector.broadcast %cst_110 : f32 to vector<8x1xf32>
    %168 = arith.addf %164, %167 : vector<8x1xf32>
    %169 = math.rsqrt %168 : vector<8x1xf32>
    %170 = vector.broadcast %169 : vector<8x1xf32> to vector<8x32xf32>
    %171 = arith.mulf %166, %170 : vector<8x32xf32>
    %c1_111 = arith.constant 1 : index
    %c0_112 = arith.constant 0 : index
    %c0_113 = arith.constant 0 : index
    %c0_114 = arith.constant 0 : index
    %172 = vector.load %arg9[%c1_111, %c0_112, %c0_113, %c0_114] : memref<2x4x32x8xf32, #tpu.memory_space<vmem>>, vector<1x4x32x8xf32>
    %173 = vector.shape_cast %172 : vector<1x4x32x8xf32> to vector<4x32x8xf32>
    %c1_115 = arith.constant 1 : index
    %c0_116 = arith.constant 0 : index
    %c0_117 = arith.constant 0 : index
    %c0_118 = arith.constant 0 : index
    %174 = vector.load %arg10[%c1_115, %c0_116, %c0_117, %c0_118] : memref<2x4x32x8xf32, #tpu.memory_space<vmem>>, vector<1x4x32x8xf32>
    %175 = vector.shape_cast %174 : vector<1x4x32x8xf32> to vector<4x32x8xf32>
    %c1_119 = arith.constant 1 : index
    %c0_120 = arith.constant 0 : index
    %c0_121 = arith.constant 0 : index
    %c0_122 = arith.constant 0 : index
    %176 = vector.load %arg11[%c1_119, %c0_120, %c0_121, %c0_122] : memref<2x4x32x8xf32, #tpu.memory_space<vmem>>, vector<1x4x32x8xf32>
    %177 = vector.shape_cast %176 : vector<1x4x32x8xf32> to vector<4x32x8xf32>
    %c1_123 = arith.constant 1 : index
    %c0_124 = arith.constant 0 : index
    %c0_125 = arith.constant 0 : index
    %c0_126 = arith.constant 0 : index
    %178 = vector.load %arg12[%c1_123, %c0_124, %c0_125, %c0_126] : memref<2x4x8x32xf32, #tpu.memory_space<vmem>>, vector<1x4x8x32xf32>
    %179 = vector.shape_cast %178 : vector<1x4x8x32xf32> to vector<4x8x32xf32>
    %180 = vector.shape_cast %171 : vector<8x32xf32> to vector<1x8x32xf32>
    %181 = vector.shape_cast %180 : vector<1x8x32xf32> to vector<1x8x32xf32>
    %182 = vector.broadcast %181 : vector<1x8x32xf32> to vector<4x8x32xf32>
    %183 = vector.shape_cast %171 : vector<8x32xf32> to vector<1x8x32xf32>
    %184 = vector.shape_cast %183 : vector<1x8x32xf32> to vector<1x8x32xf32>
    %185 = vector.broadcast %184 : vector<1x8x32xf32> to vector<4x8x32xf32>
    "tpu.trace_start"() <{level = 10 : i32, message = "hqc,hcd->hqd"}> : () -> ()
    %cst_127 = arith.constant dense<0.000000e+00> : vector<4x8x8xf32>
    %186 = tpu.matmul %182, %173, %cst_127 {dimension_numbers = #tpu.dot_dimension_numbers<[2], [1], [1], [2], [0, 0, 0, 1, 1, 2], [0], [0]>} : vector<4x8x32xf32>, vector<4x32x8xf32>, vector<4x8x8xf32> -> vector<4x8x8xf32>
    "tpu.trace_stop"() : () -> ()
    "tpu.trace_start"() <{level = 10 : i32, message = "hkc,hcd->hkd"}> : () -> ()
    %cst_128 = arith.constant dense<0.000000e+00> : vector<4x8x8xf32>
    %187 = tpu.matmul %185, %175, %cst_128 {dimension_numbers = #tpu.dot_dimension_numbers<[2], [1], [1], [2], [0, 0, 0, 1, 1, 2], [0], [0]>} : vector<4x8x32xf32>, vector<4x32x8xf32>, vector<4x8x8xf32> -> vector<4x8x8xf32>
    %cst_129 = arith.constant dense<0.000000e+00> : vector<4x8x8xf32>
    %188 = tpu.matmul %185, %177, %cst_129 {dimension_numbers = #tpu.dot_dimension_numbers<[2], [1], [1], [2], [0, 0, 0, 1, 1, 2], [0], [0]>} : vector<4x8x32xf32>, vector<4x32x8xf32>, vector<4x8x8xf32> -> vector<4x8x8xf32>
    "tpu.trace_stop"() : () -> ()
    "tpu.trace_start"() <{level = 10 : i32, message = "hqd,hkd->hqk"}> : () -> ()
    %cst_130 = arith.constant dense<0.000000e+00> : vector<4x8x8xf32>
    %189 = tpu.matmul %186, %187, %cst_130 {dimension_numbers = #tpu.dot_dimension_numbers<[2], [2], [1], [1], [0, 0, 0, 1, 1, 1], [0], [0]>} : vector<4x8x8xf32>, vector<4x8x8xf32>, vector<4x8x8xf32> -> vector<4x8x8xf32>
    "tpu.trace_stop"() : () -> ()
    %cst_131 = arith.constant 0.353553385 : f32
    %190 = vector.broadcast %cst_131 : f32 to vector<4x8x8xf32>
    %191 = arith.mulf %189, %190 : vector<4x8x8xf32>
    %192 = vector.shape_cast %5 : vector<8x8xf32> to vector<1x8x8xf32>
    %193 = vector.broadcast %192 : vector<1x8x8xf32> to vector<4x8x8xf32>
    %194 = arith.addf %191, %193 : vector<4x8x8xf32>
    %cst_132 = arith.constant dense<0xFF800000> : vector<4x8xf32>
    %195 = vector.multi_reduction <maximumf>, %194, %cst_132 [2] : vector<4x8x8xf32> to vector<4x8xf32>
    %196 = vector.shape_cast %195 : vector<4x8xf32> to vector<4x8x1xf32>
    %197 = vector.broadcast %196 : vector<4x8x1xf32> to vector<4x8x8xf32>
    %198 = arith.subf %194, %197 : vector<4x8x8xf32>
    %199 = math.exp %198 : vector<4x8x8xf32>
    %cst_133 = arith.constant dense<0.000000e+00> : vector<4x8xf32>
    %200 = vector.multi_reduction <add>, %199, %cst_133 [2] : vector<4x8x8xf32> to vector<4x8xf32>
    %201 = vector.shape_cast %200 : vector<4x8xf32> to vector<4x8x1xf32>
    %202 = tpu.reciprocal %201 {approx = true} : vector<4x8x1xf32> -> vector<4x8x1xf32>
    %203 = vector.broadcast %202 : vector<4x8x1xf32> to vector<4x8x8xf32>
    %204 = arith.mulf %199, %203 : vector<4x8x8xf32>
    "tpu.trace_start"() <{level = 10 : i32, message = "hqk,hkd->hqd"}> : () -> ()
    %cst_134 = arith.constant dense<0.000000e+00> : vector<4x8x8xf32>
    %205 = tpu.matmul %204, %188, %cst_134 {dimension_numbers = #tpu.dot_dimension_numbers<[2], [1], [1], [2], [0, 0, 0, 1, 1, 2], [0], [0]>} : vector<4x8x8xf32>, vector<4x8x8xf32>, vector<4x8x8xf32> -> vector<4x8x8xf32>
    "tpu.trace_stop"() : () -> ()
    "tpu.trace_start"() <{level = 10 : i32, message = "hqd,hdc->hqc"}> : () -> ()
    %cst_135 = arith.constant dense<0.000000e+00> : vector<4x8x32xf32>
    %206 = tpu.matmul %205, %179, %cst_135 {dimension_numbers = #tpu.dot_dimension_numbers<[2], [1], [1], [2], [0, 0, 0, 1, 1, 2], [0], [0]>} : vector<4x8x8xf32>, vector<4x8x32xf32>, vector<4x8x32xf32> -> vector<4x8x32xf32>
    "tpu.trace_stop"() : () -> ()
    %cst_136 = arith.constant dense<0.000000e+00> : vector<8x32xf32>
    %207 = vector.multi_reduction <add>, %206, %cst_136 [0] : vector<4x8x32xf32> to vector<8x32xf32>
    %208 = arith.addf %207, %171 : vector<8x32xf32>
    %cst_137 = arith.constant dense<0.000000e+00> : vector<8xf32>
    %209 = vector.multi_reduction <add>, %208, %cst_137 [1] : vector<8x32xf32> to vector<8xf32>
    %210 = vector.shape_cast %209 : vector<8xf32> to vector<8x1xf32>
    %cst_138 = arith.constant 3.200000e+01 : f32
    %211 = vector.broadcast %cst_138 : f32 to vector<8x1xf32>
    %212 = arith.divf %210, %211 : vector<8x1xf32>
    %213 = vector.broadcast %212 : vector<8x1xf32> to vector<8x32xf32>
    %214 = arith.subf %208, %213 : vector<8x32xf32>
    %215 = arith.mulf %214, %214 : vector<8x32xf32>
    %cst_139 = arith.constant dense<0.000000e+00> : vector<8xf32>
    %216 = vector.multi_reduction <add>, %215, %cst_139 [1] : vector<8x32xf32> to vector<8xf32>
    %217 = vector.shape_cast %216 : vector<8xf32> to vector<8x1xf32>
    %cst_140 = arith.constant 3.200000e+01 : f32
    %218 = vector.broadcast %cst_140 : f32 to vector<8x1xf32>
    %219 = arith.divf %217, %218 : vector<8x1xf32>
    %220 = vector.broadcast %212 : vector<8x1xf32> to vector<8x32xf32>
    %221 = arith.subf %208, %220 : vector<8x32xf32>
    %cst_141 = arith.constant 9.99999974E-6 : f32
    %222 = vector.broadcast %cst_141 : f32 to vector<8x1xf32>
    %223 = arith.addf %219, %222 : vector<8x1xf32>
    %224 = math.rsqrt %223 : vector<8x1xf32>
    %225 = vector.broadcast %224 : vector<8x1xf32> to vector<8x32xf32>
    %226 = arith.mulf %221, %225 : vector<8x32xf32>
    %c0_142 = arith.constant 0 : index
    %c4 = arith.constant 4 : index
    %c0_143 = arith.constant 0 : index
    %c0_144 = arith.constant 0 : index
    %227 = vector.load %arg20[%c0_142, %c4, %c0_143, %c0_144] : memref<1x8x8x8xf32, #tpu.memory_space<vmem>>, vector<1x4x8x8xf32>
    %228 = vector.shape_cast %227 : vector<1x4x8x8xf32> to vector<4x8x8xf32>
    %229 = vector.shape_cast %204 : vector<4x8x8xf32> to vector<1x4x8x8xf32>
    tpu.vector_store %arg20[%c0_142, %c4, %c0_143, %c0_144], %229 {strides = array<i32>} : memref<1x8x8x8xf32, #tpu.memory_space<vmem>>, vector<1x4x8x8xf32>,
    %c1_145 = arith.constant 1 : index
    %c0_146 = arith.constant 0 : index
    %c0_147 = arith.constant 0 : index
    %c0_148 = arith.constant 0 : index
    %230 = vector.load %arg13[%c1_145, %c0_146, %c0_147, %c0_148] : memref<2x4x32x8xf32, #tpu.memory_space<vmem>>, vector<1x4x32x8xf32>
    %231 = vector.shape_cast %230 : vector<1x4x32x8xf32> to vector<4x32x8xf32>
    %c1_149 = arith.constant 1 : index
    %c0_150 = arith.constant 0 : index
    %c0_151 = arith.constant 0 : index
    %c0_152 = arith.constant 0 : index
    %232 = vector.load %arg14[%c1_149, %c0_150, %c0_151, %c0_152] : memref<2x4x32x8xf32, #tpu.memory_space<vmem>>, vector<1x4x32x8xf32>
    %233 = vector.shape_cast %232 : vector<1x4x32x8xf32> to vector<4x32x8xf32>
    %c1_153 = arith.constant 1 : index
    %c0_154 = arith.constant 0 : index
    %c0_155 = arith.constant 0 : index
    %c0_156 = arith.constant 0 : index
    %234 = vector.load %arg15[%c1_153, %c0_154, %c0_155, %c0_156] : memref<2x4x32x8xf32, #tpu.memory_space<vmem>>, vector<1x4x32x8xf32>
    %235 = vector.shape_cast %234 : vector<1x4x32x8xf32> to vector<4x32x8xf32>
    %c1_157 = arith.constant 1 : index
    %c0_158 = arith.constant 0 : index
    %c0_159 = arith.constant 0 : index
    %c0_160 = arith.constant 0 : index
    %236 = vector.load %arg16[%c1_157, %c0_158, %c0_159, %c0_160] : memref<2x4x8x32xf32, #tpu.memory_space<vmem>>, vector<1x4x8x32xf32>
    %237 = vector.shape_cast %236 : vector<1x4x8x32xf32> to vector<4x8x32xf32>
    %238 = vector.shape_cast %226 : vector<8x32xf32> to vector<1x8x32xf32>
    %239 = vector.shape_cast %238 : vector<1x8x32xf32> to vector<1x8x32xf32>
    %240 = vector.broadcast %239 : vector<1x8x32xf32> to vector<4x8x32xf32>
    %241 = vector.shape_cast %3 : vector<8x32xf32> to vector<1x8x32xf32>
    %242 = vector.shape_cast %241 : vector<1x8x32xf32> to vector<1x8x32xf32>
    %243 = vector.broadcast %242 : vector<1x8x32xf32> to vector<4x8x32xf32>
    "tpu.trace_start"() <{level = 10 : i32, message = "hqc,hcd->hqd"}> : () -> ()
    %cst_161 = arith.constant dense<0.000000e+00> : vector<4x8x8xf32>
    %244 = tpu.matmul %240, %231, %cst_161 {dimension_numbers = #tpu.dot_dimension_numbers<[2], [1], [1], [2], [0, 0, 0, 1, 1, 2], [0], [0]>} : vector<4x8x32xf32>, vector<4x32x8xf32>, vector<4x8x8xf32> -> vector<4x8x8xf32>
    "tpu.trace_stop"() : () -> ()
    "tpu.trace_start"() <{level = 10 : i32, message = "hkc,hcd->hkd"}> : () -> ()
    %cst_162 = arith.constant dense<0.000000e+00> : vector<4x8x8xf32>
    %245 = tpu.matmul %243, %233, %cst_162 {dimension_numbers = #tpu.dot_dimension_numbers<[2], [1], [1], [2], [0, 0, 0, 1, 1, 2], [0], [0]>} : vector<4x8x32xf32>, vector<4x32x8xf32>, vector<4x8x8xf32> -> vector<4x8x8xf32>
    %cst_163 = arith.constant dense<0.000000e+00> : vector<4x8x8xf32>
    %246 = tpu.matmul %243, %235, %cst_163 {dimension_numbers = #tpu.dot_dimension_numbers<[2], [1], [1], [2], [0, 0, 0, 1, 1, 2], [0], [0]>} : vector<4x8x32xf32>, vector<4x32x8xf32>, vector<4x8x8xf32> -> vector<4x8x8xf32>
    "tpu.trace_stop"() : () -> ()
    "tpu.trace_start"() <{level = 10 : i32, message = "hqd,hkd->hqk"}> : () -> ()
    %cst_164 = arith.constant dense<0.000000e+00> : vector<4x8x8xf32>
    %247 = tpu.matmul %244, %245, %cst_164 {dimension_numbers = #tpu.dot_dimension_numbers<[2], [2], [1], [1], [0, 0, 0, 1, 1, 1], [0], [0]>} : vector<4x8x8xf32>, vector<4x8x8xf32>, vector<4x8x8xf32> -> vector<4x8x8xf32>
    "tpu.trace_stop"() : () -> ()
    %cst_165 = arith.constant 0.353553385 : f32
    %248 = vector.broadcast %cst_165 : f32 to vector<4x8x8xf32>
    %249 = arith.mulf %247, %248 : vector<4x8x8xf32>
    %250 = vector.shape_cast %7 : vector<8x8xf32> to vector<1x8x8xf32>
    %251 = vector.broadcast %250 : vector<1x8x8xf32> to vector<4x8x8xf32>
    %252 = arith.addf %249, %251 : vector<4x8x8xf32>
    %cst_166 = arith.constant dense<0xFF800000> : vector<4x8xf32>
    %253 = vector.multi_reduction <maximumf>, %252, %cst_166 [2] : vector<4x8x8xf32> to vector<4x8xf32>
    %254 = vector.shape_cast %253 : vector<4x8xf32> to vector<4x8x1xf32>
    %255 = vector.broadcast %254 : vector<4x8x1xf32> to vector<4x8x8xf32>
    %256 = arith.subf %252, %255 : vector<4x8x8xf32>
    %257 = math.exp %256 : vector<4x8x8xf32>
    %cst_167 = arith.constant dense<0.000000e+00> : vector<4x8xf32>
    %258 = vector.multi_reduction <add>, %257, %cst_167 [2] : vector<4x8x8xf32> to vector<4x8xf32>
    %259 = vector.shape_cast %258 : vector<4x8xf32> to vector<4x8x1xf32>
    %260 = tpu.reciprocal %259 {approx = true} : vector<4x8x1xf32> -> vector<4x8x1xf32>
    %261 = vector.broadcast %260 : vector<4x8x1xf32> to vector<4x8x8xf32>
    %262 = arith.mulf %257, %261 : vector<4x8x8xf32>
    "tpu.trace_start"() <{level = 10 : i32, message = "hqk,hkd->hqd"}> : () -> ()
    %cst_168 = arith.constant dense<0.000000e+00> : vector<4x8x8xf32>
    %263 = tpu.matmul %262, %246, %cst_168 {dimension_numbers = #tpu.dot_dimension_numbers<[2], [1], [1], [2], [0, 0, 0, 1, 1, 2], [0], [0]>} : vector<4x8x8xf32>, vector<4x8x8xf32>, vector<4x8x8xf32> -> vector<4x8x8xf32>
    "tpu.trace_stop"() : () -> ()
    "tpu.trace_start"() <{level = 10 : i32, message = "hqd,hdc->hqc"}> : () -> ()
    %cst_169 = arith.constant dense<0.000000e+00> : vector<4x8x32xf32>
    %264 = tpu.matmul %263, %237, %cst_169 {dimension_numbers = #tpu.dot_dimension_numbers<[2], [1], [1], [2], [0, 0, 0, 1, 1, 2], [0], [0]>} : vector<4x8x8xf32>, vector<4x8x32xf32>, vector<4x8x32xf32> -> vector<4x8x32xf32>
    "tpu.trace_stop"() : () -> ()
    %cst_170 = arith.constant dense<0.000000e+00> : vector<8x32xf32>
    %265 = vector.multi_reduction <add>, %264, %cst_170 [0] : vector<4x8x32xf32> to vector<8x32xf32>
    %266 = arith.addf %265, %226 : vector<8x32xf32>
    %cst_171 = arith.constant dense<0.000000e+00> : vector<8xf32>
    %267 = vector.multi_reduction <add>, %266, %cst_171 [1] : vector<8x32xf32> to vector<8xf32>
    %268 = vector.shape_cast %267 : vector<8xf32> to vector<8x1xf32>
    %cst_172 = arith.constant 3.200000e+01 : f32
    %269 = vector.broadcast %cst_172 : f32 to vector<8x1xf32>
    %270 = arith.divf %268, %269 : vector<8x1xf32>
    %271 = vector.broadcast %270 : vector<8x1xf32> to vector<8x32xf32>
    %272 = arith.subf %266, %271 : vector<8x32xf32>
    %273 = arith.mulf %272, %272 : vector<8x32xf32>
    %cst_173 = arith.constant dense<0.000000e+00> : vector<8xf32>
    %274 = vector.multi_reduction <add>, %273, %cst_173 [1] : vector<8x32xf32> to vector<8xf32>
    %275 = vector.shape_cast %274 : vector<8xf32> to vector<8x1xf32>
    %cst_174 = arith.constant 3.200000e+01 : f32
    %276 = vector.broadcast %cst_174 : f32 to vector<8x1xf32>
    %277 = arith.divf %275, %276 : vector<8x1xf32>
    %278 = vector.broadcast %270 : vector<8x1xf32> to vector<8x32xf32>
    %279 = arith.subf %266, %278 : vector<8x32xf32>
    %cst_175 = arith.constant 9.99999974E-6 : f32
    %280 = vector.broadcast %cst_175 : f32 to vector<8x1xf32>
    %281 = arith.addf %277, %280 : vector<8x1xf32>
    %282 = math.rsqrt %281 : vector<8x1xf32>
    %283 = vector.broadcast %282 : vector<8x1xf32> to vector<8x32xf32>
    %284 = arith.mulf %279, %283 : vector<8x32xf32>
    %c0_176 = arith.constant 0 : index
    %c4_177 = arith.constant 4 : index
    %c0_178 = arith.constant 0 : index
    %c0_179 = arith.constant 0 : index
    %285 = vector.load %arg21[%c0_176, %c4_177, %c0_178, %c0_179] : memref<1x8x8x8xf32, #tpu.memory_space<vmem>>, vector<1x4x8x8xf32>
    %286 = vector.shape_cast %285 : vector<1x4x8x8xf32> to vector<4x8x8xf32>
    %287 = vector.shape_cast %262 : vector<4x8x8xf32> to vector<1x4x8x8xf32>
    tpu.vector_store %arg21[%c0_176, %c4_177, %c0_178, %c0_179], %287 {strides = array<i32>} : memref<1x8x8x8xf32, #tpu.memory_space<vmem>>, vector<1x4x8x8xf32>,
    %c1_180 = arith.constant 1 : index
    %c0_181 = arith.constant 0 : index
    %c0_182 = arith.constant 0 : index
    %288 = vector.load %arg17[%c1_180, %c0_181, %c0_182] : memref<2x32x64xf32, #tpu.memory_space<vmem>>, vector<1x32x64xf32>
    %289 = vector.shape_cast %288 : vector<1x32x64xf32> to vector<32x64xf32>
    %cst_183 = arith.constant dense<0.000000e+00> : vector<8x64xf32>
    %290 = tpu.matmul %284, %289, %cst_183 {dimension_numbers = #tpu.dot_dimension_numbers<[1], [0], [0], [1], [0, 0, 1, 1], [], []>} : vector<8x32xf32>, vector<32x64xf32>, vector<8x64xf32> -> vector<8x64xf32>
    %cst_184 = arith.constant 0.000000e+00 : f32
    %291 = vector.broadcast %cst_184 : f32 to vector<8x64xf32>
    %292 = arith.maximumf %290, %291 : vector<8x64xf32>
    %c1_185 = arith.constant 1 : index
    %c0_186 = arith.constant 0 : index
    %c0_187 = arith.constant 0 : index
    %293 = vector.load %arg18[%c1_185, %c0_186, %c0_187] : memref<2x64x32xf32, #tpu.memory_space<vmem>>, vector<1x64x32xf32>
    %294 = vector.shape_cast %293 : vector<1x64x32xf32> to vector<64x32xf32>
    %cst_188 = arith.constant dense<0.000000e+00> : vector<8x32xf32>
    %295 = tpu.matmul %292, %294, %cst_188 {dimension_numbers = #tpu.dot_dimension_numbers<[1], [0], [0], [1], [0, 0, 1, 1], [], []>} : vector<8x64xf32>, vector<64x32xf32>, vector<8x32xf32> -> vector<8x32xf32>
    %296 = arith.addf %295, %284 : vector<8x32xf32>
    %cst_189 = arith.constant dense<0.000000e+00> : vector<8xf32>
    %297 = vector.multi_reduction <add>, %296, %cst_189 [1] : vector<8x32xf32> to vector<8xf32>
    %298 = vector.shape_cast %297 : vector<8xf32> to vector<8x1xf32>
    %cst_190 = arith.constant 3.200000e+01 : f32
    %299 = vector.broadcast %cst_190 : f32 to vector<8x1xf32>
    %300 = arith.divf %298, %299 : vector<8x1xf32>
    %301 = vector.broadcast %300 : vector<8x1xf32> to vector<8x32xf32>
    %302 = arith.subf %296, %301 : vector<8x32xf32>
    %303 = arith.mulf %302, %302 : vector<8x32xf32>
    %cst_191 = arith.constant dense<0.000000e+00> : vector<8xf32>
    %304 = vector.multi_reduction <add>, %303, %cst_191 [1] : vector<8x32xf32> to vector<8xf32>
    %305 = vector.shape_cast %304 : vector<8xf32> to vector<8x1xf32>
    %cst_192 = arith.constant 3.200000e+01 : f32
    %306 = vector.broadcast %cst_192 : f32 to vector<8x1xf32>
    %307 = arith.divf %305, %306 : vector<8x1xf32>
    %308 = vector.broadcast %300 : vector<8x1xf32> to vector<8x32xf32>
    %309 = arith.subf %296, %308 : vector<8x32xf32>
    %cst_193 = arith.constant 9.99999974E-6 : f32
    %310 = vector.broadcast %cst_193 : f32 to vector<8x1xf32>
    %311 = arith.addf %307, %310 : vector<8x1xf32>
    %312 = math.rsqrt %311 : vector<8x1xf32>
    %313 = vector.broadcast %312 : vector<8x1xf32> to vector<8x32xf32>
    %314 = arith.mulf %309, %313 : vector<8x32xf32>
    %c0_194 = arith.constant 0 : index
    %c0_195 = arith.constant 0 : index
    %c0_196 = arith.constant 0 : index
    %315 = vector.load %arg19[%c0_194, %c0_195, %c0_196] : memref<1x8x32xf32, #tpu.memory_space<vmem>>, vector<1x8x32xf32>
    %316 = vector.shape_cast %315 : vector<1x8x32xf32> to vector<8x32xf32>
    %317 = vector.shape_cast %314 : vector<8x32xf32> to vector<1x8x32xf32>
    tpu.vector_store %arg19[%c0_194, %c0_195, %c0_196], %317 {strides = array<i32>} : memref<1x8x32xf32, #tpu.memory_space<vmem>>, vector<1x8x32xf32>,
    return
  }
  func.func @transform_0(%arg0: i32) -> (i32, i32, i32) {
    %c0_i32 = arith.constant 0 : i32
    %c0_i32_0 = arith.constant 0 : i32
    %c0_i32_1 = arith.constant 0 : i32
    return %arg0, %c0_i32, %c0_i32_0 : i32, i32, i32
  }
  func.func @transform_1(%arg0: i32) -> (i32, i32, i32) {
    %c0_i32 = arith.constant 0 : i32
    %c0_i32_0 = arith.constant 0 : i32
    %c0_i32_1 = arith.constant 0 : i32
    return %arg0, %c0_i32, %c0_i32_0 : i32, i32, i32
  }
  func.func @transform_2(%arg0: i32) -> (i32, i32, i32) {
    %c0_i32 = arith.constant 0 : i32
    %c0_i32_0 = arith.constant 0 : i32
    %c0_i32_1 = arith.constant 0 : i32
    return %arg0, %c0_i32, %c0_i32_0 : i32, i32, i32
  }
  func.func @transform_3(%arg0: i32) -> (i32, i32, i32) {
    %c0_i32 = arith.constant 0 : i32
    %c0_i32_0 = arith.constant 0 : i32
    %c0_i32_1 = arith.constant 0 : i32
    return %arg0, %c0_i32, %c0_i32_0 : i32, i32, i32
  }
  func.func @transform_4(%arg0: i32) -> (i32, i32) {
    %c0_i32 = arith.constant 0 : i32
    %c0_i32_0 = arith.constant 0 : i32
    %c0_i32_1 = arith.constant 0 : i32
    return %c0_i32, %c0_i32_0 : i32, i32
  }
  func.func @transform_5(%arg0: i32) -> (i32, i32, i32) {
    %c0_i32 = arith.constant 0 : i32
    %c0_i32_0 = arith.constant 0 : i32
    %c0_i32_1 = arith.constant 0 : i32
    %c0_i32_2 = arith.constant 0 : i32
    return %c0_i32, %c0_i32_0, %c0_i32_1 : i32, i32, i32
  }
  func.func @transform_6(%arg0: i32) -> (i32, i32) {
    %c0_i32 = arith.constant 0 : i32
    %c0_i32_0 = arith.constant 0 : i32
    %c0_i32_1 = arith.constant 0 : i32
    return %c0_i32, %c0_i32_0 : i32, i32
  }
  func.func @transform_7(%arg0: i32) -> (i32, i32) {
    %c0_i32 = arith.constant 0 : i32
    %c0_i32_0 = arith.constant 0 : i32
    %c0_i32_1 = arith.constant 0 : i32
    return %c0_i32, %c0_i32_0 : i32, i32
  }
  func.func @transform_8(%arg0: i32) -> (i32, i32, i32, i32) {
    %c0_i32 = arith.constant 0 : i32
    %c0_i32_0 = arith.constant 0 : i32
    %c0_i32_1 = arith.constant 0 : i32
    %c0_i32_2 = arith.constant 0 : i32
    %c0_i32_3 = arith.constant 0 : i32
    return %c0_i32, %c0_i32_0, %c0_i32_1, %c0_i32_2 : i32, i32, i32, i32
  }
  func.func @transform_9(%arg0: i32) -> (i32, i32, i32, i32) {
    %c0_i32 = arith.constant 0 : i32
    %c0_i32_0 = arith.constant 0 : i32
    %c0_i32_1 = arith.constant 0 : i32
    %c0_i32_2 = arith.constant 0 : i32
    %c0_i32_3 = arith.constant 0 : i32
    return %c0_i32, %c0_i32_0, %c0_i32_1, %c0_i32_2 : i32, i32, i32, i32
  }
  func.func @transform_10(%arg0: i32) -> (i32, i32, i32, i32) {
    %c0_i32 = arith.constant 0 : i32
    %c0_i32_0 = arith.constant 0 : i32
    %c0_i32_1 = arith.constant 0 : i32
    %c0_i32_2 = arith.constant 0 : i32
    %c0_i32_3 = arith.constant 0 : i32
    return %c0_i32, %c0_i32_0, %c0_i32_1, %c0_i32_2 : i32, i32, i32, i32
  }
  func.func @transform_11(%arg0: i32) -> (i32, i32, i32, i32) {
    %c0_i32 = arith.constant 0 : i32
    %c0_i32_0 = arith.constant 0 : i32
    %c0_i32_1 = arith.constant 0 : i32
    %c0_i32_2 = arith.constant 0 : i32
    %c0_i32_3 = arith.constant 0 : i32
    return %c0_i32, %c0_i32_0, %c0_i32_1, %c0_i32_2 : i32, i32, i32, i32
  }
  func.func @transform_12(%arg0: i32) -> (i32, i32, i32, i32) {
    %c0_i32 = arith.constant 0 : i32
    %c0_i32_0 = arith.constant 0 : i32
    %c0_i32_1 = arith.constant 0 : i32
    %c0_i32_2 = arith.constant 0 : i32
    %c0_i32_3 = arith.constant 0 : i32
    return %c0_i32, %c0_i32_0, %c0_i32_1, %c0_i32_2 : i32, i32, i32, i32
  }
  func.func @transform_13(%arg0: i32) -> (i32, i32, i32, i32) {
    %c0_i32 = arith.constant 0 : i32
    %c0_i32_0 = arith.constant 0 : i32
    %c0_i32_1 = arith.constant 0 : i32
    %c0_i32_2 = arith.constant 0 : i32
    %c0_i32_3 = arith.constant 0 : i32
    return %c0_i32, %c0_i32_0, %c0_i32_1, %c0_i32_2 : i32, i32, i32, i32
  }
  func.func @transform_14(%arg0: i32) -> (i32, i32, i32, i32) {
    %c0_i32 = arith.constant 0 : i32
    %c0_i32_0 = arith.constant 0 : i32
    %c0_i32_1 = arith.constant 0 : i32
    %c0_i32_2 = arith.constant 0 : i32
    %c0_i32_3 = arith.constant 0 : i32
    return %c0_i32, %c0_i32_0, %c0_i32_1, %c0_i32_2 : i32, i32, i32, i32
  }
  func.func @transform_15(%arg0: i32) -> (i32, i32, i32, i32) {
    %c0_i32 = arith.constant 0 : i32
    %c0_i32_0 = arith.constant 0 : i32
    %c0_i32_1 = arith.constant 0 : i32
    %c0_i32_2 = arith.constant 0 : i32
    %c0_i32_3 = arith.constant 0 : i32
    return %c0_i32, %c0_i32_0, %c0_i32_1, %c0_i32_2 : i32, i32, i32, i32
  }
  func.func @transform_16(%arg0: i32) -> (i32, i32, i32) {
    %c0_i32 = arith.constant 0 : i32
    %c0_i32_0 = arith.constant 0 : i32
    %c0_i32_1 = arith.constant 0 : i32
    %c0_i32_2 = arith.constant 0 : i32
    return %c0_i32, %c0_i32_0, %c0_i32_1 : i32, i32, i32
  }
  func.func @transform_17(%arg0: i32) -> (i32, i32, i32) {
    %c0_i32 = arith.constant 0 : i32
    %c0_i32_0 = arith.constant 0 : i32
    %c0_i32_1 = arith.constant 0 : i32
    %c0_i32_2 = arith.constant 0 : i32
    return %c0_i32, %c0_i32_0, %c0_i32_1 : i32, i32, i32
  }
  func.func @transform_18(%arg0: i32) -> (i32, i32, i32) {
    %c0_i32 = arith.constant 0 : i32
    %c0_i32_0 = arith.constant 0 : i32
    %c0_i32_1 = arith.constant 0 : i32
    return %arg0, %c0_i32, %c0_i32_0 : i32, i32, i32
  }
  func.func @transform_19(%arg0: i32) -> (i32, i32, i32, i32) {
    %c0_i32 = arith.constant 0 : i32
    %c0_i32_0 = arith.constant 0 : i32
    %c0_i32_1 = arith.constant 0 : i32
    %c0_i32_2 = arith.constant 0 : i32
    return %arg0, %c0_i32, %c0_i32_0, %c0_i32_1 : i32, i32, i32, i32
  }
  func.func @transform_20(%arg0: i32) -> (i32, i32, i32, i32) {
    %c0_i32 = arith.constant 0 : i32
    %c0_i32_0 = arith.constant 0 : i32
    %c0_i32_1 = arith.constant 0 : i32
    %c0_i32_2 = arith.constant 0 : i32
    return %arg0, %c0_i32, %c0_i32_0, %c0_i32_1 : i32, i32, i32, i32
  }
}

</mosaic_0001>

<bundles_post_ra>
// kernel: decoder_forward.1
= control target key start
LH: loop header
LB: loop body
LE: loop exit
PB: predicated region body
PF: predicated region fallthrough
CT: control target
= control target key end

     0   :  { %s5553_s0 = inlined_call_operand.vmem [shape: f32[2,8,4], index: 0, kind: input, shape index: {}]   ;;  %s5554_s1 = inlined_call_operand.vmem [shape: f32[2,8,32], index: 1, kind: input, shape index: {}]   ;;  %s5555_s2 = inlined_call_operand.vmem [shape: f32[2,8,8], index: 2, kind: input, shape index: {}]   ;;  %s5556_s3 = inlined_call_operand.vmem [shape: f32[2,8,8], index: 3, kind: input, shape index: {}]   ;;  %s5557_s4 = inlined_call_operand.vmem [shape: f32[8,32], index: 4, kind: input, shape index: {}]   ;;  %s5558_s5 = inlined_call_operand.vmem [shape: f32[3,4,32], index: 5, kind: input, shape index: {}]   ;;  %s5559_s6 = inlined_call_operand.vmem [shape: f32[4,32], index: 6, kind: input, shape index: {}]   ;;  %s5560_s7 = inlined_call_operand.vmem [shape: f32[1,32], index: 7, kind: input, shape index: {}]   ;;  %s5561_s8 = inlined_call_operand.vmem [shape: f32[2,4,32,8], index: 8, kind: input, shape index: {}]   ;;  %s5562_s9 = inlined_call_operand.vmem [shape: f32[2,4,32,8], index: 9, kind: input, shape index: {}]   ;;  %s5563_s10 = inlined_call_operand.vmem [shape: f32[2,4,32,8], index: 10, kind: input, shape index: {}]   ;;  %s5564_s11 = inlined_call_operand.vmem [shape: f32[2,4,8,32], index: 11, kind: input, shape index: {}]   ;;  %s5565_s12 = inlined_call_operand.vmem [shape: f32[2,4,32,8], index: 12, kind: input, shape index: {}]   ;;  %s5566_s13 = inlined_call_operand.vmem [shape: f32[2,4,32,8], index: 13, kind: input, shape index: {}]   ;;  %s5567_s14 = inlined_call_operand.vmem [shape: f32[2,4,32,8], index: 14, kind: input, shape index: {}]   ;;  %s5568_s15 = inlined_call_operand.vmem [shape: f32[2,4,8,32], index: 15, kind: input, shape index: {}]   ;;  %s5569_s16 = inlined_call_operand.vmem [shape: f32[2,32,64], index: 16, kind: input, shape index: {}]   ;;  %s5570_s17 = inlined_call_operand.vmem [shape: f32[2,64,32], index: 17, kind: input, shape index: {}]   ;;  %s5571_s18 = inlined_call_operand.hbm [shape: f32[2,8,32], index: 18, kind: output, shape index: {0}]   ;;  %s5572_s19 = inlined_call_operand.vmem [shape: f32[2,8,8,8], index: 19, kind: output, shape index: {1}]   ;;  %s5573_s20 = inlined_call_operand.vmem [shape: f32[2,8,8,8], index: 20, kind: output, shape index: {2}]  }
   0x1   :  { %5580 = sst [smem:[#allocation10_spill]] %s5553_s0 }
   0x2   :  { %5581 = sst [smem:[#allocation11_spill]] %s5554_s1 }
   0x3   :  { %5582 = sst [smem:[#allocation12_spill]] %s5555_s2 }
   0x4   :  { %5583 = sst [smem:[#allocation13_spill]] %s5556_s3 }
   0x5   :  { %5584 = sst [smem:[#allocation14_spill]] %s5557_s4 }
   0x6   :  { %5585 = sst [smem:[#allocation15_spill]] %s5558_s5 }
   0x7   :  { %5586 = sst [smem:[#allocation16_spill]] %s5559_s6 }
   0x8   :  { %5587 = sst [smem:[#allocation17_spill]] %s5560_s7 }
   0x9   :  { %5588 = sst [smem:[#allocation18_spill]] %s5572_s19 }
   0xa   :  { %26 = vsyncpa [#allocation3], 0 }
   0xb   :  { %28 = vsyncpa [#allocation3 + $0x1], 0  ;;  %s4427_s1 = smov 0   ;;  %s4429_s22 = smov 0  }
   0xc   :  { %s4431_s23 = smov 0   ;;  %s4433_s24 = smov 0  }
   0xd LB: > { %5589 = sst [smem:[#allocation5_spill]] %s4307_s1  ;;  %s4448_s2 = sadd.s32 4294967295, %s4319_s24   ;;  %s4319_s24 = sphi %s4433_s24, %s5608_s24   ;;  %s4315_s23 = sphi %s4431_s23, %s5610_s23   ;;  %s4311_s22 = sphi %s4429_s22, %s5612_s22   ;;  %s4307_s1 = sphi %s4427_s1, %s5611_s1  }
   0xe   : > { %5590 = sst [smem:[#allocation6_spill]] %s4315_s23  ;;  %s3866_s25 = sadd.s32 4294967294, %s4319_s24  }
   0xf   : > { %s4452_s3 = sadd.s32 1, %s4319_s24   ;;  %s439_s26 = sadd.s32 1, %s4315_s23 }
  0x10   : > { %5591 = sst [smem:[#allocation7_spill]] %s4452_s3  ;;  %s436_s27 = ssub.s32 %s4319_s24, %s4452_s3 }
  0x11   : > { %p449_p0 = scmp.ne.s32.totalorder %s4315_s23, %s4311_s22  ;;  %p437_p1 = scmp.eq.s32.totalorder %s436_s27, 0 }
  0x12   : > { %p450_p2 = scmp.eq.s32.totalorder %s4448_s2, 1  ;;  %p455_p3 = scmp.ne.s32.totalorder %s4311_s22, %s4307_s1 }
  0x13   : > { %p456_p4 = scmp.eq.s32.totalorder %s3866_s25, 1  ;;  %p3869_p7 = scmp.ge.s32.totalorder %s4319_s24, 1 }
  0x14   : > { %s4463_s28 = scalar_select %p437_p1, %s4315_s23, %s439_s26  }
  0x15   : > { %p4465_p5 = por %p450_p2, %p449_p0  ;;  %p4469_p6 = por %p456_p4, %p455_p3 }
  0x16   : > { %5592 = sst [smem:[#allocation8_spill]] %s4463_s28  ;;  %p596_p8 = scmp.lt.s32.totalorder %s4319_s24, 3 }
  0x17   : > { %s5594_s29 = scalar_select %p4469_p6, 1, 0 }
  0x18   : > { %p597_p9 = pnand %p3869_p7, %p596_p8 }
  0x19   : > { %5595 = sst [smem:[#allocation9_spill]] %s5594_s29  ;;  %p675_p10 = scmp.lt.s32.totalorder (!%p597_p9), %s4448_s2, 1 }
  0x1a   : > { %600 = sbr.rel (%p597_p9) target bundleno = 5516 (0x158c), region = 92  ;;  %s5596_s5 = sld [smem:[#allocation15_spill]] (!%p597_p9) }
  0x1b   : > { %s5597_s6 = sld [smem:[#allocation16_spill]] (!%p597_p9) }
  0x1c   : > { %s5598_s25 = sld [smem:[#allocation10_spill]] (!%p597_p9) }
  0x1d   : > { %s5599_s7 = sld [smem:[#allocation17_spill]] (!%p597_p9) }
  0x1e   : > { %s5600_s21 = sld [smem:[#allocation14_spill]] (!%p597_p9) }
  0x1f   : > { %vm714_vm0 = vcmask 1043456   ;;  %s4489_s3 = scalar_select %p675_p10, %s4448_s2, 1  ;;  %vm710_vm1 = vcmask 31744   ;;  %v828_v7 = vld [vmem:[%s5561_s8 + $0x18] sm:$0xff]  ;;  %v827_v11 = vld [vmem:[%s5561_s8 + $0x10] sm:$0xff]  ;;  %v826_v15 = vld [vmem:[%s5561_s8 + $0x8] sm:$0xff] }
  0x20   : > { %v3884_v0 = vld [vmem:[%s5596_s5 + $0x8] sm:$0xf]  ;;  %v3879_v2 = vld [vmem:[%s5596_s5 + $0x4] sm:$0xf]  ;;  %v707_v3 = vld [vmem:[%s5596_s5] sm:$0xf] }
  0x21   : > { %3885 = vmatpush.msk.msra.mxu2 %vm714_vm0, %v3884_v0  ;;  %v793_v1 = vld [vmem:[%s5597_s6] sm:$0xf]  ;;  %3880 = vmatpush.msk.msra.mxu0 %vm714_vm0, %v3879_v2  ;;  %s4492_s30 = sshll.u32 %s4489_s3, 3  ;;  %v836_v8 = vld [vmem:[%s5561_s8 + $0x58] sm:$0xff]  ;;  %v835_v12 = vld [vmem:[%s5561_s8 + $0x50] sm:$0xff]  ;;  %vm877_vm2 = vcmask 261120  }
  0x22   : > { %3887 = vmatpush.msk.msra.mxu3 %vm714_vm0, %v793_v1  ;;  %3882 = vmatpush.msk.msra.mxu1 %vm714_vm0, %v707_v3  ;;  %s678_s6 = scalar_lea.vmem %s5598_s25, %s4492_s30  ;;  %v840_v9 = vld [vmem:[%s5561_s8 + $0x78] sm:$0xff]  ;;  %v839_v13 = vld [vmem:[%s5561_s8 + $0x70] sm:$0xff]  ;;  %v834_v16 = vld [vmem:[%s5561_s8 + $0x48] sm:$0xff]  ;;  %vm1121_vm3 = vcmask 64512   ;;  %s5601_s29 = sld [smem:[#allocation12_spill]]  ;;  %vm2211_vm11 = vcmask 523264  }
  0x23   : > { %v701_v4 = vld [vmem:[%s678_s6] sm:$0xff]  ;;  %933 = vmatpush.msrb.mxu2 %v836_v8  ;;  %v844_v10 = vld [vmem:[%s5562_s9 + $0x18] sm:$0xff]  ;;  %v843_v14 = vld [vmem:[%s5562_s9 + $0x10] sm:$0xff]  ;;  %s5578_s27 = sshll.u32 %s4489_s3, 6  ;;  %s5602_s19 = sld [smem:[#allocation18_spill]] }
  0x24   : > { %v706_v5 = vrot.slane %v701_v4, 1  ;;  %3888 = vmatmul.msk.f32.vlgmr.msra.gmra.mxu3 %vm710_vm1, %v701_v4  ;;  %3881 = vmatmul.msk.f32.vlgmr.msra.gmra.mxu0 %vm710_vm1, %v701_v4  ;;  %v705_v6 = vrot.slane %v701_v4, 7  ;;  %v838_v17 = vld [vmem:[%s5561_s8 + $0x68] sm:$0xff]  ;;  %v825_v19 = vld [vmem:[%s5561_s8] sm:$0xff]  ;;  %v832_v23 = vld [vmem:[%s5561_s8 + $0x38] sm:$0xff]  ;;  %s5603_s5 = sld [smem:[#allocation11_spill]] }
  0x25   : > { %893 = vmatpush.msrb.mxu1 %v828_v7  ;;  %953 = vmatpush.msrb.mxu3 %v840_v9  ;;  %v842_v18 = vld [vmem:[%s5562_s9 + $0x8] sm:$0xff]  ;;  %v833_v20 = vld [vmem:[%s5561_s8 + $0x40] sm:$0xff]  ;;  %v852_v24 = vld [vmem:[%s5562_s9 + $0x58] sm:$0xff]  ;;  %s5604_s1 = sld [smem:[#allocation13_spill]]  ;;  %s4130_s25 = sshll.u32 %s4448_s2, 3 }
  0x26   : > { %3886 = vmatmul.msk.f32.vlgmr.msra.gmra.mxu2 %vm710_vm1, %v706_v5  ;;  %3883 = vmatmul.msk.f32.vlgmr.msra.gmra.mxu1 %vm710_vm1, %v705_v6  ;;  %v837_v21 = vld [vmem:[%s5561_s8 + $0x60] sm:$0xff]  ;;  %v856_v25 = vld [vmem:[%s5562_s9 + $0x78] sm:$0xff]  ;;  %v831_v27 = vld [vmem:[%s5561_s8 + $0x30] sm:$0xff] }
  0x27   : > { %973 = vmatpush.msrb.mxu0 %v844_v10  ;;  %894 = vmatpush.msrb.mxu1 %v827_v11  ;;  %v841_v22 = vld [vmem:[%s5562_s9] sm:$0xff]  ;;  %v860_v26 = vld [vmem:[%s5563_s10 + $0x18] sm:$0xff]  ;;  %v851_v28 = vld [vmem:[%s5562_s9 + $0x50] sm:$0xff] }
  0x28   : > { %934 = vmatpush.msrb.mxu2 %v835_v12  ;;  %954 = vmatpush.msrb.mxu3 %v839_v13  ;;  %v855_v29 = vld [vmem:[%s5562_s9 + $0x70] sm:$0xff]  ;;  %v830_v31 = vld [vmem:[%s5561_s8 + $0x28] sm:$0xff]  ;;  %v829_v35 = vld [vmem:[%s5561_s8 + $0x20] sm:$0xff]  ;;  %s4686_s26 = scalar_lea.vmem %s5601_s29, %s4492_s30 }
  0x29   : > { %974 = vmatpush.msrb.mxu0 %v843_v14  ;;  %895 = vmatpush.msrb.mxu1 %v826_v15  ;;  %v859_v30 = vld [vmem:[%s5563_s10 + $0x10] sm:$0xff]  ;;  %v850_v32 = vld [vmem:[%s5562_s9 + $0x48] sm:$0xff]  ;;  %v849_v36 = vld [vmem:[%s5562_s9 + $0x40] sm:$0xff] }
  0x2a   : > { %935 = vmatpush.msrb.mxu2 %v834_v16  ;;  %955 = vmatpush.msrb.mxu3 %v838_v17  ;;  %v854_v33 = vld [vmem:[%s5562_s9 + $0x68] sm:$0xff]  ;;  %v853_v37 = vld [vmem:[%s5562_s9 + $0x60] sm:$0xff]  ;;  %v848_v50 = vld [vmem:[%s5562_s9 + $0x38] sm:$0xff]  ;;  %s4871_s29 = scalar_lea.vmem %s5603_s5, %s4492_s30 }
  0x2b   : > { %975 = vmatpush.msrb.mxu0 %v842_v18  ;;  %896 = vmatpush.msrb.mxu1 %v825_v19  ;;  %v858_v34 = vld [vmem:[%s5563_s10 + $0x8] sm:$0xff]  ;;  %v857_v38 = vld [vmem:[%s5563_s10] sm:$0xff]  ;;  %v868_v51 = vld [vmem:[%s5563_s10 + $0x58] sm:$0xff]  ;;  %s4930_s23 = scalar_lea.vmem %s5604_s1, %s4492_s30  ;;  %s5605_s30 = sshll.u32 %s4489_s3, 6 }
  0x2c   : > { %936 = vmatpush.msrb.mxu2 %v833_v20  ;;  %956 = vmatpush.msrb.mxu3 %v837_v21  ;;  %v4175_v45 = vld [vmem:[%s5599_s7] ss:$0 sm:$0xff]  ;;  %v872_v52 = vld [vmem:[%s5563_s10 + $0x78] sm:$0xff]  ;;  %v847_v53 = vld [vmem:[%s5562_s9 + $0x30] sm:$0xff]  ;;  %s4946_s6 = scalar_lea.vmem %s5573_s20, %s5605_s30 }
  0x2d   : > { %976 = vmatpush.msrb.mxu0 %v841_v22  ;;  %913 = vmatpush.msra.mxu1 %v832_v23  ;;  %v823_v47 = vld [vmem:[%s5600_s21] sm:$0xff]  ;;  %v867_v54 = vld [vmem:[%s5563_s10 + $0x50] sm:$0xff]  ;;  %v846_v56 = vld [vmem:[%s5562_s9 + $0x28] sm:$0xff]  ;;  %s4703_s21 = scalar_lea.vmem %s5602_s19, %s5578_s27  ;;  %s658_s27 = sand.u32 1, %s4311_s22  }
  0x2e   : > { %1013 = vmatpush.msra.mxu2 %v852_v24  ;;  %1033 = vmatpush.msra.mxu3 %v856_v25  ;;  %v871_v55 = vld [vmem:[%s5563_s10 + $0x70] sm:$0xff]  ;;  %v866_v57 = vld [vmem:[%s5563_s10 + $0x48] sm:$0xff]  ;;  %v845_v59 = vld [vmem:[%s5562_s9 + $0x20] sm:$0xff]  ;;  %s3690_s2 = scalar_lea.sflag [#allocation3], %s658_s27 }
  0x2f   : > { %1053 = vmatpush.msra.mxu0 %v860_v26  ;;  %914 = vmatpush.msra.mxu1 %v831_v27  ;;  %v870_v58 = vld [vmem:[%s5563_s10 + $0x68] sm:$0xff]  ;;  %v865_v60 = vld [vmem:[%s5563_s10 + $0x40] sm:$0xff]  ;;  %v864_v62 = vld [vmem:[%s5563_s10 + $0x38] sm:$0xff] }
  0x30   : > { %1014 = vmatpush.msra.mxu2 %v851_v28  ;;  %1034 = vmatpush.msra.mxu3 %v855_v29  ;;  %v869_v61 = vld [vmem:[%s5563_s10 + $0x60] sm:$0xff]  ;;  %v863_v63 = vld [vmem:[%s5563_s10 + $0x30] sm:$0xff]  ;;  %v862_v0 = vld [vmem:[%s5563_s10 + $0x28] sm:$0xff] }
  0x31   : > { %1054 = vmatpush.msra.mxu0 %v859_v30  ;;  %915 = vmatpush.msra.mxu1 %v830_v31  ;;  %v861_v1 = vld [vmem:[%s5563_s10 + $0x20] sm:$0xff] }
  0x32   : > { %1015 = vmatpush.msra.mxu2 %v850_v32  ;;  %1035 = vmatpush.msra.mxu3 %v854_v33  ;;  %v703_v14 = vld [vmem:[%s4686_s26] sm:$0xff] }
  0x33   : > { %1055 = vmatpush.msra.mxu0 %v858_v34  ;;  %916 = vmatpush.msra.mxu1 %v829_v35 }
  0x34   : > { %1016 = vmatpush.msra.mxu2 %v849_v36  ;;  %1036 = vmatpush.msra.mxu3 %v853_v37 }
  0x35   : > { %1056 = vmatpush.msra.mxu0 %v857_v38 }
  0xa1   : > { %v735_v39 = vpop.f32.mrf.mxu0 }
  0xa3   : > { %v761_v40 = vpop.f32.mrf.mxu1 }
  0xa4   : > { %v762_v41 = vadd.f32 %v761_v40, %v735_v39 }
  0xa7   : > { %v814_v43 = vpop.f32.mrf.mxu3 }
  0xa9   : > { %v789_v42 = vpop.f32.mrf.mxu2 }
  0xaa   : > { %v792_v44 = vadd.f32 %v789_v42, %v762_v41 }
  0xac   : > { %v817_v46 = vadd.f32 %v814_v43, %v792_v44 }
  0xae   : > { %v822_v48 = vadd.f32 %v4175_v45, %v817_v46 }
  0xb0   : > { %v4600_v49 = vadd.f32 %v823_v47, %v822_v48 }
  0xb2   : > { %3889 = vmatmul.msk.f32.vlgmr.msrb.gmra.mxu1 %vm877_vm2, %v4600_v49  ;;  %3891 = vmatmul.msk.f32.vlgmr.msrb.gmra.mxu2 %vm877_vm2, %v4600_v49 }
  0xb3   : > { %3892 = vmatmul.msk.f32.vlgmr.msrb.gmra.mxu3 %vm877_vm2, %v4600_v49  ;;  %3893 = vmatmul.msk.f32.vlgmr.msrb.gmra.mxu0 %vm877_vm2, %v4600_v49 }
  0xb4   : > { %993 = vmatpush.msrb.mxu1 %v848_v50  ;;  %1093 = vmatpush.msrb.mxu2 %v868_v51 }
  0xb5   : > { %1113 = vmatpush.msrb.mxu3 %v872_v52 }
  0xb6   : > { %994 = vmatpush.msrb.mxu1 %v847_v53  ;;  %1094 = vmatpush.msrb.mxu2 %v867_v54 }
  0xb7   : > { %1114 = vmatpush.msrb.mxu3 %v871_v55 }
  0xb8   : > { %995 = vmatpush.msrb.mxu1 %v846_v56  ;;  %1095 = vmatpush.msrb.mxu2 %v866_v57 }
  0xb9   : > { %1115 = vmatpush.msrb.mxu3 %v870_v58 }
  0xba   : > { %3890 = vmatmul.msk.f32.vlgmr.msra.gmra.mxu1 %vm877_vm2, %v4600_v49  ;;  %3895 = vmatmul.msk.f32.vlgmr.msra.gmra.mxu2 %vm877_vm2, %v4600_v49 }
  0xbb   : > { %3896 = vmatmul.msk.f32.vlgmr.msra.gmra.mxu3 %vm877_vm2, %v4600_v49  ;;  %3897 = vmatmul.msk.f32.vlgmr.msra.gmra.mxu0 %vm877_vm2, %v4600_v49 }
  0xbc   : > { %996 = vmatpush.msrb.mxu1 %v845_v59  ;;  %1096 = vmatpush.msrb.mxu2 %v865_v60 }
  0xbd   : > { %1116 = vmatpush.msrb.mxu3 %v869_v61 }
  0xbe   : > { %1073 = vmatpush.msra.mxu1 %v864_v62 }
  0xc0   : > { %1074 = vmatpush.msra.mxu1 %v863_v63 }
  0xc2   : > { %1075 = vmatpush.msra.mxu1 %v862_v0  ;;  %3899 = vmatmul.msk.f32.vlgmr.msrb.gmra.mxu2 %vm877_vm2, %v4600_v49  ;;  %v873_v0 = vld [vmem:[%s5564_s11] sm:$0xff] }
  0xc3   : > { %3894 = vmatmul.msk.f32.vlgmr.msrb.gmra.mxu1 %vm877_vm2, %v4600_v49  ;;  %3900 = vmatmul.msk.f32.vlgmr.msrb.gmra.mxu3 %vm877_vm2, %v4600_v49 }
  0xc4   : > { %1076 = vmatpush.msra.mxu1 %v861_v1  ;;  %v874_v1 = vld [vmem:[%s5564_s11 + $0x8] sm:$0xff] }
  0xcb   : > { %3898 = vmatmul.msk.f32.vlgmr.msra.gmra.mxu1 %vm877_vm2, %v4600_v49 }
 0x12f   : > { %v898_v2 = vpop.f32.mrf.mxu1 }
 0x130   : > { %v978_v3 = vpop.f32.mrf.mxu0 }
 0x131   : > { %3901 = vmatpush.xpose.msk.msrb.mxu0 %vm1121_vm3, %v978_v3  ;;  %v876_v3 = vld [vmem:[%s5564_s11 + $0x18] sm:$0xff] }
 0x134   : > { %3902 = vmatmul.msk.f32.vlgmr.msrb.gmra.mxu0 %vm1121_vm3, %v898_v2  ;;  %v875_v2 = vld [vmem:[%s5564_s11 + $0x10] sm:$0xff] }
 0x135   : > { %v938_v4 = vpop.f32.mrf.mxu2 }
 0x136   : > { %v958_v5 = vpop.f32.mrf.mxu3 }
 0x137   : > { %v918_v6 = vpop.f32.mrf.mxu1 }
 0x138   : > { %v1058_v7 = vpop.f32.mrf.mxu0 }
 0x139   : > { %1296 = vmatpush.msra.mxu0 %v1058_v7 }
 0x13b   : > { %1388 = vmatpush.msrb.mxu0 %v873_v0  ;;  %v1531_v0 = vld [vmem:[%s5566_s13 + $0x60] sm:$0xff] }
 0x13d   : > { %v1018_v8 = vpop.f32.mrf.mxu2 }
 0x13e   : > { %v1038_v9 = vpop.f32.mrf.mxu3  ;;  %3905 = vmatpush.xpose.msk.msra.mxu2 %vm1121_vm3, %v1018_v8 }
 0x13f   : > { %3907 = vmatpush.xpose.msk.msra.mxu3 %vm1121_vm3, %v1038_v9 }
 0x140   : > { %v998_v10 = vpop.f32.mrf.mxu1 }
 0x141   : > { %3903 = vmatpush.xpose.msk.msrb.mxu1 %vm1121_vm3, %v998_v10  ;;  %3906 = vmatmul.msk.f32.vlgmr.msra.gmra.mxu2 %vm1121_vm3, %v938_v4 }
 0x142   : > { %3908 = vmatmul.msk.f32.vlgmr.msra.gmra.mxu3 %vm1121_vm3, %v958_v5 }
 0x144   : > { %3904 = vmatmul.msk.f32.vlgmr.msrb.gmra.mxu1 %vm1121_vm3, %v918_v6 }
 0x145   : > { %v1098_v11 = vpop.f32.mrf.mxu2 }
 0x146   : > { %v1118_v12 = vpop.f32.mrf.mxu3  ;;  %1342 = vmatpush.msrb.mxu2 %v1098_v11 }
 0x147   : > { %1365 = vmatpush.msrb.mxu3 %v1118_v12 }
 0x148   : > { %v1078_v13 = vpop.f32.mrf.mxu1  ;;  %1434 = vmatpush.msra.mxu2 %v875_v2 }
 0x149   : > { %1319 = vmatpush.msra.mxu1 %v1078_v13  ;;  %1457 = vmatpush.msra.mxu3 %v876_v3 }
 0x14b   : > { %1411 = vmatpush.msrb.mxu1 %v874_v1 }
 0x1b1   : > { %v1145_v15 = vpop.f32.mrf.mxu0 }
 0x1b2   : > { %v1226_v16 = vmul.f32 0.35355338, %v1145_v15 }
 0x1b4   : > { %v1230_v17 = vadd.f32 %v1226_v16, %v703_v14 }
 0x1b6   : > { %v1234_v18 = vsel %vm1121_vm3, %v1230_v17, -inf }
 0x1b7   : > { %1235 = vmax.xlane.f32.xlu1 %v1234_v18 }
 0x1c1   : > { %v1171_v19 = vpop.f32.mrf.mxu1 }
 0x1c2   : > { %v1227_v20 = vmul.f32 0.35355338, %v1171_v19 }
 0x1c4   : > { %v1231_v21 = vadd.f32 %v1227_v20, %v703_v14  ;;  %v1197_v22 = vpop.f32.mrf.mxu2 }
 0x1c5   : > { %v1228_v23 = vmul.f32 0.35355338, %v1197_v22  ;;  %v1223_v25 = vpop.f32.mrf.mxu3 }
 0x1c6   : > { %v1237_v24 = vsel %vm1121_vm3, %v1231_v21, -inf  ;;  %v1229_v27 = vmul.f32 0.35355338, %v1223_v25 }
 0x1c7   : > { %1238 = vmax.xlane.f32.xlu1 %v1237_v24  ;;  %v1232_v26 = vadd.f32 %v1228_v23, %v703_v14 }
 0x1c8   : > { %v1233_v29 = vadd.f32 %v1229_v27, %v703_v14 }
 0x1c9   : > { %v1240_v28 = vsel %vm1121_vm3, %v1232_v26, -inf }
 0x1ca   : > { %1241 = vmax.xlane.f32.xlu0 %v1240_v28  ;;  %v1243_v30 = vsel %vm1121_vm3, %v1233_v29, -inf }
 0x1d2   : > { %1244 = vmax.xlane.f32.xlu0 %v1243_v30 }
 0x22a   : > { %v1236_v31 = vpop.xlane.xlu1 %1235 }
 0x22b   : > { %v1246_v32 = vsub.f32 %v1230_v17, %v1236_v31 }
 0x22d   : > { %v1250_v33 = vmul.f32 1.442695, %v1246_v32  ;;  %v1506_v32 = vld [vmem:[%s5565_s12 + $0x18] sm:$0xff] }
 0x22f   : > { %4176 = vpow2.f32 %v1250_v33  ;;  %v1510_v33 = vld [vmem:[%s5565_s12 + $0x38] sm:$0xff] }
 0x235   : > { %v4177_v34 = vpop.eup %4176 }
 0x236   : > { %v1258_v35 = vsel %vm1121_vm3, %v4177_v34, 0.0 }
 0x237   : > { %1259 = vadd.xlane.f32.xlu0 %v1258_v35  ;;  %v1518_v35 = vld [vmem:[%s5565_s12 + $0x78] sm:$0xff] }
 0x23a   : > { %v1239_v36 = vpop.xlane.xlu1 %1238 }
 0x23b   : > { %v1247_v37 = vsub.f32 %v1231_v21, %v1239_v36  ;;  %v4321_v21 = vmov 32.0   ;;  %v1505_v36 = vld [vmem:[%s5565_s12 + $0x10] sm:$0xff] }
 0x23d   : > { %v1252_v38 = vmul.f32 1.442695, %v1247_v37  ;;  %v1242_v39 = vpop.xlane.xlu0 %1241  ;;  %v1509_v37 = vld [vmem:[%s5565_s12 + $0x30] sm:$0xff] }
 0x23e   : > { %v1248_v40 = vsub.f32 %v1232_v26, %v1242_v39  ;;  %v1517_v39 = vld [vmem:[%s5565_s12 + $0x70] sm:$0xff] }
 0x23f   : > { %4178 = vpow2.f32 %v1252_v38  ;;  %v1513_v38 = vld [vmem:[%s5565_s12 + $0x50] sm:$0xff] }
 0x240   : > { %v1254_v41 = vmul.f32 1.442695, %v1248_v40  ;;  %v1504_v40 = vld [vmem:[%s5565_s12 + $0x8] sm:$0xff] }
 0x242   : > { %4180 = vpow2.f32 %v1254_v41  ;;  %v1508_v41 = vld [vmem:[%s5565_s12 + $0x28] sm:$0xff] }
 0x245   : > { %v4179_v42 = vpop.eup %4178  ;;  %v1245_v43 = vpop.xlane.xlu0 %1244 }
 0x246   : > { %v1261_v44 = vsel %vm1121_vm3, %v4179_v42, 0.0  ;;  %v1249_v45 = vsub.f32 %v1233_v29, %v1245_v43  ;;  %v1516_v43 = vld [vmem:[%s5565_s12 + $0x68] sm:$0xff] }
 0x247   : > { %1262 = vadd.xlane.f32.xlu1 %v1261_v44  ;;  %v1503_v44 = vld [vmem:[%s5565_s12] sm:$0xff] }
 0x248   : > { %v4181_v46 = vpop.eup %4180  ;;  %v1256_v47 = vmul.f32 1.442695, %v1249_v45  ;;  %v1507_v45 = vld [vmem:[%s5565_s12 + $0x20] sm:$0xff] }
 0x249   : > { %v1264_v48 = vsel %vm1121_vm3, %v4181_v46, 0.0 }
 0x24a   : > { %4182 = vpow2.f32 %v1256_v47  ;;  %1265 = vadd.xlane.f32.xlu2 %v1264_v48  ;;  %v1515_v47 = vld [vmem:[%s5565_s12 + $0x60] sm:$0xff]  ;;  %v1522_v48 = vld [vmem:[%s5566_s13 + $0x18] sm:$0xff] }
 0x250   : > { %v4183_v50 = vpop.eup %4182 }
 0x251   : > { %v1267_v51 = vsel %vm1121_vm3, %v4183_v50, 0.0 }
 0x252   : > { %1268 = vadd.xlane.f32.xlu2 %v1267_v51  ;;  %v1530_v51 = vld [vmem:[%s5566_s13 + $0x58] sm:$0xff] }
 0x2aa   : > { %v1260_v52 = vpop.xlane.xlu0 %1259 }
 0x2ab   : > { %4184 = vrcp.f32 %v1260_v52  ;;  %v1534_v52 = vld [vmem:[%s5566_s13 + $0x78] sm:$0xff] }
 0x2b1   : > { %v4185_v53 = vpop.eup %4184 }
 0x2b2   : > { %v1274_v54 = vmul.f32 %v4185_v53, %v4177_v34  ;;  %v1514_v34 = vld [vmem:[%s5565_s12 + $0x58] sm:$0xff]  ;;  %v1521_v53 = vld [vmem:[%s5566_s13 + $0x10] sm:$0xff] }
 0x2b4   : > { %1499 = vst.msk [vmem:[%s4703_s21] sm:$0xff] %vm1121_vm3, %v1274_v54  ;;  %3909 = vmatmul.msk.f32.vlgmr.msra.gmra.mxu0 %vm1121_vm3, %v1274_v54  ;;  %v1525_v54 = vld [vmem:[%s5566_s13 + $0x30] sm:$0xff] }
 0x2b5   : > { %1570 = vmatpush.msra.mxu0 %v1506_v32 }
 0x2b7   : > { %1571 = vmatpush.msra.mxu0 %v1505_v36 }
 0x2b9   : > { %1572 = vmatpush.msra.mxu0 %v1504_v40 }
 0x2ba   : > { %v1263_v55 = vpop.xlane.xlu1 %1262 }
 0x2bb   : > { %4186 = vrcp.f32 %v1263_v55  ;;  %1573 = vmatpush.msra.mxu0 %v1503_v44  ;;  %v1529_v55 = vld [vmem:[%s5566_s13 + $0x50] sm:$0xff] }
 0x2bd   : > { %v1266_v56 = vpop.xlane.xlu2 %1265 }
 0x2be   : > { %4188 = vrcp.f32 %v1266_v56  ;;  %v1533_v56 = vld [vmem:[%s5566_s13 + $0x70] sm:$0xff] }
 0x2c1   : > { %v4187_v57 = vpop.eup %4186 }
 0x2c2   : > { %v1275_v58 = vmul.f32 %v4187_v57, %v4179_v42  ;;  %v1512_v42 = vld [vmem:[%s5565_s12 + $0x48] sm:$0xff] }
 0x2c3   : > { %v1520_v57 = vld [vmem:[%s5566_s13 + $0x8] sm:$0xff] }
 0x2c4   : > { %1500 = vst.msk [vmem:[%s4703_s21 + $0x8] sm:$0xff] %vm1121_vm3, %v1275_v58  ;;  %3910 = vmatmul.msk.f32.vlgmr.msra.gmra.mxu1 %vm1121_vm3, %v1275_v58  ;;  %v4189_v59 = vpop.eup %4188  ;;  %v1524_v58 = vld [vmem:[%s5566_s13 + $0x28] sm:$0xff] }
 0x2c5   : > { %v1276_v60 = vmul.f32 %v4189_v59, %v4181_v46  ;;  %v1269_v61 = vpop.xlane.xlu2 %1268  ;;  %1590 = vmatpush.msra.mxu1 %v1510_v33  ;;  %v1511_v46 = vld [vmem:[%s5565_s12 + $0x40] sm:$0xff]  ;;  %v1528_v59 = vld [vmem:[%s5566_s13 + $0x48] sm:$0xff] }
 0x2c6   : > { %4190 = vrcp.f32 %v1269_v61  ;;  %v1519_v61 = vld [vmem:[%s5566_s13] sm:$0xff] }
 0x2c7   : > { %1501 = vst.msk [vmem:[%s4703_s21 + $0x10] sm:$0xff] %vm1121_vm3, %v1276_v60  ;;  %3911 = vmatmul.msk.f32.vlgmr.msrb.gmra.mxu2 %vm1121_vm3, %v1276_v60  ;;  %4192 = vrcp.f32 %v4321_v21  ;;  %1591 = vmatpush.msra.mxu1 %v1509_v37  ;;  %v1532_v60 = vld [vmem:[%s5566_s13 + $0x68] sm:$0xff]  ;;  %v1546_v21 = vld [vmem:[%s5567_s14 + $0x58] sm:$0xff] }
 0x2c8   : > { %1610 = vmatpush.msrb.mxu2 %v1514_v34 }
 0x2c9   : > { %1592 = vmatpush.msra.mxu1 %v1508_v41  ;;  %v704_v41 = vld [vmem:[%s4930_s23] sm:$0xff] }
 0x2ca   : > { %1611 = vmatpush.msrb.mxu2 %v1513_v38 }
 0x2cb   : > { %1593 = vmatpush.msra.mxu1 %v1507_v45 }
 0x2cc   : > { %v4191_v62 = vpop.eup %4190  ;;  %1612 = vmatpush.msrb.mxu2 %v1512_v42 }
 0x2cd   : > { %v1277_v63 = vmul.f32 %v4191_v62, %v4183_v50  ;;  %v4193_v22 = vpop.eup %4192  ;;  %v1526_v50 = vld [vmem:[%s5566_s13 + $0x38] sm:$0xff]  ;;  %v1523_v62 = vld [vmem:[%s5566_s13 + $0x20] sm:$0xff] }
 0x2ce   : > { %v1474_v23 = vmul.f32 32.0, %v4193_v22  ;;  %vm1478_vm4 = vweird.f32 %v4193_v22  ;;  %1613 = vmatpush.msrb.mxu2 %v1511_v46 }
 0x2cf   : > { %1502 = vst.msk [vmem:[%s4703_s21 + $0x18] sm:$0xff] %vm1121_vm3, %v1277_v63  ;;  %3912 = vmatmul.msk.f32.vlgmr.msrb.gmra.mxu3 %vm1121_vm3, %v1277_v63  ;;  %v1527_v63 = vld [vmem:[%s5566_s13 + $0x40] sm:$0xff] }
 0x2d0   : > { %v1475_v24 = vsub.f32 1.0, %v1474_v23  ;;  %1630 = vmatpush.msrb.mxu3 %v1518_v35  ;;  %v1545_v23 = vld [vmem:[%s5567_s14 + $0x50] sm:$0xff] }
 0x2d2   : > { %v1476_v25 = vmul.f32 %v4193_v22, %v1475_v24  ;;  %1631 = vmatpush.msrb.mxu3 %v1517_v39  ;;  %v1549_v24 = vld [vmem:[%s5567_s14 + $0x70] sm:$0xff] }
 0x2d4   : > { %v1477_v26 = vadd.f32 %v4193_v22, %v1476_v25  ;;  %1632 = vmatpush.msrb.mxu3 %v1516_v43  ;;  %v1544_v25 = vld [vmem:[%s5567_s14 + $0x48] sm:$0xff] }
 0x2d6   : > { %v4739_v27 = vsel %vm1478_vm4, %v4193_v22, %v1477_v26  ;;  %1633 = vmatpush.msrb.mxu3 %v1515_v47  ;;  %v1550_v22 = vld [vmem:[%s5567_s14 + $0x78] sm:$0xff]  ;;  %v1548_v26 = vld [vmem:[%s5567_s14 + $0x68] sm:$0xff] }
 0x331   : > { %v1298_v4 = vpop.f32.mrf.mxu0 }
 0x332   : > { %3913 = vmatmul.msk.f32.vlgmr.msrb.gmra.mxu0 %vm1121_vm3, %v1298_v4 }
 0x333   : > { %1653 = vmatpush.msrb.mxu0 %v1522_v48 }
 0x335   : > { %1654 = vmatpush.msrb.mxu0 %v1521_v53 }
 0x337   : > { %1655 = vmatpush.msrb.mxu0 %v1520_v57 }
 0x339   : > { %1656 = vmatpush.msrb.mxu0 %v1519_v61 }
 0x341   : > { %v1321_v5 = vpop.f32.mrf.mxu1 }
 0x342   : > { %3914 = vmatmul.msk.f32.vlgmr.msrb.gmra.mxu1 %vm1121_vm3, %v1321_v5 }
 0x343   : > { %1673 = vmatpush.msrb.mxu1 %v1526_v50 }
 0x345   : > { %1674 = vmatpush.msrb.mxu1 %v1525_v54 }
 0x347   : > { %1675 = vmatpush.msrb.mxu1 %v1524_v58 }
 0x349   : > { %1676 = vmatpush.msrb.mxu1 %v1523_v62 }
 0x34a   : > { %v1344_v6 = vpop.f32.mrf.mxu2 }
 0x34b   : > { %3915 = vmatmul.msk.f32.vlgmr.msra.gmra.mxu2 %vm1121_vm3, %v1344_v6 }
 0x34c   : > { %1693 = vmatpush.msra.mxu2 %v1530_v51 }
 0x34e   : > { %1694 = vmatpush.msra.mxu2 %v1529_v55 }
 0x350   : > { %1695 = vmatpush.msra.mxu2 %v1528_v59 }
 0x352   : > { %v1367_v7 = vpop.f32.mrf.mxu3  ;;  %1696 = vmatpush.msra.mxu2 %v1527_v63 }
 0x353   : > { %3916 = vmatmul.msk.f32.vlgmr.msra.gmra.mxu3 %vm1121_vm3, %v1367_v7 }
 0x354   : > { %1713 = vmatpush.msra.mxu3 %v1534_v52 }
 0x356   : > { %1714 = vmatpush.msra.mxu3 %v1533_v56 }
 0x358   : > { %1715 = vmatpush.msra.mxu3 %v1532_v60 }
 0x35a   : > { %1716 = vmatpush.msra.mxu3 %v1531_v0 }
 0x3af   : > { %v1390_v9 = vpop.f32.mrf.mxu0 }
 0x3b0   : > { %v1462_v12 = vsel %vm877_vm2, %v1390_v9, 0.0 }
 0x3bf   : > { %v1413_v8 = vpop.f32.mrf.mxu1 }
 0x3c0   : > { %v1463_v11 = vsel %vm877_vm2, %v1413_v8, 0.0 }
 0x3c1   : > { %v1464_v14 = vadd.f32 %v1463_v11, %v1462_v12  ;;  %v1538_v12 = vld [vmem:[%s5567_s14 + $0x18] sm:$0xff] }
 0x3ce   : > { %v1436_v10 = vpop.f32.mrf.mxu2 }
 0x3cf   : > { %v1465_v13 = vsel %vm877_vm2, %v1436_v10, 0.0 }
 0x3d0   : > { %v1466_v15 = vadd.f32 %v1465_v13, %v1464_v14  ;;  %v1542_v13 = vld [vmem:[%s5567_s14 + $0x38] sm:$0xff]  ;;  %v1537_v14 = vld [vmem:[%s5567_s14 + $0x10] sm:$0xff] }
 0x3d6   : > { %v1459_v16 = vpop.f32.mrf.mxu3 }
 0x3d7   : > { %v1467_v17 = vsel %vm877_vm2, %v1459_v16, 0.0  ;;  %v702_v16 = vld [vmem:[%s4871_s29] sm:$0xff] }
 0x3d8   : > { %v1468_v18 = vadd.f32 %v1467_v17, %v1466_v15  ;;  %v1541_v15 = vld [vmem:[%s5567_s14 + $0x30] sm:$0xff]  ;;  %v1536_v17 = vld [vmem:[%s5567_s14 + $0x8] sm:$0xff] }
 0x3da   : > { %v1469_v19 = vadd.f32 %v1468_v18, %v4600_v49  ;;  %v1540_v18 = vld [vmem:[%s5567_s14 + $0x28] sm:$0xff] }
 0x3dc   : > { %v1470_v20 = vsel %vm877_vm2, %v1469_v19, 0.0 }
 0x3dd   : > { %1471 = vadd.xlane.f32.xlu2 %v1470_v20  ;;  %v1539_v20 = vld [vmem:[%s5567_s14 + $0x20] sm:$0xff] }
 0x450   : > { %v1472_v28 = vpop.xlane.xlu2 %1471 }
 0x451   : > { %v1480_v29 = vmul.f32 %v4739_v27, %v1472_v28  ;;  %v1543_v28 = vld [vmem:[%s5567_s14 + $0x40] sm:$0xff] }
 0x453   : > { %v4742_v30 = vsub.f32 %v1469_v19, %v1480_v29  ;;  %v1535_v19 = vld [vmem:[%s5567_s14] sm:$0xff] }
 0x454   : > { %v1547_v29 = vld [vmem:[%s5567_s14 + $0x60] sm:$0xff] }
 0x455   : > { %v1482_v49 = vmul.f32 %v4742_v30, %v4742_v30 }
 0x457   : > { %v1483_v31 = vsel %vm877_vm2, %v1482_v49, 0.0 }
 0x458   : > { %1484 = vadd.xlane.f32.xlu0 %v1483_v31 }
 0x4cb   : > { %v1485_v1 = vpop.xlane.xlu0 %1484 }
 0x4cc   : > { %v1486_v2 = vmul.f32 %v1485_v1, %v4739_v27 }
 0x4ce   : > { %v1487_v3 = vadd.f32 1e-05, %v1486_v2 }
 0x4d0   : > { %4194 = vrsqrt.f32 %v1487_v3  ;;  %vm1494_vm6 = vweird.f32 %v1487_v3 }
 0x4d6   : > { %v4195_v4 = vpop.eup %4194 }
 0x4d7   : > { %v1489_v5 = vmul.f32 %v4195_v4, %v1487_v3  ;;  %vm1495_vm5 = vweird.f32 %v4195_v4 }
 0x4d8   : > { %vm1496_vm7 = vmor %vm1494_vm6, %vm1495_vm5 }
 0x4d9   : > { %v1490_v6 = vmul.f32 %v4195_v4, %v1489_v5 }
 0x4db   : > { %v1491_v7 = vmul.f32 0.5, %v1490_v6 }
 0x4dd   : > { %v1492_v8 = vsub.f32 1.5, %v1491_v7 }
 0x4df   : > { %v1493_v9 = vmul.f32 %v4195_v4, %v1492_v8 }
 0x4e1   : > { %v1497_v10 = vsel %vm1496_vm7, %v4195_v4, %v1493_v9 }
 0x4e2   : > { %v4845_v11 = vmul.f32 %v1497_v10, %v4742_v30 }
 0x4e4   : > { %3917 = vmatmul.msk.f32.vlgmr.msra.gmra.mxu0 %vm877_vm2, %v4845_v11  ;;  %3918 = vmatmul.msk.f32.vlgmr.msra.gmra.mxu1 %vm877_vm2, %v4845_v11 }
 0x4e5   : > { %3919 = vmatmul.msk.f32.vlgmr.msrb.gmra.mxu2 %vm877_vm2, %v4845_v11  ;;  %3920 = vmatmul.msk.f32.vlgmr.msrb.gmra.mxu3 %vm877_vm2, %v4845_v11 }
 0x4e6   : > { %1733 = vmatpush.msra.mxu0 %v1538_v12  ;;  %1753 = vmatpush.msra.mxu1 %v1542_v13 }
 0x4e7   : > { %1773 = vmatpush.msrb.mxu2 %v1546_v21  ;;  %1793 = vmatpush.msrb.mxu3 %v1550_v22 }
 0x4e8   : > { %1734 = vmatpush.msra.mxu0 %v1537_v14  ;;  %1754 = vmatpush.msra.mxu1 %v1541_v15 }
 0x4e9   : > { %1774 = vmatpush.msrb.mxu2 %v1545_v23  ;;  %1794 = vmatpush.msrb.mxu3 %v1549_v24 }
 0x4ea   : > { %1735 = vmatpush.msra.mxu0 %v1536_v17  ;;  %1755 = vmatpush.msra.mxu1 %v1540_v18 }
 0x4eb   : > { %1775 = vmatpush.msrb.mxu2 %v1544_v25  ;;  %1795 = vmatpush.msrb.mxu3 %v1548_v26 }
 0x4ec   : > { %3921 = vmatmul.msk.f32.vlgmr.msrb.gmra.mxu0 %vm877_vm2, %v702_v16  ;;  %3922 = vmatmul.msk.f32.vlgmr.msrb.gmra.mxu1 %vm877_vm2, %v702_v16 }
 0x4ed   : > { %3923 = vmatmul.msk.f32.vlgmr.msra.gmra.mxu2 %vm877_vm2, %v702_v16  ;;  %3924 = vmatmul.msk.f32.vlgmr.msra.gmra.mxu3 %vm877_vm2, %v702_v16 }
 0x4ee   : > { %1736 = vmatpush.msra.mxu0 %v1535_v19  ;;  %1756 = vmatpush.msra.mxu1 %v1539_v20 }
 0x4ef   : > { %1776 = vmatpush.msrb.mxu2 %v1543_v28  ;;  %1796 = vmatpush.msrb.mxu3 %v1547_v29  ;;  %v1551_v29 = vld [vmem:[%s5568_s15] sm:$0xff] }
 0x4f4   : > { %3925 = vmatmul.msk.f32.vlgmr.msra.gmra.mxu0 %vm877_vm2, %v702_v16  ;;  %3926 = vmatmul.msk.f32.vlgmr.msra.gmra.mxu1 %vm877_vm2, %v702_v16 }
 0x4f5   : > { %3927 = vmatmul.msk.f32.vlgmr.msrb.gmra.mxu2 %vm877_vm2, %v702_v16  ;;  %3928 = vmatmul.msk.f32.vlgmr.msrb.gmra.mxu3 %vm877_vm2, %v702_v16 }
 0x561   : > { %v1575_v30 = vpop.f32.mrf.mxu0  ;;  %v1595_v49 = vpop.f32.mrf.mxu1 }
 0x568   : > { %v1615_v31 = vpop.f32.mrf.mxu2  ;;  %v1635_v32 = vpop.f32.mrf.mxu3 }
 0x569   : > { %v1658_v33 = vpop.f32.mrf.mxu0  ;;  %v1678_v34 = vpop.f32.mrf.mxu1 }
 0x56a   : > { %3929 = vmatpush.xpose.msk.msrb.mxu0 %vm1121_vm3, %v1658_v33  ;;  %3931 = vmatpush.xpose.msk.msrb.mxu1 %vm1121_vm3, %v1678_v34 }
 0x56d   : > { %3930 = vmatmul.msk.f32.vlgmr.msrb.gmra.mxu0 %vm1121_vm3, %v1575_v30  ;;  %3932 = vmatmul.msk.f32.vlgmr.msrb.gmra.mxu1 %vm1121_vm3, %v1595_v49  ;;  %v1553_v30 = vld [vmem:[%s5568_s15 + $0x10] sm:$0xff]  ;;  %v1554_v49 = vld [vmem:[%s5568_s15 + $0x18] sm:$0xff] }
 0x570   : > { %v1698_v35 = vpop.f32.mrf.mxu2  ;;  %v1718_v36 = vpop.f32.mrf.mxu3 }
 0x571   : > { %3933 = vmatpush.xpose.msk.msra.mxu2 %vm1121_vm3, %v1698_v35  ;;  %3935 = vmatpush.xpose.msk.msra.mxu3 %vm1121_vm3, %v1718_v36  ;;  %v1738_v37 = vpop.f32.mrf.mxu0  ;;  %v1758_v38 = vpop.f32.mrf.mxu1 }
 0x572   : > { %1975 = vmatpush.msra.mxu0 %v1738_v37  ;;  %1998 = vmatpush.msra.mxu1 %v1758_v38 }
 0x574   : > { %3934 = vmatmul.msk.f32.vlgmr.msra.gmra.mxu2 %vm1121_vm3, %v1615_v31  ;;  %3936 = vmatmul.msk.f32.vlgmr.msra.gmra.mxu3 %vm1121_vm3, %v1635_v32  ;;  %v1552_v31 = vld [vmem:[%s5568_s15 + $0x8] sm:$0xff] }
 0x575   : > { %2067 = vmatpush.msrb.mxu0 %v1551_v29  ;;  %2090 = vmatpush.msrb.mxu1 %v1552_v31  ;;  %v3949_v29 = vld [vmem:[%s5561_s8 + $0x90] sm:$0xff] }
 0x576   : > { %v3973_v31 = vld [vmem:[%s5562_s9 + $0xd0] sm:$0xff] }
 0x578   : > { %v1778_v39 = vpop.f32.mrf.mxu2  ;;  %v1798_v40 = vpop.f32.mrf.mxu3 }
 0x579   : > { %2021 = vmatpush.msrb.mxu2 %v1778_v39  ;;  %2044 = vmatpush.msrb.mxu3 %v1798_v40 }
 0x57b   : > { %2113 = vmatpush.msra.mxu2 %v1553_v30  ;;  %2136 = vmatpush.msra.mxu3 %v1554_v49  ;;  %v3953_v30 = vld [vmem:[%s5561_s8 + $0xb0] sm:$0xff] }
 0x57c   : > { %v3957_v49 = vld [vmem:[%s5561_s8 + $0xd0] sm:$0xff] }
 0x5ea   : > { %v1824_v42 = vpop.f32.mrf.mxu0  ;;  %v1850_v51 = vpop.f32.mrf.mxu1 }
 0x5eb   : > { %v1905_v43 = vmul.f32 0.35355338, %v1824_v42  ;;  %v1906_v54 = vmul.f32 0.35355338, %v1850_v51 }
 0x5ed   : > { %v1909_v44 = vadd.f32 %v1905_v43, %v704_v41  ;;  %v1910_v57 = vadd.f32 %v1906_v54, %v704_v41 }
 0x5ef   : > { %v1913_v45 = vsel %vm1121_vm3, %v1909_v44, -inf  ;;  %v1916_v58 = vsel %vm1121_vm3, %v1910_v57, -inf }
 0x5f0   : > { %1914 = vmax.xlane.f32.xlu0 %v1913_v45 }
 0x5f7   : > { %v1876_v46 = vpop.f32.mrf.mxu2  ;;  %v1902_v47 = vpop.f32.mrf.mxu3 }
 0x5f8   : > { %v1907_v48 = vmul.f32 0.35355338, %v1876_v46  ;;  %v1908_v50 = vmul.f32 0.35355338, %v1902_v47 }
 0x5fa   : > { %v1912_v52 = vadd.f32 %v1908_v50, %v704_v41  ;;  %v1911_v53 = vadd.f32 %v1907_v48, %v704_v41 }
 0x5fc   : > { %v1922_v55 = vsel %vm1121_vm3, %v1912_v52, -inf  ;;  %v1919_v56 = vsel %vm1121_vm3, %v1911_v53, -inf }
 0x5fd   : > { %1923 = vmax.xlane.f32.xlu2 %v1922_v55  ;;  %1920 = vmax.xlane.f32.xlu1 %v1919_v56  ;;  %v2178_v55 = vld [vmem:[%s5569_s16 + $0x18] sm:$0xff]  ;;  %v2176_v56 = vld [vmem:[%s5569_s16 + $0x8] sm:$0xff] }
 0x605   : > { %1917 = vmax.xlane.f32.xlu1 %v1916_v58  ;;  %v2210_v58 = vld [vmem:[%s5570_s17 + $0x38] sm:$0xff] }
 0x663   : > { %v1915_v59 = vpop.xlane.xlu0 %1914 }
 0x664   : > { %v1925_v60 = vsub.f32 %v1909_v44, %v1915_v59  ;;  %v2209_v59 = vld [vmem:[%s5570_s17 + $0x30] sm:$0xff] }
 0x666   : > { %v1929_v61 = vmul.f32 1.442695, %v1925_v60  ;;  %v2208_v60 = vld [vmem:[%s5570_s17 + $0x28] sm:$0xff] }
 0x668   : > { %4196 = vpow2.f32 %v1929_v61  ;;  %v2207_v61 = vld [vmem:[%s5570_s17 + $0x20] sm:$0xff] }
 0x66e   : > { %v4197_v62 = vpop.eup %4196 }
 0x66f   : > { %v1937_v63 = vsel %vm1121_vm3, %v4197_v62, 0.0 }
 0x670   : > { %v1924_v0 = vpop.xlane.xlu2 %1923  ;;  %v1921_v1 = vpop.xlane.xlu1 %1920  ;;  %1938 = vadd.xlane.f32.xlu1 %v1937_v63 }
 0x671   : > { %v1928_v2 = vsub.f32 %v1912_v52, %v1924_v0  ;;  %v1927_v3 = vsub.f32 %v1911_v53, %v1921_v1  ;;  %v2205_v1 = vld [vmem:[%s5570_s17 + $0x10] sm:$0xff] }
 0x673   : > { %v1935_v4 = vmul.f32 1.442695, %v1928_v2  ;;  %v1933_v5 = vmul.f32 1.442695, %v1927_v3 }
 0x675   : > { %4198 = vpow2.f32 %v1935_v4 }
 0x676   : > { %4200 = vpow2.f32 %v1933_v5 }
 0x678   : > { %v1918_v6 = vpop.xlane.xlu1 %1917 }
 0x679   : > { %v1926_v7 = vsub.f32 %v1910_v57, %v1918_v6  ;;  %v2175_v57 = vld [vmem:[%s5569_s16] sm:$0xff] }
 0x67b   : > { %v4199_v8 = vpop.eup %4198  ;;  %v1931_v9 = vmul.f32 1.442695, %v1926_v7 }
 0x67c   : > { %v4201_v10 = vpop.eup %4200  ;;  %v1946_v12 = vsel %vm1121_vm3, %v4199_v8, 0.0 }
 0x67d   : > { %4202 = vpow2.f32 %v1931_v9  ;;  %v1943_v13 = vsel %vm1121_vm3, %v4201_v10, 0.0  ;;  %1947 = vadd.xlane.f32.xlu0 %v1946_v12  ;;  %v2204_v12 = vld [vmem:[%s5570_s17 + $0x8] sm:$0xff] }
 0x67e   : > { %1944 = vadd.xlane.f32.xlu2 %v1943_v13  ;;  %v2203_v13 = vld [vmem:[%s5570_s17] sm:$0xff] }
 0x683   : > { %v4203_v14 = vpop.eup %4202 }
 0x684   : > { %v1940_v15 = vsel %vm1121_vm3, %v4203_v14, 0.0 }
 0x686   : > { %1941 = vadd.xlane.f32.xlu2 %v1940_v15 }
 0x6e3   : > { %v1939_v16 = vpop.xlane.xlu1 %1938 }
 0x6e4   : > { %4204 = vrcp.f32 %v1939_v16 }
 0x6ea   : > { %v4205_v17 = vpop.eup %4204 }
 0x6eb   : > { %v1953_v18 = vmul.f32 %v4205_v17, %v4197_v62  ;;  %v2206_v62 = vld [vmem:[%s5570_s17 + $0x18] sm:$0xff] }
 0x6ed   : > { %2171 = vst.msk [vmem:[%s4946_s6] sm:$0xff] %vm1121_vm3, %v1953_v18  ;;  %3937 = vmatmul.msk.f32.vlgmr.msra.gmra.mxu0 %vm1121_vm3, %v1953_v18 }
 0x6ee   : > { %2194 = vmatpush.msra.mxu0 %v2178_v55  ;;  %v3967_v55 = vld [vmem:[%s5562_s9 + $0xa0] sm:$0xff] }
 0x6f0   : > { %v1948_v19 = vpop.xlane.xlu0 %1947 }
 0x6f1   : > { %v1945_v20 = vpop.xlane.xlu2 %1944  ;;  %4206 = vrcp.f32 %v1948_v19 }
 0x6f2   : > { %4208 = vrcp.f32 %v1945_v20 }
 0x6f7   : > { %v4207_v21 = vpop.eup %4206 }
 0x6f8   : > { %v4209_v22 = vpop.eup %4208  ;;  %v1956_v23 = vmul.f32 %v4207_v21, %v4199_v8 }
 0x6f9   : > { %v1955_v24 = vmul.f32 %v4209_v22, %v4201_v10  ;;  %v1942_v25 = vpop.xlane.xlu2 %1941 }
 0x6fa   : > { %2174 = vst.msk [vmem:[%s4946_s6 + $0x18] sm:$0xff] %vm1121_vm3, %v1956_v23  ;;  %4210 = vrcp.f32 %v1942_v25  ;;  %3940 = vmatmul.msk.f32.vlgmr.msrb.gmra.mxu3 %vm1121_vm3, %v1956_v23  ;;  %v3954_v25 = vld [vmem:[%s5561_s8 + $0xb8] sm:$0xff] }
 0x6fb   : > { %2173 = vst.msk [vmem:[%s4946_s6 + $0x10] sm:$0xff] %vm1121_vm3, %v1955_v24  ;;  %3939 = vmatmul.msk.f32.vlgmr.msrb.gmra.mxu2 %vm1121_vm3, %v1955_v24  ;;  %v3950_v24 = vld [vmem:[%s5561_s8 + $0x98] sm:$0xff]  ;;  %2348 = vmatpush.msrb.mxu3 %v3954_v25 }
 0x6fc   : > { %2328 = vmatpush.msrb.mxu2 %v3950_v24 }
 0x6fd   : > { %2349 = vmatpush.msrb.mxu3 %v3953_v30 }
 0x6fe   : > { %2329 = vmatpush.msrb.mxu2 %v3949_v29 }
 0x700   : > { %v4211_v26 = vpop.eup %4210 }
 0x701   : > { %v1954_v28 = vmul.f32 %v4211_v26, %v4203_v14  ;;  %v3958_v26 = vld [vmem:[%s5561_s8 + $0xd8] sm:$0xff] }
 0x703   : > { %2172 = vst.msk [vmem:[%s4946_s6 + $0x8] sm:$0xff] %vm1121_vm3, %v1954_v28  ;;  %3938 = vmatmul.msk.f32.vlgmr.msra.gmra.mxu1 %vm1121_vm3, %v1954_v28  ;;  %v3974_v28 = vld [vmem:[%s5562_s9 + $0xd8] sm:$0xff] }
 0x704   : > { %2223 = vmatpush.msra.mxu1 %v2210_v58 }
 0x706   : > { %2224 = vmatpush.msra.mxu1 %v2209_v59 }
 0x708   : > { %2225 = vmatpush.msra.mxu1 %v2208_v60 }
 0x70a   : > { %2226 = vmatpush.msra.mxu1 %v2207_v61 }
 0x70c   : > { %2227 = vmatpush.msra.mxu1 %v2206_v62 }
 0x70e   : > { %2228 = vmatpush.msra.mxu1 %v2205_v1 }
 0x710   : > { %2229 = vmatpush.msra.mxu1 %v2204_v12  ;;  %v3984_v12 = vld [vmem:[%s5563_s10 + $0xa8] sm:$0xff] }
 0x712   : > { %2230 = vmatpush.msra.mxu1 %v2203_v13  ;;  %v3975_v13 = vld [vmem:[%s5562_s9 + $0xe0] sm:$0xff] }
 0x76a   : > { %v1977_v32 = vpop.f32.mrf.mxu0 }
 0x76b   : > { %3941 = vmatmul.msk.f32.vlgmr.msrb.gmra.mxu0 %vm1121_vm3, %v1977_v32  ;;  %v3948_v32 = vld [vmem:[%s5561_s8 + $0x88] sm:$0xff] }
 0x76c   : > { %2330 = vmatpush.msrb.mxu2 %v3948_v32 }
 0x77d   : > { %v2046_v33 = vpop.f32.mrf.mxu3 }
 0x77e   : > { %v2023_v34 = vpop.f32.mrf.mxu2  ;;  %3944 = vmatmul.msk.f32.vlgmr.msra.gmra.mxu3 %vm1121_vm3, %v2046_v33  ;;  %v3952_v33 = vld [vmem:[%s5561_s8 + $0xa8] sm:$0xff] }
 0x77f   : > { %3943 = vmatmul.msk.f32.vlgmr.msra.gmra.mxu2 %vm1121_vm3, %v2023_v34  ;;  %v3956_v34 = vld [vmem:[%s5561_s8 + $0xc8] sm:$0xff]  ;;  %2350 = vmatpush.msrb.mxu3 %v3952_v33 }
 0x780   : > { %v2000_v35 = vpop.f32.mrf.mxu1 }
 0x781   : > { %3942 = vmatmul.msk.f32.vlgmr.msrb.gmra.mxu1 %vm1121_vm3, %v2000_v35  ;;  %v3972_v35 = vld [vmem:[%s5562_s9 + $0xc8] sm:$0xff] }
 0x782   : > { %2448 = vmatpush.msrb.mxu1 %v3974_v28 }
 0x784   : > { %2449 = vmatpush.msrb.mxu1 %v3973_v31 }
 0x786   : > { %2450 = vmatpush.msrb.mxu1 %v3972_v35 }
 0x7e8   : > { %v2069_v36 = vpop.f32.mrf.mxu0 }
 0x7e9   : > { %v2141_v39 = vsel %vm877_vm2, %v2069_v36, 0.0  ;;  %v3947_v36 = vld [vmem:[%s5561_s8 + $0x80] sm:$0xff] }
 0x7ea   : > { %2331 = vmatpush.msrb.mxu2 %v3947_v36 }
 0x7fe   : > { %v2092_v37 = vpop.f32.mrf.mxu1 }
 0x7ff   : > { %v2142_v38 = vsel %vm877_vm2, %v2092_v37, 0.0  ;;  %v3951_v37 = vld [vmem:[%s5561_s8 + $0xa0] sm:$0xff] }
 0x800   : > { %v2143_v40 = vadd.f32 %v2142_v38, %v2141_v39  ;;  %v3955_v38 = vld [vmem:[%s5561_s8 + $0xc0] sm:$0xff]  ;;  %2351 = vmatpush.msrb.mxu3 %v3951_v37 }
 0x801   : > { %v2138_v42 = vpop.f32.mrf.mxu3  ;;  %v3971_v39 = vld [vmem:[%s5562_s9 + $0xc0] sm:$0xff] }
 0x802   : > { %v2115_v41 = vpop.f32.mrf.mxu2  ;;  %v2146_v45 = vsel %vm877_vm2, %v2138_v42, 0.0  ;;  %2451 = vmatpush.msrb.mxu1 %v3971_v39  ;;  %v3970_v42 = vld [vmem:[%s5562_s9 + $0xb8] sm:$0xff] }
 0x803   : > { %v2144_v43 = vsel %vm877_vm2, %v2115_v41, 0.0  ;;  %v3966_v41 = vld [vmem:[%s5562_s9 + $0x98] sm:$0xff] }
 0x804   : > { %v2145_v44 = vadd.f32 %v2144_v43, %v2143_v40  ;;  %v3962_v40 = vld [vmem:[%s5561_s8 + $0xf8] sm:$0xff]  ;;  %2408 = vmatpush.msra.mxu3 %v3966_v41 }
 0x805   : > { %2388 = vmatpush.msra.mxu2 %v3962_v40  ;;  %v3990_v43 = vld [vmem:[%s5563_s10 + $0xd8] sm:$0xff] }
 0x806   : > { %v2147_v46 = vadd.f32 %v2146_v45, %v2145_v44  ;;  %v3961_v44 = vld [vmem:[%s5561_s8 + $0xf0] sm:$0xff] }
 0x807   : > { %v3965_v45 = vld [vmem:[%s5562_s9 + $0x90] sm:$0xff]  ;;  %2389 = vmatpush.msra.mxu2 %v3961_v44 }
 0x808   : > { %v2148_v47 = vadd.f32 %v2147_v46, %v4845_v11  ;;  %v2177_v11 = vld [vmem:[%s5569_s16 + $0x10] sm:$0xff]  ;;  %2409 = vmatpush.msra.mxu3 %v3965_v45 }
 0x809   : > { %2195 = vmatpush.msra.mxu0 %v2177_v11  ;;  %v3969_v46 = vld [vmem:[%s5562_s9 + $0xb0] sm:$0xff]  ;;  %v3987_v11 = vld [vmem:[%s5563_s10 + $0xc0] sm:$0xff] }
 0x80a   : > { %v2149_v48 = vsel %vm877_vm2, %v2148_v47, 0.0 }
 0x80b   : > { %2150 = vadd.xlane.f32.xlu0 %v2149_v48  ;;  %2196 = vmatpush.msra.mxu0 %v2176_v56  ;;  %v3960_v48 = vld [vmem:[%s5561_s8 + $0xe8] sm:$0xff] }
 0x80c   : > { %2390 = vmatpush.msra.mxu2 %v3960_v48 }
 0x80d   : > { %2197 = vmatpush.msra.mxu0 %v2175_v57 }
 0x80f   : > { %2368 = vmatpush.msrb.mxu0 %v3958_v26 }
 0x811   : > { %2369 = vmatpush.msrb.mxu0 %v3957_v49 }
 0x813   : > { %2370 = vmatpush.msrb.mxu0 %v3956_v34  ;;  %v4254_v34 = vld [vmem:[%s4686_s26] sm:$0xff]  ;;  %s3710_s26 = scalar_lea.hbm %s5571_s18, %s4130_s25 }
 0x815   : > { %2371 = vmatpush.msrb.mxu0 %v3955_v38 }
 0x87e   : > { %v2151_v50 = vpop.xlane.xlu0 %2150 }
 0x87f   : > { %v2152_v51 = vmul.f32 %v2151_v50, %v4739_v27  ;;  %v3964_v50 = vld [vmem:[%s5562_s9 + $0x88] sm:$0xff] }
 0x880   : > { %2410 = vmatpush.msra.mxu3 %v3964_v50 }
 0x881   : > { %v2153_v52 = vsub.f32 %v2148_v47, %v2152_v51  ;;  %v3989_v47 = vld [vmem:[%s5563_s10 + $0xd0] sm:$0xff]  ;;  %v3968_v51 = vld [vmem:[%s5562_s9 + $0xa8] sm:$0xff] }
 0x883   : > { %v2154_v53 = vmul.f32 %v2153_v52, %v2153_v52 }
 0x885   : > { %v2155_v54 = vsel %vm877_vm2, %v2154_v53, 0.0  ;;  %v3959_v53 = vld [vmem:[%s5561_s8 + $0xe0] sm:$0xff] }
 0x886   : > { %2156 = vadd.xlane.f32.xlu1 %v2155_v54  ;;  %v3963_v54 = vld [vmem:[%s5562_s9 + $0x80] sm:$0xff]  ;;  %2391 = vmatpush.msra.mxu2 %v3959_v53 }
 0x887   : > { %2411 = vmatpush.msra.mxu3 %v3963_v54 }
 0x8f9   : > { %v2157_v63 = vpop.xlane.xlu1 %2156 }
 0x8fa   : > { %v2158_v0 = vmul.f32 %v2157_v63, %v4739_v27 }
 0x8fc   : > { %v2159_v2 = vadd.f32 1e-05, %v2158_v0 }
 0x8fe   : > { %4212 = vrsqrt.f32 %v2159_v2  ;;  %vm2166_vm9 = vweird.f32 %v2159_v2 }
 0x904   : > { %v4213_v3 = vpop.eup %4212 }
 0x905   : > { %v2161_v4 = vmul.f32 %v4213_v3, %v2159_v2  ;;  %vm2167_vm8 = vweird.f32 %v4213_v3 }
 0x906   : > { %vm2168_vm10 = vmor %vm2166_vm9, %vm2167_vm8 }
 0x907   : > { %v2162_v5 = vmul.f32 %v4213_v3, %v2161_v4  ;;  %v3982_v4 = vld [vmem:[%s5563_s10 + $0x98] sm:$0xff] }
 0x909   : > { %v2163_v6 = vmul.f32 0.5, %v2162_v5  ;;  %v3986_v5 = vld [vmem:[%s5563_s10 + $0xb8] sm:$0xff] }
 0x90b   : > { %v2164_v7 = vsub.f32 1.5, %v2163_v6  ;;  %v3977_v6 = vld [vmem:[%s5562_s9 + $0xf0] sm:$0xff] }
 0x90d   : > { %v2165_v8 = vmul.f32 %v4213_v3, %v2164_v7  ;;  %v3981_v7 = vld [vmem:[%s5563_s10 + $0x90] sm:$0xff] }
 0x90f   : > { %v2169_v9 = vsel %vm2168_vm10, %v4213_v3, %v2165_v8  ;;  %v3978_v3 = vld [vmem:[%s5562_s9 + $0xf8] sm:$0xff]  ;;  %v3985_v8 = vld [vmem:[%s5563_s10 + $0xb0] sm:$0xff] }
 0x910   : > { %v2170_v10 = vmul.f32 %v2169_v9, %v2153_v52  ;;  %v3988_v52 = vld [vmem:[%s5563_s10 + $0xc8] sm:$0xff] }
 0x911   : > { %v3976_v9 = vld [vmem:[%s5562_s9 + $0xe8] sm:$0xff] }
 0x912   : > { %3945 = vmatmul.msk.f32.vlgmr.msra.gmra.mxu0 %vm877_vm2, %v2170_v10 }
 0x913   : > { %2428 = vmatpush.msra.mxu0 %v3970_v42 }
 0x915   : > { %2429 = vmatpush.msra.mxu0 %v3969_v46 }
 0x917   : > { %2430 = vmatpush.msra.mxu0 %v3968_v51 }
 0x919   : > { %2431 = vmatpush.msra.mxu0 %v3967_v55 }
 0x98f   : > { %v2199_v14 = vpop.f32.mrf.mxu0 }
 0x990   : > { %v2202_v15 = vmax.f32 %v2199_v14, 0.0  ;;  %v3979_v14 = vld [vmem:[%s5563_s10 + $0x80] sm:$0xff] }
 0x992   : > { %3946 = vmatmul.msk.f32.vlgmr.msra.gmra.mxu1 %vm2211_vm11, %v2202_v15  ;;  %v3983_v15 = vld [vmem:[%s5563_s10 + $0xa0] sm:$0xff] }
 0x993   : > { %2528 = vmatpush.msra.mxu1 %v3990_v43 }
 0x995   : > { %2529 = vmatpush.msra.mxu1 %v3989_v47 }
 0x997   : > { %2530 = vmatpush.msra.mxu1 %v3988_v52 }
 0x999   : > { %2531 = vmatpush.msra.mxu1 %v3987_v11 }
 0xa0f   : > { %v2232_v16 = vpop.f32.mrf.mxu1 }
 0xa10   : > { %v2233_v17 = vadd.f32 %v2232_v16, %v2170_v10  ;;  %v3980_v10 = vld [vmem:[%s5563_s10 + $0x88] sm:$0xff]  ;;  %v3994_v16 = vld [vmem:[%s5563_s10 + $0xf8] sm:$0xff] }
 0xa12   : > { %v2235_v18 = vsel %vm877_vm2, %v2233_v17, 0.0 }
 0xa13   : > { %2236 = vadd.xlane.f32.xlu2 %v2235_v18  ;;  %v3992_v18 = vld [vmem:[%s5563_s10 + $0xe8] sm:$0xff] }
 0xa86   : > { %v2237_v19 = vpop.xlane.xlu2 %2236 }
 0xa87   : > { %v2238_v20 = vmul.f32 %v2237_v19, %v4739_v27  ;;  %v3991_v19 = vld [vmem:[%s5563_s10 + $0xe0] sm:$0xff] }
 0xa89   : > { %v5025_v21 = vsub.f32 %v2233_v17, %v2238_v20  ;;  %v3993_v17 = vld [vmem:[%s5563_s10 + $0xf0] sm:$0xff] }
 0xa8b   : > { %v2240_v22 = vmul.f32 %v5025_v21, %v5025_v21 }
 0xa8d   : > { %v2241_v23 = vsel %vm877_vm2, %v2240_v22, 0.0 }
 0xa8e   : > { %2242 = vadd.xlane.f32.xlu0 %v2241_v23 }
 0xb01   : > { %v2243_v56 = vpop.xlane.xlu0 %2242 }
 0xb02   : > { %v2244_v57 = vmul.f32 %v2243_v56, %v4739_v27 }
 0xb04   : > { %v2245_v58 = vadd.f32 1e-05, %v2244_v57 }
 0xb06   : > { %4214 = vrsqrt.f32 %v2245_v58  ;;  %vm2252_vm13 = vweird.f32 %v2245_v58 }
 0xb0c   : > { %v4215_v59 = vpop.eup %4214 }
 0xb0d   : > { %v2247_v60 = vmul.f32 %v4215_v59, %v2245_v58  ;;  %vm2253_vm12 = vweird.f32 %v4215_v59 }
 0xb0e   : > { %vm2254_vm14 = vmor %vm2252_vm13, %vm2253_vm12 }
 0xb0f   : > { %v2248_v61 = vmul.f32 %v4215_v59, %v2247_v60 }
 0xb11   : > { %v2249_v62 = vmul.f32 0.5, %v2248_v61 }
 0xb13   : > { %v2250_v63 = vsub.f32 1.5, %v2249_v62 }
 0xb15   : > { %v2251_v0 = vmul.f32 %v4215_v59, %v2250_v63 }
 0xb17   : > { %v2255_v1 = vsel %vm2254_vm14, %v4215_v59, %v2251_v0 }
 0xb18   : > { %v5128_v2 = vmul.f32 %v2255_v1, %v5025_v21 }
 0xb1a   : > { %3999 = vmatmul.msk.f32.vlgmr.msrb.gmra.mxu2 %vm877_vm2, %v5128_v2  ;;  %4000 = vmatmul.msk.f32.vlgmr.msrb.gmra.mxu3 %vm877_vm2, %v5128_v2 }
 0xb1b   : > { %4001 = vmatmul.msk.f32.vlgmr.msrb.gmra.mxu0 %vm877_vm2, %v5128_v2  ;;  %4005 = vmatmul.msk.f32.vlgmr.msrb.gmra.mxu1 %vm877_vm2, %v5128_v2 }
 0xb1c   : > { %2468 = vmatpush.msrb.mxu2 %v3978_v3  ;;  %2488 = vmatpush.msrb.mxu3 %v3982_v4 }
 0xb1d   : > { %2508 = vmatpush.msrb.mxu0 %v3986_v5 }
 0xb1e   : > { %2469 = vmatpush.msrb.mxu2 %v3977_v6  ;;  %2489 = vmatpush.msrb.mxu3 %v3981_v7 }
 0xb1f   : > { %2509 = vmatpush.msrb.mxu0 %v3985_v8 }
 0xb20   : > { %2470 = vmatpush.msrb.mxu2 %v3976_v9  ;;  %2490 = vmatpush.msrb.mxu3 %v3980_v10 }
 0xb21   : > { %2510 = vmatpush.msrb.mxu0 %v3984_v12 }
 0xb22   : > { %4002 = vmatmul.msk.f32.vlgmr.msra.gmra.mxu2 %vm877_vm2, %v5128_v2  ;;  %4003 = vmatmul.msk.f32.vlgmr.msra.gmra.mxu3 %vm877_vm2, %v5128_v2 }
 0xb23   : > { %4004 = vmatmul.msk.f32.vlgmr.msra.gmra.mxu0 %vm877_vm2, %v5128_v2  ;;  %4009 = vmatmul.msk.f32.vlgmr.msra.gmra.mxu1 %vm877_vm2, %v5128_v2 }
 0xb24   : > { %2471 = vmatpush.msrb.mxu2 %v3975_v13  ;;  %2491 = vmatpush.msrb.mxu3 %v3979_v14 }
 0xb25   : > { %2511 = vmatpush.msrb.mxu0 %v3983_v15 }
 0xb26   : > { %2548 = vmatpush.msra.mxu2 %v3994_v16 }
 0xb28   : > { %2549 = vmatpush.msra.mxu2 %v3993_v17 }
 0xb2a   : > { %2550 = vmatpush.msra.mxu2 %v3992_v18  ;;  %4007 = vmatmul.msk.f32.vlgmr.msrb.gmra.mxu3 %vm877_vm2, %v5128_v2 }
 0xb2b   : > { %4006 = vmatmul.msk.f32.vlgmr.msrb.gmra.mxu2 %vm877_vm2, %v5128_v2  ;;  %4008 = vmatmul.msk.f32.vlgmr.msrb.gmra.mxu0 %vm877_vm2, %v5128_v2 }
 0xb2c   : > { %2551 = vmatpush.msra.mxu2 %v3991_v19  ;;  %v3996_v19 = vld [vmem:[%s5564_s11 + $0x28] sm:$0xff] }
 0xb33   : > { %4010 = vmatmul.msk.f32.vlgmr.msra.gmra.mxu2 %vm877_vm2, %v5128_v2 }
 0xb98   : > { %v2373_v20 = vpop.f32.mrf.mxu0  ;;  %v2453_v21 = vpop.f32.mrf.mxu1 }
 0xb99   : > { %4015 = vmatpush.xpose.msk.msrb.mxu1 %vm1121_vm3, %v2453_v21  ;;  %v3997_v21 = vld [vmem:[%s5564_s11 + $0x30] sm:$0xff] }
 0xb9c   : > { %4016 = vmatmul.msk.f32.vlgmr.msrb.gmra.mxu1 %vm1121_vm3, %v2373_v20  ;;  %v3995_v20 = vld [vmem:[%s5564_s11 + $0x20] sm:$0xff] }
 0xb9d   : > { %v2333_v22 = vpop.f32.mrf.mxu2  ;;  %v2353_v23 = vpop.f32.mrf.mxu3 }
 0xba0   : > { %v2433_v24 = vpop.f32.mrf.mxu0  ;;  %v2533_v25 = vpop.f32.mrf.mxu1 }
 0xba1   : > { %4013 = vmatpush.xpose.msk.msra.mxu0 %vm1121_vm3, %v2433_v24  ;;  %2776 = vmatpush.msra.mxu1 %v2533_v25 }
 0xba3   : > { %2868 = vmatpush.msrb.mxu1 %v3997_v21 }
 0xba4   : > { %4014 = vmatmul.msk.f32.vlgmr.msra.gmra.mxu0 %vm1121_vm3, %v2353_v23 }
 0xba5   : > { %v2393_v26 = vpop.f32.mrf.mxu2  ;;  %v2413_v28 = vpop.f32.mrf.mxu3 }
 0xba6   : > { %4011 = vmatpush.xpose.msk.msra.mxu3 %vm1121_vm3, %v2413_v28 }
 0xba8   : > { %v2513_v29 = vpop.f32.mrf.mxu0 }
 0xba9   : > { %2753 = vmatpush.msrb.mxu0 %v2513_v29  ;;  %4012 = vmatmul.msk.f32.vlgmr.msra.gmra.mxu3 %vm1121_vm3, %v2333_v22  ;;  %v3998_v22 = vld [vmem:[%s5564_s11 + $0x38] sm:$0xff] }
 0xbab   : > { %2845 = vmatpush.msra.mxu0 %v3996_v19 }
 0xbad   : > { %v2493_v49 = vpop.f32.mrf.mxu3 }
 0xbae   : > { %v2473_v30 = vpop.f32.mrf.mxu2  ;;  %2730 = vmatpush.msrb.mxu3 %v2493_v49 }
 0xbaf   : > { %4017 = vmatpush.xpose.msk.msrb.mxu2 %vm1121_vm3, %v2473_v30 }
 0xbb0   : > { %2822 = vmatpush.msra.mxu3 %v3995_v20 }
 0xbb2   : > { %4018 = vmatmul.msk.f32.vlgmr.msrb.gmra.mxu2 %vm1121_vm3, %v2393_v26 }
 0xbb6   : > { %v2553_v31 = vpop.f32.mrf.mxu2 }
 0xbb7   : > { %2799 = vmatpush.msra.mxu2 %v2553_v31 }
 0xbb9   : > { %2891 = vmatpush.msrb.mxu2 %v3998_v22 }
 0xc19   : > { %v2631_v39 = vpop.f32.mrf.mxu1 }
 0xc1a   : > { %v2662_v41 = vmul.f32 0.35355338, %v2631_v39 }
 0xc1c   : > { %v2666_v45 = vadd.f32 %v4254_v34, %v2662_v41 }
 0xc1e   : > { %v2674_v47 = vsel %vm1121_vm3, %v2666_v45, -inf }
 0xc21   : > { %v2605_v32 = vpop.f32.mrf.mxu0 }
 0xc22   : > { %v2661_v33 = vmul.f32 0.35355338, %v2605_v32 }
 0xc24   : > { %v2665_v35 = vadd.f32 %v4254_v34, %v2661_v33 }
 0xc26   : > { %v2671_v36 = vsel %vm1121_vm3, %v2665_v35, -inf }
 0xc27   : > { %2672 = vmax.xlane.f32.xlu0 %v2671_v36 }
 0xc2c   : > { %v2579_v37 = vpop.f32.mrf.mxu3 }
 0xc2d   : > { %v2660_v38 = vmul.f32 0.35355338, %v2579_v37 }
 0xc2f   : > { %v2664_v40 = vadd.f32 %v4254_v34, %v2660_v38 }
 0xc31   : > { %v2668_v42 = vsel %vm1121_vm3, %v2664_v40, -inf }
 0xc32   : > { %2669 = vmax.xlane.f32.xlu1 %v2668_v42 }
 0xc35   : > { %v2657_v43 = vpop.f32.mrf.mxu2 }
 0xc36   : > { %v2663_v44 = vmul.f32 0.35355338, %v2657_v43 }
 0xc38   : > { %v2667_v46 = vadd.f32 %v4254_v34, %v2663_v44 }
 0xc3a   : > { %v2677_v48 = vsel %vm1121_vm3, %v2667_v46, -inf  ;;  %2675 = vmax.xlane.f32.xlu1 %v2674_v47  ;;  %v4046_v47 = vld [vmem:[%s5565_s12 + $0xf8] sm:$0xff] }
 0xc3b   : > { %2678 = vmax.xlane.f32.xlu2 %v2677_v48  ;;  %v4033_v48 = vld [vmem:[%s5565_s12 + $0x90] sm:$0xff] }
 0xc9a   : > { %v2673_v50 = vpop.xlane.xlu0 %2672 }
 0xc9b   : > { %v2681_v51 = vsub.f32 %v2665_v35, %v2673_v50  ;;  %v4037_v50 = vld [vmem:[%s5565_s12 + $0xb0] sm:$0xff] }
 0xc9d   : > { %v2686_v52 = vmul.f32 1.442695, %v2681_v51  ;;  %v4041_v51 = vld [vmem:[%s5565_s12 + $0xd0] sm:$0xff] }
 0xc9f   : > { %4216 = vpow2.f32 %v2686_v52  ;;  %v4045_v52 = vld [vmem:[%s5565_s12 + $0xf0] sm:$0xff] }
 0xca5   : > { %v4217_v53 = vpop.eup %4216  ;;  %v2670_v54 = vpop.xlane.xlu1 %2669 }
 0xca6   : > { %v2680_v55 = vsub.f32 %v2664_v40, %v2670_v54  ;;  %v2695_v11 = vsel %vm1121_vm3, %v4217_v53, 0.0  ;;  %v4036_v54 = vld [vmem:[%s5565_s12 + $0xa8] sm:$0xff] }
 0xca7   : > { %2696 = vadd.xlane.f32.xlu1 %v2695_v11  ;;  %v4044_v11 = vld [vmem:[%s5565_s12 + $0xe8] sm:$0xff] }
 0xca8   : > { %v2684_v56 = vmul.f32 1.442695, %v2680_v55  ;;  %v4040_v55 = vld [vmem:[%s5565_s12 + $0xc8] sm:$0xff] }
 0xcaa   : > { %4218 = vpow2.f32 %v2684_v56  ;;  %v4031_v56 = vld [vmem:[%s5565_s12 + $0x80] sm:$0xff] }
 0xcad   : > { %v2676_v57 = vpop.xlane.xlu1 %2675 }
 0xcae   : > { %v2679_v58 = vpop.xlane.xlu2 %2678  ;;  %v2682_v59 = vsub.f32 %v2666_v45, %v2676_v57  ;;  %v4034_v45 = vld [vmem:[%s5565_s12 + $0x98] sm:$0xff]  ;;  %v4035_v57 = vld [vmem:[%s5565_s12 + $0xa0] sm:$0xff] }
 0xcaf   : > { %v2683_v60 = vsub.f32 %v2667_v46, %v2679_v58  ;;  %v4042_v46 = vld [vmem:[%s5565_s12 + $0xd8] sm:$0xff]  ;;  %v4039_v58 = vld [vmem:[%s5565_s12 + $0xc0] sm:$0xff] }
 0xcb0   : > { %v4219_v61 = vpop.eup %4218  ;;  %v2688_v62 = vmul.f32 1.442695, %v2682_v59  ;;  %v4043_v59 = vld [vmem:[%s5565_s12 + $0xe0] sm:$0xff] }
 0xcb1   : > { %v2690_v63 = vmul.f32 1.442695, %v2683_v60  ;;  %v2692_v0 = vsel %vm1121_vm3, %v4219_v61, 0.0  ;;  %v4050_v60 = vld [vmem:[%s5566_s13 + $0x98] sm:$0xff] }
 0xcb2   : > { %4220 = vpow2.f32 %v2688_v62  ;;  %2693 = vadd.xlane.f32.xlu2 %v2692_v0  ;;  %v4058_v62 = vld [vmem:[%s5566_s13 + $0xd8] sm:$0xff]  ;;  %v4049_v0 = vld [vmem:[%s5566_s13 + $0x90] sm:$0xff] }
 0xcb3   : > { %4222 = vpow2.f32 %v2690_v63  ;;  %v4062_v63 = vld [vmem:[%s5566_s13 + $0xf8] sm:$0xff] }
 0xcb8   : > { %v4221_v1 = vpop.eup %4220 }
 0xcb9   : > { %v4223_v3 = vpop.eup %4222  ;;  %v2698_v4 = vsel %vm1121_vm3, %v4221_v1, 0.0 }
 0xcba   : > { %2699 = vadd.xlane.f32.xlu2 %v2698_v4  ;;  %v2701_v5 = vsel %vm1121_vm3, %v4223_v3, 0.0  ;;  %v4061_v4 = vld [vmem:[%s5566_s13 + $0xf0] sm:$0xff] }
 0xcbb   : > { %2702 = vadd.xlane.f32.xlu0 %v2701_v5  ;;  %v4048_v5 = vld [vmem:[%s5566_s13 + $0x88] sm:$0xff] }
 0xd1a   : > { %v2697_v6 = vpop.xlane.xlu1 %2696 }
 0xd1b   : > { %4224 = vrcp.f32 %v2697_v6  ;;  %v4052_v6 = vld [vmem:[%s5566_s13 + $0xa8] sm:$0xff] }
 0xd21   : > { %v4225_v7 = vpop.eup %4224 }
 0xd22   : > { %v2709_v8 = vmul.f32 %v4225_v7, %v4217_v53  ;;  %v4032_v53 = vld [vmem:[%s5565_s12 + $0x88] sm:$0xff] }
 0xd23   : > { %v4056_v7 = vld [vmem:[%s5566_s13 + $0xc8] sm:$0xff] }
 0xd24   : > { %4028 = vst.msk [vmem:[%s4703_s21 + $0x28] sm:$0xff] %vm1121_vm3, %v2709_v8  ;;  %4020 = vmatmul.msk.f32.vlgmr.msrb.gmra.mxu0 %vm1121_vm3, %v2709_v8  ;;  %v4060_v8 = vld [vmem:[%s5566_s13 + $0xe8] sm:$0xff] }
 0xd25   : > { %v2694_v9 = vpop.xlane.xlu2 %2693 }
 0xd26   : > { %4226 = vrcp.f32 %v2694_v9  ;;  %v4047_v9 = vld [vmem:[%s5566_s13 + $0x80] sm:$0xff] }
 0xd2c   : > { %v4227_v10 = vpop.eup %4226 }
 0xd2d   : > { %v2708_v12 = vmul.f32 %v4227_v10, %v4219_v61  ;;  %v2700_v13 = vpop.xlane.xlu2 %2699  ;;  %v4054_v61 = vld [vmem:[%s5566_s13 + $0xb8] sm:$0xff]  ;;  %v4051_v10 = vld [vmem:[%s5566_s13 + $0xa0] sm:$0xff] }
 0xd2e   : > { %v2703_v14 = vpop.xlane.xlu0 %2702  ;;  %4228 = vrcp.f32 %v2700_v13  ;;  %v4059_v13 = vld [vmem:[%s5566_s13 + $0xe0] sm:$0xff] }
 0xd2f   : > { %4027 = vst.msk [vmem:[%s4703_s21 + $0x20] sm:$0xff] %vm1121_vm3, %v2708_v12  ;;  %4230 = vrcp.f32 %v2703_v14  ;;  %4019 = vmatmul.msk.f32.vlgmr.msrb.gmra.mxu3 %vm1121_vm3, %v2708_v12  ;;  %v4055_v12 = vld [vmem:[%s5566_s13 + $0xc0] sm:$0xff] }
 0xd30   : > { %3002 = vmatpush.msrb.mxu3 %v4034_v45 }
 0xd32   : > { %3003 = vmatpush.msrb.mxu3 %v4033_v48 }
 0xd34   : > { %v4229_v15 = vpop.eup %4228  ;;  %3004 = vmatpush.msrb.mxu3 %v4032_v53 }
 0xd35   : > { %v4231_v16 = vpop.eup %4230  ;;  %v2710_v17 = vmul.f32 %v4229_v15, %v4221_v1  ;;  %v4053_v1 = vld [vmem:[%s5566_s13 + $0xb0] sm:$0xff] }
 0xd36   : > { %v2711_v18 = vmul.f32 %v4231_v16, %v4223_v3  ;;  %3005 = vmatpush.msrb.mxu3 %v4031_v56  ;;  %v4057_v3 = vld [vmem:[%s5566_s13 + $0xd0] sm:$0xff] }
 0xd37   : > { %4029 = vst.msk [vmem:[%s4703_s21 + $0x30] sm:$0xff] %vm1121_vm3, %v2710_v17  ;;  %4021 = vmatmul.msk.f32.vlgmr.msra.gmra.mxu1 %vm1121_vm3, %v2710_v17 }
 0xd38   : > { %4030 = vst.msk [vmem:[%s4703_s21 + $0x38] sm:$0xff] %vm1121_vm3, %v2711_v18  ;;  %4022 = vmatmul.msk.f32.vlgmr.msra.gmra.mxu2 %vm1121_vm3, %v2711_v18  ;;  %3042 = vmatpush.msra.mxu1 %v4042_v46  ;;  %s3870_s21 = sshll.u32 %s658_s27, 3 }
 0xd39   : > { %3062 = vmatpush.msra.mxu2 %v4046_v47 }
 0xd3a   : > { %3043 = vmatpush.msra.mxu1 %v4041_v51 }
 0xd3b   : > { %3063 = vmatpush.msra.mxu2 %v4045_v52 }
 0xd3c   : > { %3044 = vmatpush.msra.mxu1 %v4040_v55 }
 0xd3d   : > { %3064 = vmatpush.msra.mxu2 %v4044_v11  ;;  %v4256_v11 = vld [vmem:[%s4930_s23] sm:$0xff]  ;;  %s4277_s23 = scalar_lea.hbm %s5571_s18, 16 }
 0xd3e   : > { %3045 = vmatpush.msra.mxu1 %v4039_v58 }
 0xd3f   : > { %3065 = vmatpush.msra.mxu2 %v4043_v59 }
 0xda1   : > { %v2755_v23 = vpop.f32.mrf.mxu0 }
 0xda2   : > { %4024 = vmatmul.msk.f32.vlgmr.msra.gmra.mxu0 %vm1121_vm3, %v2755_v23 }
 0xdb2   : > { %v2732_v24 = vpop.f32.mrf.mxu3 }
 0xdb3   : > { %4023 = vmatmul.msk.f32.vlgmr.msra.gmra.mxu3 %vm1121_vm3, %v2732_v24 }
 0xdb4   : > { %v2778_v25 = vpop.f32.mrf.mxu1  ;;  %3082 = vmatpush.msra.mxu3 %v4050_v60 }
 0xdb5   : > { %4025 = vmatmul.msk.f32.vlgmr.msrb.gmra.mxu1 %vm1121_vm3, %v2778_v25  ;;  %v4070_v25 = vld [vmem:[%s5567_s14 + $0xb8] sm:$0xff] }
 0xdb6   : > { %3122 = vmatpush.msrb.mxu1 %v4058_v62  ;;  %3083 = vmatpush.msra.mxu3 %v4049_v0 }
 0xdb8   : > { %3123 = vmatpush.msrb.mxu1 %v4057_v3  ;;  %3084 = vmatpush.msra.mxu3 %v4048_v5 }
 0xdba   : > { %3124 = vmatpush.msrb.mxu1 %v4056_v7  ;;  %3085 = vmatpush.msra.mxu3 %v4047_v9 }
 0xdbb   : > { %v2801_v26 = vpop.f32.mrf.mxu2 }
 0xdbc   : > { %4026 = vmatmul.msk.f32.vlgmr.msrb.gmra.mxu2 %vm1121_vm3, %v2801_v26  ;;  %3125 = vmatpush.msrb.mxu1 %v4055_v12  ;;  %v4074_v26 = vld [vmem:[%s5567_s14 + $0xd8] sm:$0xff] }
 0xdbd   : > { %3142 = vmatpush.msrb.mxu2 %v4062_v63 }
 0xdbf   : > { %3143 = vmatpush.msrb.mxu2 %v4061_v4 }
 0xdc1   : > { %3144 = vmatpush.msrb.mxu2 %v4060_v8 }
 0xdc3   : > { %3145 = vmatpush.msrb.mxu2 %v4059_v13 }
 0xe1f   : > { %v2847_v29 = vpop.f32.mrf.mxu0 }
 0xe20   : > { %v2897_v49 = vsel %vm877_vm2, %v2847_v29, 0.0  ;;  %v4073_v29 = vld [vmem:[%s5567_s14 + $0xd0] sm:$0xff] }
 0xe32   : > { %v2870_v31 = vpop.f32.mrf.mxu1 }
 0xe33   : > { %v2899_v33 = vsel %vm877_vm2, %v2870_v31, 0.0  ;;  %v4072_v31 = vld [vmem:[%s5567_s14 + $0xc8] sm:$0xff] }
 0xe36   : > { %v2824_v28 = vpop.f32.mrf.mxu3 }
 0xe37   : > { %v2896_v30 = vsel %vm877_vm2, %v2824_v28, 0.0  ;;  %v4069_v28 = vld [vmem:[%s5567_s14 + $0xb0] sm:$0xff] }
 0xe38   : > { %v2898_v32 = vadd.f32 %v2897_v49, %v2896_v30  ;;  %v4255_v30 = vld [vmem:[%s4871_s29] sm:$0xff]  ;;  %v4068_v49 = vld [vmem:[%s5567_s14 + $0xa8] sm:$0xff]  ;;  %s3714_s29 = sshll.u32 %s3710_s26, 4  ;;  %s3715_s29 = int_to_ptr.hbm [resolvable:$true] %s3714_s29 }
 0xe39   : > { %s4271_s5 = sshra.s32 %s3715_s29, 4  ;;  %s4272_s5 = int_to_ptr.hbm [resolvable:$true] %s4271_s5 }
 0xe3a   : > { %v2900_v35 = vadd.f32 %v2899_v33, %v2898_v32  ;;  %v4066_v32 = vld [vmem:[%s5567_s14 + $0x98] sm:$0xff]  ;;  %v4067_v33 = vld [vmem:[%s5567_s14 + $0xa0] sm:$0xff]  ;;  %s4273_s3 = scalar_lea.hbm %s4272_s5, 8  ;;  %p4278_p0 = scmp.lt.s32.totalorder %s4272_s5, %s5571_s18 }
 0xe3b   : > { %p4274_p11 = scmp.ne.s32.totalorder %s4272_s5, %s4273_s3  ;;  %p4279_p1 = scmp.lt.s32.totalorder %s4277_s23, %s4273_s3 }
 0xe3d   : > { %p4275_p12 = pnand %p4274_p11, %p4465_p5  ;;  %p4280_p2 = por %p4279_p1, %p4278_p0 }
 0xe3f   : > { %v2893_v34 = vpop.f32.mrf.mxu2  ;;  %p4276_p13 = pneg %p4275_p12 }
 0xe40   : > { %v2901_v36 = vsel %vm877_vm2, %v2893_v34, 0.0  ;;  %v4071_v34 = vld [vmem:[%s5567_s14 + $0xc0] sm:$0xff] }
 0xe41   : > { %v2902_v37 = vadd.f32 %v2901_v36, %v2900_v35  ;;  %v4078_v35 = vld [vmem:[%s5567_s14 + $0xf8] sm:$0xff]  ;;  %v4065_v36 = vld [vmem:[%s5567_s14 + $0x90] sm:$0xff]  ;;  %p4281_p3 = pnand %p4280_p2, %p4276_p13 }
 0xe43   : > { %v2903_v38 = vadd.f32 %v2902_v37, %v5128_v2  ;;  %v4038_v2 = vld [vmem:[%s5565_s12 + $0xb8] sm:$0xff]  ;;  %v4077_v37 = vld [vmem:[%s5567_s14 + $0xf0] sm:$0xff] }
 0xe44   : > { %3022 = vmatpush.msrb.mxu0 %v4038_v2 }
 0xe45   : > { %v2904_v39 = vsel %vm877_vm2, %v2903_v38, 0.0 }
 0xe46   : > { %2905 = vadd.xlane.f32.xlu0 %v2904_v39  ;;  %3023 = vmatpush.msrb.mxu0 %v4037_v50  ;;  %v4076_v39 = vld [vmem:[%s5567_s14 + $0xe8] sm:$0xff] }
 0xe48   : > { %3024 = vmatpush.msrb.mxu0 %v4036_v54 }
 0xe4a   : > { %3025 = vmatpush.msrb.mxu0 %v4035_v57 }
 0xe4c   : > { %3102 = vmatpush.msra.mxu0 %v4054_v61 }
 0xe4e   : > { %3103 = vmatpush.msra.mxu0 %v4053_v1 }
 0xe50   : > { %3104 = vmatpush.msra.mxu0 %v4052_v6 }
 0xe52   : > { %3105 = vmatpush.msra.mxu0 %v4051_v10 }
 0xeb9   : > { %v2906_v40 = vpop.xlane.xlu0 %2905 }
 0xeba   : > { %v2907_v41 = vmul.f32 %v2906_v40, %v4739_v27  ;;  %v4063_v40 = vld [vmem:[%s5567_s14 + $0x80] sm:$0xff] }
 0xebc   : > { %v5254_v42 = vsub.f32 %v2903_v38, %v2907_v41  ;;  %v4064_v38 = vld [vmem:[%s5567_s14 + $0x88] sm:$0xff]  ;;  %v4075_v41 = vld [vmem:[%s5567_s14 + $0xe0] sm:$0xff] }
 0xebe   : > { %v2909_v43 = vmul.f32 %v5254_v42, %v5254_v42 }
 0xec0   : > { %v2910_v44 = vsel %vm877_vm2, %v2909_v43, 0.0 }
 0xec1   : > { %2911 = vadd.xlane.f32.xlu1 %v2910_v44 }
 0xf34   : > { %v2912_v14 = vpop.xlane.xlu1 %2911 }
 0xf35   : > { %v2913_v15 = vmul.f32 %v2912_v14, %v4739_v27 }
 0xf37   : > { %v2914_v16 = vadd.f32 1e-05, %v2913_v15 }
 0xf39   : > { %4232 = vrsqrt.f32 %v2914_v16  ;;  %vm2921_vm0 = vweird.f32 %v2914_v16 }
 0xf3f   : > { %v4233_v17 = vpop.eup %4232 }
 0xf40   : > { %v2916_v18 = vmul.f32 %v4233_v17, %v2914_v16  ;;  %vm2922_vm15 = vweird.f32 %v4233_v17 }
 0xf41   : > { %vm2923_vm1 = vmor %vm2921_vm0, %vm2922_vm15 }
 0xf42   : > { %v2917_v19 = vmul.f32 %v4233_v17, %v2916_v18 }
 0xf44   : > { %v2918_v20 = vmul.f32 0.5, %v2917_v19 }
 0xf46   : > { %v2919_v21 = vsub.f32 1.5, %v2918_v20 }
 0xf48   : > { %v2920_v22 = vmul.f32 %v4233_v17, %v2919_v21 }
 0xf4a   : > { %v2924_v23 = vsel %vm2923_vm1, %v4233_v17, %v2920_v22 }
 0xf4b   : > { %v5357_v24 = vmul.f32 %v2924_v23, %v5254_v42 }
 0xf4d   : > { %4083 = vmatmul.msk.f32.vlgmr.msrb.gmra.mxu3 %vm877_vm2, %v5357_v24  ;;  %4084 = vmatmul.msk.f32.vlgmr.msrb.gmra.mxu0 %vm877_vm2, %v5357_v24 }
 0xf4e   : > { %4085 = vmatmul.msk.f32.vlgmr.msra.gmra.mxu1 %vm877_vm2, %v5357_v24  ;;  %4086 = vmatmul.msk.f32.vlgmr.msra.gmra.mxu2 %vm877_vm2, %v5357_v24 }
 0xf4f   : > { %3182 = vmatpush.msrb.mxu0 %v4070_v25  ;;  %3202 = vmatpush.msra.mxu1 %v4074_v26 }
 0xf50   : > { %3162 = vmatpush.msrb.mxu3 %v4066_v32  ;;  %3222 = vmatpush.msra.mxu2 %v4078_v35 }
 0xf51   : > { %3183 = vmatpush.msrb.mxu0 %v4069_v28  ;;  %3203 = vmatpush.msra.mxu1 %v4073_v29 }
 0xf52   : > { %3163 = vmatpush.msrb.mxu3 %v4065_v36  ;;  %3223 = vmatpush.msra.mxu2 %v4077_v37 }
 0xf53   : > { %3184 = vmatpush.msrb.mxu0 %v4068_v49  ;;  %3204 = vmatpush.msra.mxu1 %v4072_v31 }
 0xf54   : > { %3164 = vmatpush.msrb.mxu3 %v4064_v38  ;;  %3224 = vmatpush.msra.mxu2 %v4076_v39 }
 0xf55   : > { %4087 = vmatmul.msk.f32.vlgmr.msra.gmra.mxu3 %vm877_vm2, %v4255_v30  ;;  %4088 = vmatmul.msk.f32.vlgmr.msra.gmra.mxu0 %vm877_vm2, %v4255_v30 }
 0xf56   : > { %4089 = vmatmul.msk.f32.vlgmr.msrb.gmra.mxu1 %vm877_vm2, %v4255_v30  ;;  %4090 = vmatmul.msk.f32.vlgmr.msrb.gmra.mxu2 %vm877_vm2, %v4255_v30 }
 0xf57   : > { %3185 = vmatpush.msrb.mxu0 %v4067_v33  ;;  %3205 = vmatpush.msra.mxu1 %v4071_v34 }
 0xf58   : > { %3165 = vmatpush.msrb.mxu3 %v4063_v40  ;;  %3225 = vmatpush.msra.mxu2 %v4075_v41  ;;  %v4080_v41 = vld [vmem:[%s5568_s15 + $0x28] sm:$0xff] }
 0xf5d   : > { %4092 = vmatmul.msk.f32.vlgmr.msrb.gmra.mxu0 %vm877_vm2, %v4255_v30  ;;  %4091 = vmatmul.msk.f32.vlgmr.msrb.gmra.mxu3 %vm877_vm2, %v4255_v30 }
 0xf5e   : > { %4093 = vmatmul.msk.f32.vlgmr.msra.gmra.mxu1 %vm877_vm2, %v4255_v30  ;;  %4094 = vmatmul.msk.f32.vlgmr.msra.gmra.mxu2 %vm877_vm2, %v4255_v30 }
 0xfca   : > { %v3027_v42 = vpop.f32.mrf.mxu0 }
 0xfcb   : > { %v3047_v43 = vpop.f32.mrf.mxu1 }
 0xfd0   : > { %v3007_v44 = vpop.f32.mrf.mxu3 }
 0xfd1   : > { %v3067_v45 = vpop.f32.mrf.mxu2 }
 0xfd2   : > { %v3107_v2 = vpop.f32.mrf.mxu0 }
 0xfd3   : > { %v3127_v46 = vpop.f32.mrf.mxu1  ;;  %4097 = vmatpush.xpose.msk.msra.mxu0 %vm1121_vm3, %v3107_v2 }
 0xfd4   : > { %4099 = vmatpush.xpose.msk.msrb.mxu1 %vm1121_vm3, %v3127_v46 }
 0xfd6   : > { %4098 = vmatmul.msk.f32.vlgmr.msra.gmra.mxu0 %vm1121_vm3, %v3027_v42  ;;  %v4079_v42 = vld [vmem:[%s5568_s15 + $0x20] sm:$0xff] }
 0xfd7   : > { %4100 = vmatmul.msk.f32.vlgmr.msrb.gmra.mxu1 %vm1121_vm3, %v3047_v43  ;;  %v4082_v43 = vld [vmem:[%s5568_s15 + $0x38] sm:$0xff] }
 0xfd8   : > { %v3087_v47 = vpop.f32.mrf.mxu3 }
 0xfd9   : > { %v3147_v48 = vpop.f32.mrf.mxu2  ;;  %4095 = vmatpush.xpose.msk.msra.mxu3 %vm1121_vm3, %v3087_v47 }
 0xfda   : > { %4101 = vmatpush.xpose.msk.msrb.mxu2 %vm1121_vm3, %v3147_v48  ;;  %v3187_v50 = vpop.f32.mrf.mxu0 }
 0xfdb   : > { %v3207_v51 = vpop.f32.mrf.mxu1  ;;  %3427 = vmatpush.msrb.mxu0 %v3187_v50 }
 0xfdc   : > { %4096 = vmatmul.msk.f32.vlgmr.msra.gmra.mxu3 %vm1121_vm3, %v3007_v44  ;;  %3450 = vmatpush.msra.mxu1 %v3207_v51  ;;  %v4081_v44 = vld [vmem:[%s5568_s15 + $0x30] sm:$0xff] }
 0xfdd   : > { %4102 = vmatmul.msk.f32.vlgmr.msrb.gmra.mxu2 %vm1121_vm3, %v3067_v45  ;;  %3519 = vmatpush.msra.mxu0 %v4080_v41 }
 0xfde   : > { %3542 = vmatpush.msrb.mxu1 %v4081_v44 }
 0xfe0   : > { %v3167_v52 = vpop.f32.mrf.mxu3 }
 0xfe1   : > { %v3227_v53 = vpop.f32.mrf.mxu2  ;;  %3404 = vmatpush.msrb.mxu3 %v3167_v52 }
 0xfe2   : > { %3473 = vmatpush.msra.mxu2 %v3227_v53 }
 0xfe3   : > { %3496 = vmatpush.msra.mxu3 %v4079_v42 }
 0xfe4   : > { %3565 = vmatpush.msrb.mxu2 %v4082_v43 }
0x1053   : > { %v3279_v54 = vpop.f32.mrf.mxu0 }
0x1054   : > { %v3335_v55 = vmul.f32 0.35355338, %v3279_v54  ;;  %v3305_v61 = vpop.f32.mrf.mxu1 }
0x1055   : > { %v3336_v1 = vmul.f32 0.35355338, %v3305_v61 }
0x1056   : > { %v3339_v56 = vadd.f32 %v4256_v11, %v3335_v55 }
0x1057   : > { %v3340_v5 = vadd.f32 %v4256_v11, %v3336_v1 }
0x1058   : > { %v3345_v57 = vsel %vm1121_vm3, %v3339_v56, -inf }
0x1059   : > { %3346 = vmax.xlane.f32.xlu1 %v3345_v57  ;;  %v3348_v6 = vsel %vm1121_vm3, %v3340_v5, -inf }
0x105f   : > { %v3253_v58 = vpop.f32.mrf.mxu3 }
0x1060   : > { %v3334_v59 = vmul.f32 0.35355338, %v3253_v58  ;;  %v3331_v60 = vpop.f32.mrf.mxu2 }
0x1061   : > { %v3337_v62 = vmul.f32 0.35355338, %v3331_v60 }
0x1062   : > { %v3338_v63 = vadd.f32 %v4256_v11, %v3334_v59 }
0x1063   : > { %v3341_v0 = vadd.f32 %v4256_v11, %v3337_v62 }
0x1064   : > { %v3342_v3 = vsel %vm1121_vm3, %v3338_v63, -inf }
0x1065   : > { %v3351_v4 = vsel %vm1121_vm3, %v3341_v0, -inf  ;;  %3343 = vmax.xlane.f32.xlu2 %v3342_v3  ;;  %v4118_v3 = vld [vmem:[%s5569_s16 + $0x38] sm:$0xff] }
0x1066   : > { %3352 = vmax.xlane.f32.xlu0 %v3351_v4  ;;  %v4116_v4 = vld [vmem:[%s5569_s16 + $0x28] sm:$0xff] }
0x106d   : > { %3349 = vmax.xlane.f32.xlu2 %v3348_v6  ;;  %v4127_v6 = vld [vmem:[%s5570_s17 + $0x78] sm:$0xff] }
0x10cc   : > { %v3347_v7 = vpop.xlane.xlu1 %3346 }
0x10cd   : > { %v3355_v8 = vsub.f32 %v3339_v56, %v3347_v7  ;;  %v4126_v7 = vld [vmem:[%s5570_s17 + $0x70] sm:$0xff] }
0x10cf   : > { %v3360_v9 = vmul.f32 1.442695, %v3355_v8  ;;  %v4125_v8 = vld [vmem:[%s5570_s17 + $0x68] sm:$0xff] }
0x10d1   : > { %4234 = vpow2.f32 %v3360_v9  ;;  %v4124_v9 = vld [vmem:[%s5570_s17 + $0x60] sm:$0xff] }
0x10d7   : > { %v4235_v10 = vpop.eup %4234 }
0x10d8   : > { %v3344_v12 = vpop.xlane.xlu2 %3343  ;;  %v3369_v13 = vsel %vm1121_vm3, %v4235_v10, 0.0 }
0x10d9   : > { %v3353_v14 = vpop.xlane.xlu0 %3352  ;;  %v3354_v15 = vsub.f32 %v3338_v63, %v3344_v12  ;;  %3370 = vadd.xlane.f32.xlu2 %v3369_v13 }
0x10da   : > { %v3357_v16 = vsub.f32 %v3341_v0, %v3353_v14  ;;  %v4122_v14 = vld [vmem:[%s5570_s17 + $0x50] sm:$0xff] }
0x10db   : > { %v3358_v17 = vmul.f32 1.442695, %v3354_v15 }
0x10dc   : > { %v3364_v18 = vmul.f32 1.442695, %v3357_v16 }
0x10dd   : > { %4236 = vpow2.f32 %v3358_v17 }
0x10de   : > { %4238 = vpow2.f32 %v3364_v18 }
0x10e0   : > { %v3350_v19 = vpop.xlane.xlu2 %3349 }
0x10e1   : > { %v3356_v20 = vsub.f32 %v3340_v5, %v3350_v19  ;;  %v4115_v5 = vld [vmem:[%s5569_s16 + $0x20] sm:$0xff] }
0x10e3   : > { %v4237_v21 = vpop.eup %4236  ;;  %v3362_v22 = vmul.f32 1.442695, %v3356_v20 }
0x10e4   : > { %v4239_v23 = vpop.eup %4238  ;;  %v3366_v25 = vsel %vm1121_vm3, %v4237_v21, 0.0 }
0x10e5   : > { %4240 = vpow2.f32 %v3362_v22  ;;  %v3375_v26 = vsel %vm1121_vm3, %v4239_v23, 0.0  ;;  %3367 = vadd.xlane.f32.xlu0 %v3366_v25  ;;  %v4121_v25 = vld [vmem:[%s5570_s17 + $0x48] sm:$0xff] }
0x10e6   : > { %3376 = vadd.xlane.f32.xlu1 %v3375_v26  ;;  %v4120_v26 = vld [vmem:[%s5570_s17 + $0x40] sm:$0xff] }
0x10eb   : > { %v4241_v28 = vpop.eup %4240 }
0x10ec   : > { %v3372_v29 = vsel %vm1121_vm3, %v4241_v28, 0.0 }
0x10ed   : > { %3373 = vadd.xlane.f32.xlu0 %v3372_v29 }
0x114c   : > { %v3371_v30 = vpop.xlane.xlu2 %3370 }
0x114d   : > { %4242 = vrcp.f32 %v3371_v30 }
0x1153   : > { %v4243_v49 = vpop.eup %4242 }
0x1154   : > { %v3383_v31 = vmul.f32 %v4243_v49, %v4235_v10  ;;  %v4123_v10 = vld [vmem:[%s5570_s17 + $0x58] sm:$0xff] }
0x1156   : > { %4112 = vst.msk [vmem:[%s4946_s6 + $0x28] sm:$0xff] %vm1121_vm3, %v3383_v31  ;;  %4104 = vmatmul.msk.f32.vlgmr.msrb.gmra.mxu0 %vm1121_vm3, %v3383_v31 }
0x1157   : > { %3654 = vmatpush.msrb.mxu0 %v4127_v6 }
0x1158   : > { %v3368_v32 = vpop.xlane.xlu0 %3367 }
0x1159   : > { %v3377_v33 = vpop.xlane.xlu1 %3376  ;;  %4244 = vrcp.f32 %v3368_v32  ;;  %3655 = vmatpush.msrb.mxu0 %v4126_v7 }
0x115a   : > { %4246 = vrcp.f32 %v3377_v33 }
0x115b   : > { %3656 = vmatpush.msrb.mxu0 %v4125_v8 }
0x115d   : > { %3657 = vmatpush.msrb.mxu0 %v4124_v9 }
0x115f   : > { %v4245_v34 = vpop.eup %4244  ;;  %3658 = vmatpush.msrb.mxu0 %v4123_v10 }
0x1160   : > { %v4247_v35 = vpop.eup %4246  ;;  %v3382_v36 = vmul.f32 %v4245_v34, %v4237_v21  ;;  %v3374_v37 = vpop.xlane.xlu0 %3373 }
0x1161   : > { %v3385_v38 = vmul.f32 %v4247_v35, %v4239_v23  ;;  %4248 = vrcp.f32 %v3374_v37  ;;  %3659 = vmatpush.msrb.mxu0 %v4122_v14 }
0x1162   : > { %4111 = vst.msk [vmem:[%s4946_s6 + $0x20] sm:$0xff] %vm1121_vm3, %v3382_v36  ;;  %4103 = vmatmul.msk.f32.vlgmr.msrb.gmra.mxu3 %vm1121_vm3, %v3382_v36 }
0x1163   : > { %4114 = vst.msk [vmem:[%s4946_s6 + $0x38] sm:$0xff] %vm1121_vm3, %v3385_v38  ;;  %4106 = vmatmul.msk.f32.vlgmr.msra.gmra.mxu2 %vm1121_vm3, %v3385_v38  ;;  %3625 = vmatpush.msrb.mxu3 %v4118_v3 }
0x1164   : > { %3660 = vmatpush.msrb.mxu0 %v4121_v25 }
0x1166   : > { %3661 = vmatpush.msrb.mxu0 %v4120_v26 }
0x1167   : > { %v4249_v39 = vpop.eup %4248 }
0x1168   : > { %v3384_v40 = vmul.f32 %v4249_v39, %v4241_v28 }
0x116a   : > { %4113 = vst.msk [vmem:[%s4946_s6 + $0x30] sm:$0xff] %vm1121_vm3, %v3384_v40  ;;  %4105 = vmatmul.msk.f32.vlgmr.msra.gmra.mxu1 %vm1121_vm3, %v3384_v40  ;;  %s660_s6 = scalar_lea.vmem [#allocation2], %s3870_s21 }
0x116b   : > { %s3712_s28 = sshll.u32 %s660_s6, 4  ;;  %s3713_s28 = int_to_ptr.vmem [resolvable:$true] %s3712_s28 }
0x11d3   : > { %v3429_v45 = vpop.f32.mrf.mxu0 }
0x11d4   : > { %4108 = vmatmul.msk.f32.vlgmr.msra.gmra.mxu0 %vm1121_vm3, %v3429_v45 }
0x11e5   : > { %v3406_v2 = vpop.f32.mrf.mxu3 }
0x11e6   : > { %v3475_v46 = vpop.f32.mrf.mxu2  ;;  %4107 = vmatmul.msk.f32.vlgmr.msra.gmra.mxu3 %vm1121_vm3, %v3406_v2 }
0x11e7   : > { %4110 = vmatmul.msk.f32.vlgmr.msrb.gmra.mxu2 %vm1121_vm3, %v3475_v46  ;;  %v3452_v47 = vpop.f32.mrf.mxu1 }
0x11e8   : > { %4109 = vmatmul.msk.f32.vlgmr.msrb.gmra.mxu1 %vm1121_vm3, %v3452_v47 }
0x1251   : > { %v3521_v48 = vpop.f32.mrf.mxu0 }
0x1252   : > { %v3571_v52 = vsel %vm877_vm2, %v3521_v48, 0.0 }
0x1265   : > { %v3544_v50 = vpop.f32.mrf.mxu1 }
0x1266   : > { %v3573_v11 = vsel %vm877_vm2, %v3544_v50, 0.0 }
0x1269   : > { %v3498_v51 = vpop.f32.mrf.mxu3 }
0x126a   : > { %v3570_v53 = vsel %vm877_vm2, %v3498_v51, 0.0  ;;  %v3567_v55 = vpop.f32.mrf.mxu2 }
0x126b   : > { %v3572_v54 = vadd.f32 %v3571_v52, %v3570_v53  ;;  %v3575_v57 = vsel %vm877_vm2, %v3567_v55, 0.0 }
0x126d   : > { %v3574_v56 = vadd.f32 %v3573_v11, %v3572_v54 }
0x126f   : > { %v3576_v58 = vadd.f32 %v3575_v57, %v3574_v56 }
0x1271   : > { %v3577_v59 = vadd.f32 %v3576_v58, %v5357_v24  ;;  %v4117_v24 = vld [vmem:[%s5569_s16 + $0x30] sm:$0xff] }
0x1272   : > { %3626 = vmatpush.msrb.mxu3 %v4117_v24 }
0x1273   : > { %v3578_v60 = vsel %vm877_vm2, %v3577_v59, 0.0 }
0x1274   : > { %3579 = vadd.xlane.f32.xlu1 %v3578_v60  ;;  %3627 = vmatpush.msrb.mxu3 %v4116_v4 }
0x1276   : > { %3628 = vmatpush.msrb.mxu3 %v4115_v5 }
0x12e7   : > { %v3580_v61 = vpop.xlane.xlu1 %3579 }
0x12e8   : > { %v3581_v62 = vmul.f32 %v3580_v61, %v4739_v27 }
0x12ea   : > { %v3582_v63 = vsub.f32 %v3577_v59, %v3581_v62 }
0x12ec   : > { %v3583_v0 = vmul.f32 %v3582_v63, %v3582_v63 }
0x12ee   : > { %v3584_v1 = vsel %vm877_vm2, %v3583_v0, 0.0 }
0x12ef   : > { %3585 = vadd.xlane.f32.xlu2 %v3584_v1 }
0x1362   : > { %v3586_v12 = vpop.xlane.xlu2 %3585 }
0x1363   : > { %v3587_v13 = vmul.f32 %v3586_v12, %v4739_v27 }
0x1365   : > { %v3588_v15 = vadd.f32 1e-05, %v3587_v13 }
0x1367   : > { %4250 = vrsqrt.f32 %v3588_v15  ;;  %vm3595_vm4 = vweird.f32 %v3588_v15 }
0x136d   : > { %v4251_v16 = vpop.eup %4250 }
0x136e   : > { %v3590_v17 = vmul.f32 %v4251_v16, %v3588_v15  ;;  %vm3596_vm3 = vweird.f32 %v4251_v16 }
0x136f   : > { %vm3597_vm5 = vmor %vm3595_vm4, %vm3596_vm3 }
0x1370   : > { %v3591_v18 = vmul.f32 %v4251_v16, %v3590_v17 }
0x1372   : > { %v3592_v19 = vmul.f32 0.5, %v3591_v18 }
0x1374   : > { %v3593_v20 = vsub.f32 1.5, %v3592_v19 }
0x1376   : > { %v3594_v21 = vmul.f32 %v4251_v16, %v3593_v20 }
0x1378   : > { %v3598_v22 = vsel %vm3597_vm5, %v4251_v16, %v3594_v21 }
0x1379   : > { %v3599_v23 = vmul.f32 %v3598_v22, %v3582_v63 }
0x137b   : > { %4119 = vmatmul.msk.f32.vlgmr.msrb.gmra.mxu3 %vm877_vm2, %v3599_v23 }
0x13fe   : > { %v3630_v28 = vpop.f32.mrf.mxu3 }
0x13ff   : > { %v3633_v29 = vmax.f32 %v3630_v28, 0.0 }
0x1401   : > { %4128 = vmatmul.msk.f32.vlgmr.msrb.gmra.mxu0 %vm2211_vm11, %v3633_v29 }
0x147e   : > { %v3663_v30 = vpop.f32.mrf.mxu0 }
0x147f   : > { %v3664_v49 = vadd.f32 %v3663_v30, %v3599_v23 }
0x1481   : > { %v3666_v31 = vsel %vm877_vm2, %v3664_v49, 0.0 }
0x1482   : > { %3667 = vadd.xlane.f32.xlu0 %v3666_v31 }
0x14f5   : > { %v3668_v32 = vpop.xlane.xlu0 %3667 }
0x14f6   : > { %v3669_v33 = vmul.f32 %v3668_v32, %v4739_v27 }
0x14f8   : > { %v3670_v34 = vsub.f32 %v3664_v49, %v3669_v33 }
0x14fa   : > { %v3671_v35 = vmul.f32 %v3670_v34, %v3670_v34 }
0x14fc   : > { %v3672_v36 = vsel %vm877_vm2, %v3671_v35, 0.0 }
0x14fd   : > { %3673 = vadd.xlane.f32.xlu1 %v3672_v36 }
0x1570   : > { %v3674_v37 = vpop.xlane.xlu1 %3673 }
0x1571   : > { %v3675_v38 = vmul.f32 %v3674_v37, %v4739_v27 }
0x1573   : > { %v3676_v39 = vadd.f32 1e-05, %v3675_v38 }
0x1575   : > { %4252 = vrsqrt.f32 %v3676_v39  ;;  %vm3683_vm7 = vweird.f32 %v3676_v39 }
0x157b   : > { %v4253_v40 = vpop.eup %4252 }
0x157c   : > { %v3678_v41 = vmul.f32 %v4253_v40, %v3676_v39  ;;  %vm3684_vm6 = vweird.f32 %v4253_v40 }
0x157d   : > { %vm3685_vm8 = vmor %vm3683_vm7, %vm3684_vm6 }
0x157e   : > { %v3679_v42 = vmul.f32 %v4253_v40, %v3678_v41 }
0x1580   : > { %v3680_v43 = vmul.f32 0.5, %v3679_v42 }
0x1582   : > { %v3681_v44 = vsub.f32 1.5, %v3680_v43 }
0x1584   : > { %v3682_v45 = vmul.f32 %v4253_v40, %v3681_v44 }
0x1586   : > { %v3686_v27 = vsel %vm3685_vm8, %v4253_v40, %v3682_v45 }
0x1587   : > { %v3687_v2 = vmul.f32 %v3686_v27, %v3670_v34 }
0x1589   : > { %3688 = vst.msk [vmem:[%s660_s6] sm:$0xff] %vm877_vm2, %v3687_v2 }
0x158a   : > { %4284 = shalt.err (!%p4281_p3)
}
0x158b   : > { %4135 = dma.vmem_to_hbm [thread:$0]  (%p4465_p5), %s3713_s28, 128, %s3715_s29, %s3690_s2  }
0x158c PF: > { %s5606_s27 = sld [smem:[#allocation5_spill]]  ;;  %p4141_p4 = scmp.ge.s32.totalorder %s4319_s24, 2 }
0x158e   : > { %p4138_p7 = pnand %p4141_p4, %p4469_p6 }
0x1590   : > { %p4139_p8 = pneg %p4138_p7 }
0x1592   : > { %s3732_s1 = sand.u32 1, %s5606_s27  }
0x1593   : > { %s3733_s30 = scalar_lea.sflag [#allocation3], %s3732_s1 }
0x1594   : > { %4302 = dma.done.wait (%p4139_p8), %s3733_s30, 128  }
0x1595   : > { %4304 = vsyncadd (%p4139_p8), %s3733_s30, 4294967168  ;;  %s5608_s24 = sld [smem:[#allocation7_spill]]  ;;  %s5611_s1 = smov %s4311_s22 }
0x1596   : > { %s5609_s26 = sld [smem:[#allocation6_spill]] }
0x1597   : > { %s5610_s23 = sld [smem:[#allocation8_spill]] }
0x159b   : > { %p31_p9 = scmp.ge.s32.totalorder %s5608_s24, 4  }
0x159c   : > { %s5612_s22 = smov %s5609_s26 }
0x159d   :  { %33 = sbr.rel (!%p31_p9) target bundleno = 13 (0xd), region = 174 }
0x15a2   :  { %3755 = vsyncpa [#allocation3], 1 }
0x15a3   :  { %3757 = vsyncpa [#allocation3 + $0x1], 1 }

</bundles_post_ra>
